<compile_context>
chip_gen: v5e
topology: v5e:2x2
jax: 0.10.0
libtpu: 0.0.40
codegen_flags: <defaults>
</compile_context>

<pallas_src>
import functools

import jax
import jax.numpy as jnp
from jax import lax
from jax.experimental import pallas as pl
from jax.experimental.pallas import tpu as pltpu  # noqa: F401  (TPU backend assumed)

MAX_PEP_LEN = 50
NUM_TOKENS = 28
PAD_VOCAB = 128          # lane-dense readout slab; sliced back to NUM_TOKENS outside
LN_EPS = 1e-5


# ----------------------------------------------------------------------------
# In-kernel building blocks (values in VMEM, traced inside the single kernel)
# ----------------------------------------------------------------------------
def _layer_norm(y, g, b, eps=LN_EPS):
    mu = jnp.mean(y, axis=-1, keepdims=True)
    var = jnp.mean(jnp.square(y - mu), axis=-1, keepdims=True)
    return (y - mu) * lax.rsqrt(var + eps) * g + b


def _mha(x_q, kv_in, bias, wq, bq, wkv, bkv, wo, bo, g, b, *, B, Tq, Tk, H, Dh):
    """Fused multi-head attention on flattened slabs.

    x_q  : (B*Tq, D) f32    kv_in: (B*Tk, D) f32    bias: (B, 1, Tk) f32 additive key mask
    wq   : (D, H*Dh) bf16 (softmax scale folded)    wkv: (D, 2*H*Dh) bf16
    wo   : (H*Dh, D) bf16                           biases / LN params f32
    """
    HDh = H * Dh
    # Fused projections over the whole (B*Tq | B*Tk) row slab.
    q = jnp.dot(x_q.astype(jnp.bfloat16), wq,
                preferred_element_type=jnp.float32) + bq            # (B*Tq, H*Dh)
    kv = jnp.dot(kv_in.astype(jnp.bfloat16), wkv,
                 preferred_element_type=jnp.float32) + bkv          # (B*Tk, 2*H*Dh)

    q3 = q.reshape(B, Tq, HDh)
    k3 = kv[:, :HDh].reshape(B, Tk, HDh)
    v3 = kv[:, HDh:].reshape(B, Tk, HDh)

    outs = []
    for h in range(H):        # tiny static unroll; projections already fused above
        sl = slice(h * Dh, (h + 1) * Dh)
        qh = q3[:, :, sl].astype(jnp.bfloat16)                      # (B, Tq, Dh)
        kh = k3[:, :, sl].astype(jnp.bfloat16)                      # (B, Tk, Dh)
        vh = v3[:, :, sl].astype(jnp.bfloat16)                      # (B, Tk, Dh)
        # Batched over B (known-good single-batch-dim dot_general).
        s = jnp.einsum('bqd,bkd->bqk', qh, kh,
                       preferred_element_type=jnp.float32) + bias   # (B, Tq, Tk)
        s = s - jnp.max(s, axis=-1, keepdims=True)
        e = jnp.exp(s)
        p = e * pl.reciprocal(jnp.sum(e, axis=-1, keepdims=True), approx=True)
        outs.append(jnp.einsum('bqk,bkd->bqd', p.astype(jnp.bfloat16), vh,
                               preferred_element_type=jnp.float32))  # (B, Tq, Dh)

    o = jnp.concatenate(outs, axis=-1).reshape(B * Tq, HDh)          # head concat
    y = jnp.dot(o.astype(jnp.bfloat16), wo,
                preferred_element_type=jnp.float32) + bo + x_q       # residual on query
    return _layer_norm(y, g, b)


def _ffn(x, w1, b1, w2, b2, g, b):
    h = jnp.dot(x.astype(jnp.bfloat16), w1, preferred_element_type=jnp.float32) + b1
    h = jnp.maximum(h, 0.0)
    y = jnp.dot(h.astype(jnp.bfloat16), w2, preferred_element_type=jnp.float32) + b2
    return _layer_norm(y + x, g, b)


# ----------------------------------------------------------------------------
# The single fused kernel: pos-attention + n_layers decoder layers + readout
# ----------------------------------------------------------------------------
def _fused_decoder_kernel(
        pos_ref, mask_ref, z_ref, src_ref, smask_ref,
        pa_wq, pa_bq, pa_wkv, pa_bkv, pa_wo, pa_bo, pa_g, pa_b,
        sa_wq, sa_bq, sa_wkv, sa_bkv, sa_wo, sa_bo, sa_g, sa_b,
        ea_wq, ea_bq, ea_wkv, ea_bkv, ea_wo, ea_bo, ea_g, ea_b,
        ff_w1, ff_b1, ff_w2, ff_b2, ff_g, ff_b,
        ro_w, ro_b,
        out_ref, *, B, T, S, D, H, n_layers):
    Dh = D // H

    mask = mask_ref[...]                              # (B, T)  1 = keep, 0 = pad
    smask = smask_ref[...]                            # (B, S)
    self_bias = ((mask - 1.0) * 1e9)[:, None, :]      # (B, 1, T) additive key mask
    src_bias = ((smask - 1.0) * 1e9)[:, None, :]      # (B, 1, S)

    z_flat = z_ref[...].reshape(B * T, D)             # dropout = identity (eval)
    src_flat = src_ref[...].reshape(B * S, D)
    pos_enc = (pos_ref[...] * mask[:, :, None]).reshape(B * T, D)

    # positional attention: q = pos_enc, k = v = z
    ctx = _mha(pos_enc, z_flat, self_bias,
               pa_wq[...], pa_bq[...], pa_wkv[...], pa_bkv[...],
               pa_wo[...], pa_bo[...], pa_g[...], pa_b[...],
               B=B, Tq=T, Tk=T, H=H, Dh=Dh)

    for l in range(n_layers):                         # static unroll; ctx stays in VMEM
        ctx = _mha(ctx, ctx, self_bias,
                   sa_wq[l], sa_bq[l], sa_wkv[l], sa_bkv[l],
                   sa_wo[l], sa_bo[l], sa_g[l], sa_b[l],
                   B=B, Tq=T, Tk=T, H=H, Dh=Dh)       # self-attention
        ctx = _mha(ctx, src_flat, src_bias,
                   ea_wq[l], ea_bq[l], ea_wkv[l], ea_bkv[l],
                   ea_wo[l], ea_bo[l], ea_g[l], ea_b[l],
                   B=B, Tq=T, Tk=S, H=H, Dh=Dh)       # cross-attention
        ctx = _ffn(ctx, ff_w1[l], ff_b1[l], ff_w2[l], ff_b2[l], ff_g[l], ff_b[l])

    # fused readout -> lane-dense (B*T, 128) slab
    out_ref[...] = (jnp.dot(ctx.astype(jnp.bfloat16), ro_w[...],
                            preferred_element_type=jnp.float32) + ro_b[...])


# ----------------------------------------------------------------------------
# Wrapper (exactly one pallas_call per forward)
# ----------------------------------------------------------------------------
_MHA_KEYS = ("wq", "bq", "wkv", "bkv", "wo", "bo", "ln_g", "ln_b")
_FFN_KEYS = ("w1", "b1", "w2", "b2", "ln_g", "ln_b")


def _pad_axis(x, target, axis):
    pad = target - x.shape[axis]
    if pad == 0:
        return x
    widths = [(0, 0)] * x.ndim
    widths[axis] = (0, pad)
    return jnp.pad(x, widths)


def decoder_forward(params, z, mask, src, src_mask, n_heads):
    # z:(B,T,D) mask:(B,T) src:(B,S,D) src_mask:(B,S). Dropout = identity (eval).
    B, T0, D = z.shape
    S0 = src.shape[1]
    # Pad sequence dims to sublane (8) multiples so in-kernel reshapes are tile-aligned.
    T = -(-T0 // 8) * 8
    S = -(-S0 // 8) * 8
    z_p = _pad_axis(z, T, 1)
    mask_p = _pad_axis(mask, T, 1)                    # padded rows masked out (0)
    src_p = _pad_axis(src, S, 1)
    smask_p = _pad_axis(src_mask, S, 1)
    pos_p = _pad_axis(params["pos_table"][:T0], T, 0)

    pa, sa, ea, ff = (params["pos_attn"], params["self_attn"],
                      params["enc_attn"], params["ffn"])
    L = ff["w1"].shape[0]

    args = ([pos_p, mask_p, z_p, src_p, smask_p]
            + [pa[k] for k in _MHA_KEYS]
            + [sa[k] for k in _MHA_KEYS]
            + [ea[k] for k in _MHA_KEYS]
            + [ff[k] for k in _FFN_KEYS]
            + [params["readout_w"], params["readout_b"]])

    out = pl.pallas_call(
        functools.partial(_fused_decoder_kernel,
                          B=B, T=T, S=S, D=D, H=n_heads, n_layers=L),
        out_shape=jax.ShapeDtypeStruct((B * T, PAD_VOCAB), jnp.float32),
    )(*args)
    return out.reshape(B, T, PAD_VOCAB)[:, :T0, :NUM_TOKENS]


# ----------------------------------------------------------------------------
# Deterministic parameter initialization (fused QKV / out-proj layout, bf16 weights)
# ----------------------------------------------------------------------------
def sinusoidal_table(num_embeddings, dim):
    half = dim // 2
    emb = jnp.exp(jnp.arange(half, dtype=jnp.float32) * -(jnp.log(10000.0) / (half - 1)))
    pos = jnp.arange(num_embeddings, dtype=jnp.float32)[:, None] * emb[None, :]
    table = jnp.concatenate([jnp.sin(pos), jnp.cos(pos)], axis=1)
    if dim % 2 == 1:
        table = jnp.concatenate([table, jnp.zeros((num_embeddings, 1))], axis=1)
    return table


def init_mha(key, dim, n_heads):
    dh = dim // n_heads
    scale = 1.0 / float(dh) ** 0.5
    ks = jax.random.split(key, 4)
    s = 0.02
    wq = jax.random.normal(ks[0], (dim, dim), jnp.float32) * s * scale   # scale folded
    wk = jax.random.normal(ks[1], (dim, dim), jnp.float32) * s
    wv = jax.random.normal(ks[2], (dim, dim), jnp.float32) * s
    wo = jax.random.normal(ks[3], (dim, dim), jnp.float32) * s
    return {
        "wq": wq.astype(jnp.bfloat16),
        "bq": jnp.zeros((1, dim), jnp.float32),            # scale-folded (zero init anyway)
        "wkv": jnp.concatenate([wk, wv], axis=1).astype(jnp.bfloat16),   # (D, 2D)
        "bkv": jnp.zeros((1, 2 * dim), jnp.float32),
        "wo": wo.astype(jnp.bfloat16),
        "bo": jnp.zeros((1, dim), jnp.float32),
        "ln_g": jnp.ones((1, dim), jnp.float32),
        "ln_b": jnp.zeros((1, dim), jnp.float32),
    }


def init_ffn(key, dim, hidden):
    k1, k2 = jax.random.split(key)
    s = 0.02
    return {
        "w1": (jax.random.normal(k1, (dim, hidden), jnp.float32) * s).astype(jnp.bfloat16),
        "b1": jnp.zeros((1, hidden), jnp.float32),
        "w2": (jax.random.normal(k2, (hidden, dim), jnp.float32) * s).astype(jnp.bfloat16),
        "b2": jnp.zeros((1, dim), jnp.float32),
        "ln_g": jnp.ones((1, dim), jnp.float32),
        "ln_b": jnp.zeros((1, dim), jnp.float32),
    }


def _stack(dicts):
    return {k: jnp.stack([d[k] for d in dicts], axis=0) for k in dicts[0]}


def init_params(key, latent_dim, hidden_size, n_layers, n_heads):
    keys = jax.random.split(key, 2 + 3 * n_layers)
    self_l, enc_l, ff_l = [], [], []
    for i in range(n_layers):
        self_l.append(init_mha(keys[2 + 3 * i], latent_dim, n_heads))
        enc_l.append(init_mha(keys[3 + 3 * i], latent_dim, n_heads))
        ff_l.append(init_ffn(keys[4 + 3 * i], latent_dim, hidden_size))
    # readout: nn.init.uniform_(-0.1, 0.1), bias = 0 ; zero-padded to 128 lanes
    rw = jax.random.uniform(keys[1], (latent_dim, NUM_TOKENS), jnp.float32,
                            minval=-0.1, maxval=0.1)
    rw_pad = jnp.zeros((latent_dim, PAD_VOCAB), jnp.float32).at[:, :NUM_TOKENS].set(rw)
    return {
        "pos_attn": init_mha(keys[0], latent_dim, n_heads),
        "self_attn": _stack(self_l),     # each leaf has leading layer axis (L, ...)
        "enc_attn": _stack(enc_l),
        "ffn": _stack(ff_l),
        "readout_w": rw_pad.astype(jnp.bfloat16),
        "readout_b": jnp.zeros((1, PAD_VOCAB), jnp.float32),
        "pos_table": sinusoidal_table(MAX_PEP_LEN + 1, latent_dim),
    }


# ----------------------------------------------------------------------------
if __name__ == "__main__":
    B, T, S = 2, 8, 10
    hidden_size, n_layers, n_heads = 32, 2, 2
    latent_dim = hidden_size // 2

    key = jax.random.PRNGKey(0)
    kz, ksrc, kp = jax.random.split(key, 3)

    z = jax.random.normal(kz, (B, T, latent_dim), jnp.float32)
    src = jax.random.normal(ksrc, (B, S, latent_dim), jnp.float32)
    mask = jnp.ones((B, T), jnp.float32).at[1, 6:].set(0.0)        # pad last 2 of batch 1
    src_mask = jnp.ones((B, S), jnp.float32).at[0, 8:].set(0.0)    # pad last 2 of batch 0

    params = init_params(kp, latent_dim, hidden_size, n_layers, n_heads)

    fwd = jax.jit(functools.partial(decoder_forward, n_heads=n_heads))
    out = jax.block_until_ready(fwd(params, z, mask, src, src_mask))

    assert out.shape == (B, T, NUM_TOKENS), out.shape
    assert bool(jnp.all(jnp.isfinite(out)))
    # TODO(synk): loss()/decode() (cross-entropy / log-softmax argmax) are host-side
    # utilities around this forward pass and are not implemented as kernels.
    print("KERNEL_OK")
</pallas_src>

<mosaic_0001>
module attributes {stable_mosaic.version = 11 : i64} {
  func.func @_fused_decoder_kernel(%arg0: memref<8x16xf32, #tpu.memory_space<vmem>>, %arg1: memref<2x8xf32, #tpu.memory_space<vmem>>, %arg2: memref<2x8x16xf32, #tpu.memory_space<vmem>>, %arg3: memref<2x16x16xf32, #tpu.memory_space<vmem>>, %arg4: memref<2x16xf32, #tpu.memory_space<vmem>>, %arg5: memref<16x16xbf16, #tpu.memory_space<vmem>>, %arg6: memref<1x16xf32, #tpu.memory_space<vmem>>, %arg7: memref<16x32xbf16, #tpu.memory_space<vmem>>, %arg8: memref<1x32xf32, #tpu.memory_space<vmem>>, %arg9: memref<16x16xbf16, #tpu.memory_space<vmem>>, %arg10: memref<1x16xf32, #tpu.memory_space<vmem>>, %arg11: memref<1x16xf32, #tpu.memory_space<vmem>>, %arg12: memref<1x16xf32, #tpu.memory_space<vmem>>, %arg13: memref<2x16x16xbf16, #tpu.memory_space<vmem>>, %arg14: memref<2x1x16xf32, #tpu.memory_space<vmem>>, %arg15: memref<2x16x32xbf16, #tpu.memory_space<vmem>>, %arg16: memref<2x1x32xf32, #tpu.memory_space<vmem>>, %arg17: memref<2x16x16xbf16, #tpu.memory_space<vmem>>, %arg18: memref<2x1x16xf32, #tpu.memory_space<vmem>>, %arg19: memref<2x1x16xf32, #tpu.memory_space<vmem>>, %arg20: memref<2x1x16xf32, #tpu.memory_space<vmem>>, %arg21: memref<2x16x16xbf16, #tpu.memory_space<vmem>>, %arg22: memref<2x1x16xf32, #tpu.memory_space<vmem>>, %arg23: memref<2x16x32xbf16, #tpu.memory_space<vmem>>, %arg24: memref<2x1x32xf32, #tpu.memory_space<vmem>>, %arg25: memref<2x16x16xbf16, #tpu.memory_space<vmem>>, %arg26: memref<2x1x16xf32, #tpu.memory_space<vmem>>, %arg27: memref<2x1x16xf32, #tpu.memory_space<vmem>>, %arg28: memref<2x1x16xf32, #tpu.memory_space<vmem>>, %arg29: memref<2x16x32xbf16, #tpu.memory_space<vmem>>, %arg30: memref<2x1x32xf32, #tpu.memory_space<vmem>>, %arg31: memref<2x32x16xbf16, #tpu.memory_space<vmem>>, %arg32: memref<2x1x16xf32, #tpu.memory_space<vmem>>, %arg33: memref<2x1x16xf32, #tpu.memory_space<vmem>>, %arg34: memref<2x1x16xf32, #tpu.memory_space<vmem>>, %arg35: memref<16x128xbf16, #tpu.memory_space<vmem>>, %arg36: memref<1x128xf32, #tpu.memory_space<vmem>>, %arg37: memref<16x128xf32, #tpu.memory_space<vmem>>) attributes {dimension_semantics = [], scalar_prefetch = 0 : i64, scratch_operands = 0 : i64, tpu.core_type = #tpu.core_type<tc>} {
    %c0 = arith.constant 0 : index
    %c0_0 = arith.constant 0 : index
    %0 = vector.load %arg1[%c0, %c0_0] : memref<2x8xf32, #tpu.memory_space<vmem>>, vector<2x8xf32>
    %c0_1 = arith.constant 0 : index
    %c0_2 = arith.constant 0 : index
    %1 = vector.load %arg4[%c0_1, %c0_2] : memref<2x16xf32, #tpu.memory_space<vmem>>, vector<2x16xf32>
    %cst = arith.constant 1.000000e+00 : f32
    %2 = vector.broadcast %cst : f32 to vector<2x8xf32>
    %3 = arith.subf %0, %2 : vector<2x8xf32>
    %cst_3 = arith.constant 1.000000e+09 : f32
    %4 = vector.broadcast %cst_3 : f32 to vector<2x8xf32>
    %5 = arith.mulf %3, %4 : vector<2x8xf32>
    %6 = vector.shape_cast %5 : vector<2x8xf32> to vector<2x1x8xf32>
    %cst_4 = arith.constant 1.000000e+00 : f32
    %7 = vector.broadcast %cst_4 : f32 to vector<2x16xf32>
    %8 = arith.subf %1, %7 : vector<2x16xf32>
    %cst_5 = arith.constant 1.000000e+09 : f32
    %9 = vector.broadcast %cst_5 : f32 to vector<2x16xf32>
    %10 = arith.mulf %8, %9 : vector<2x16xf32>
    %11 = vector.shape_cast %10 : vector<2x16xf32> to vector<2x1x16xf32>
    %c0_6 = arith.constant 0 : index
    %c0_7 = arith.constant 0 : index
    %c0_8 = arith.constant 0 : index
    %12 = vector.load %arg2[%c0_6, %c0_7, %c0_8] : memref<2x8x16xf32, #tpu.memory_space<vmem>>, vector<2x8x16xf32>
    %13 = vector.shape_cast %12 : vector<2x8x16xf32> to vector<16x16xf32>
    %c0_9 = arith.constant 0 : index
    %c0_10 = arith.constant 0 : index
    %c0_11 = arith.constant 0 : index
    %14 = vector.load %arg3[%c0_9, %c0_10, %c0_11] : memref<2x16x16xf32, #tpu.memory_space<vmem>>, vector<2x16x16xf32>
    %15 = vector.shape_cast %14 : vector<2x16x16xf32> to vector<32x16xf32>
    %c0_12 = arith.constant 0 : index
    %c0_13 = arith.constant 0 : index
    %16 = vector.load %arg0[%c0_12, %c0_13] : memref<8x16xf32, #tpu.memory_space<vmem>>, vector<8x16xf32>
    %17 = vector.shape_cast %0 : vector<2x8xf32> to vector<2x8x1xf32>
    %18 = vector.shape_cast %16 : vector<8x16xf32> to vector<1x8x16xf32>
    %19 = vector.broadcast %18 : vector<1x8x16xf32> to vector<2x8x16xf32>
    %20 = vector.broadcast %17 : vector<2x8x1xf32> to vector<2x8x16xf32>
    %21 = arith.mulf %19, %20 : vector<2x8x16xf32>
    %22 = vector.shape_cast %21 : vector<2x8x16xf32> to vector<16x16xf32>
    %c0_14 = arith.constant 0 : index
    %c0_15 = arith.constant 0 : index
    %23 = vector.load %arg5[%c0_14, %c0_15] : memref<16x16xbf16, #tpu.memory_space<vmem>>, vector<16x16xbf16>
    %c0_16 = arith.constant 0 : index
    %c0_17 = arith.constant 0 : index
    %24 = vector.load %arg6[%c0_16, %c0_17] : memref<1x16xf32, #tpu.memory_space<vmem>>, vector<1x16xf32>
    %c0_18 = arith.constant 0 : index
    %c0_19 = arith.constant 0 : index
    %25 = vector.load %arg7[%c0_18, %c0_19] : memref<16x32xbf16, #tpu.memory_space<vmem>>, vector<16x32xbf16>
    %c0_20 = arith.constant 0 : index
    %c0_21 = arith.constant 0 : index
    %26 = vector.load %arg8[%c0_20, %c0_21] : memref<1x32xf32, #tpu.memory_space<vmem>>, vector<1x32xf32>
    %c0_22 = arith.constant 0 : index
    %c0_23 = arith.constant 0 : index
    %27 = vector.load %arg9[%c0_22, %c0_23] : memref<16x16xbf16, #tpu.memory_space<vmem>>, vector<16x16xbf16>
    %c0_24 = arith.constant 0 : index
    %c0_25 = arith.constant 0 : index
    %28 = vector.load %arg10[%c0_24, %c0_25] : memref<1x16xf32, #tpu.memory_space<vmem>>, vector<1x16xf32>
    %c0_26 = arith.constant 0 : index
    %c0_27 = arith.constant 0 : index
    %29 = vector.load %arg11[%c0_26, %c0_27] : memref<1x16xf32, #tpu.memory_space<vmem>>, vector<1x16xf32>
    %c0_28 = arith.constant 0 : index
    %c0_29 = arith.constant 0 : index
    %30 = vector.load %arg12[%c0_28, %c0_29] : memref<1x16xf32, #tpu.memory_space<vmem>>, vector<1x16xf32>
    %31 = arith.truncf %22 : vector<16x16xf32> to vector<16x16xbf16>
    %cst_30 = arith.constant dense<0.000000e+00> : vector<16x16xf32>
    %32 = tpu.matmul %31, %23, %cst_30 {dimension_numbers = #tpu.dot_dimension_numbers<[1], [0], [0], [1], [0, 0, 1, 1], [], []>} : vector<16x16xbf16>, vector<16x16xbf16>, vector<16x16xf32> -> vector<16x16xf32>
    %33 = vector.broadcast %24 : vector<1x16xf32> to vector<16x16xf32>
    %34 = arith.addf %32, %33 : vector<16x16xf32>
    %35 = arith.truncf %13 : vector<16x16xf32> to vector<16x16xbf16>
    %cst_31 = arith.constant dense<0.000000e+00> : vector<16x32xf32>
    %36 = tpu.matmul %35, %25, %cst_31 {dimension_numbers = #tpu.dot_dimension_numbers<[1], [0], [0], [1], [0, 0, 1, 1], [], []>} : vector<16x16xbf16>, vector<16x32xbf16>, vector<16x32xf32> -> vector<16x32xf32>
    %37 = vector.broadcast %26 : vector<1x32xf32> to vector<16x32xf32>
    %38 = arith.addf %36, %37 : vector<16x32xf32>
    %39 = vector.shape_cast %34 : vector<16x16xf32> to vector<2x8x16xf32>
    %40 = vector.extract_strided_slice %38 {offsets = [0, 0], sizes = [16, 16], strides = [1, 1]} : vector<16x32xf32> to vector<16x16xf32>
    %41 = vector.shape_cast %40 : vector<16x16xf32> to vector<2x8x16xf32>
    %42 = vector.extract_strided_slice %38 {offsets = [0, 16], sizes = [16, 16], strides = [1, 1]} : vector<16x32xf32> to vector<16x16xf32>
    %43 = vector.shape_cast %42 : vector<16x16xf32> to vector<2x8x16xf32>
    %44 = vector.extract_strided_slice %39 {offsets = [0, 0, 0], sizes = [2, 8, 8], strides = [1, 1, 1]} : vector<2x8x16xf32> to vector<2x8x8xf32>
    %45 = arith.truncf %44 : vector<2x8x8xf32> to vector<2x8x8xbf16>
    %46 = vector.extract_strided_slice %41 {offsets = [0, 0, 0], sizes = [2, 8, 8], strides = [1, 1, 1]} : vector<2x8x16xf32> to vector<2x8x8xf32>
    %47 = arith.truncf %46 : vector<2x8x8xf32> to vector<2x8x8xbf16>
    %48 = vector.extract_strided_slice %43 {offsets = [0, 0, 0], sizes = [2, 8, 8], strides = [1, 1, 1]} : vector<2x8x16xf32> to vector<2x8x8xf32>
    %49 = arith.truncf %48 : vector<2x8x8xf32> to vector<2x8x8xbf16>
    "tpu.trace_start"() <{level = 10 : i32, message = "bqd,bkd->bqk"}> : () -> ()
    %cst_32 = arith.constant dense<0.000000e+00> : vector<2x8x8xf32>
    %50 = tpu.matmul %45, %47, %cst_32 {dimension_numbers = #tpu.dot_dimension_numbers<[2], [2], [1], [1], [0, 0, 0, 1, 1, 1], [0], [0]>} : vector<2x8x8xbf16>, vector<2x8x8xbf16>, vector<2x8x8xf32> -> vector<2x8x8xf32>
    "tpu.trace_stop"() : () -> ()
    %51 = vector.broadcast %6 : vector<2x1x8xf32> to vector<2x8x8xf32>
    %52 = arith.addf %50, %51 : vector<2x8x8xf32>
    %cst_33 = arith.constant dense<0xFF800000> : vector<2x8xf32>
    %53 = vector.multi_reduction <maximumf>, %52, %cst_33 [2] : vector<2x8x8xf32> to vector<2x8xf32>
    %54 = vector.shape_cast %53 : vector<2x8xf32> to vector<2x8x1xf32>
    %55 = vector.broadcast %54 : vector<2x8x1xf32> to vector<2x8x8xf32>
    %56 = arith.subf %52, %55 : vector<2x8x8xf32>
    %57 = math.exp %56 : vector<2x8x8xf32>
    %cst_34 = arith.constant dense<0.000000e+00> : vector<2x8xf32>
    %58 = vector.multi_reduction <add>, %57, %cst_34 [2] : vector<2x8x8xf32> to vector<2x8xf32>
    %59 = vector.shape_cast %58 : vector<2x8xf32> to vector<2x8x1xf32>
    %60 = tpu.reciprocal %59 {approx = true} : vector<2x8x1xf32> -> vector<2x8x1xf32>
    %61 = vector.broadcast %60 : vector<2x8x1xf32> to vector<2x8x8xf32>
    %62 = arith.mulf %57, %61 : vector<2x8x8xf32>
    %63 = arith.truncf %62 : vector<2x8x8xf32> to vector<2x8x8xbf16>
    "tpu.trace_start"() <{level = 10 : i32, message = "bqk,bkd->bqd"}> : () -> ()
    %cst_35 = arith.constant dense<0.000000e+00> : vector<2x8x8xf32>
    %64 = tpu.matmul %63, %49, %cst_35 {dimension_numbers = #tpu.dot_dimension_numbers<[2], [1], [1], [2], [0, 0, 0, 1, 1, 2], [0], [0]>} : vector<2x8x8xbf16>, vector<2x8x8xbf16>, vector<2x8x8xf32> -> vector<2x8x8xf32>
    "tpu.trace_stop"() : () -> ()
    %65 = vector.extract_strided_slice %39 {offsets = [0, 0, 8], sizes = [2, 8, 8], strides = [1, 1, 1]} : vector<2x8x16xf32> to vector<2x8x8xf32>
    %66 = arith.truncf %65 : vector<2x8x8xf32> to vector<2x8x8xbf16>
    %67 = vector.extract_strided_slice %41 {offsets = [0, 0, 8], sizes = [2, 8, 8], strides = [1, 1, 1]} : vector<2x8x16xf32> to vector<2x8x8xf32>
    %68 = arith.truncf %67 : vector<2x8x8xf32> to vector<2x8x8xbf16>
    %69 = vector.extract_strided_slice %43 {offsets = [0, 0, 8], sizes = [2, 8, 8], strides = [1, 1, 1]} : vector<2x8x16xf32> to vector<2x8x8xf32>
    %70 = arith.truncf %69 : vector<2x8x8xf32> to vector<2x8x8xbf16>
    "tpu.trace_start"() <{level = 10 : i32, message = "bqd,bkd->bqk"}> : () -> ()
    %cst_36 = arith.constant dense<0.000000e+00> : vector<2x8x8xf32>
    %71 = tpu.matmul %66, %68, %cst_36 {dimension_numbers = #tpu.dot_dimension_numbers<[2], [2], [1], [1], [0, 0, 0, 1, 1, 1], [0], [0]>} : vector<2x8x8xbf16>, vector<2x8x8xbf16>, vector<2x8x8xf32> -> vector<2x8x8xf32>
    "tpu.trace_stop"() : () -> ()
    %72 = vector.broadcast %6 : vector<2x1x8xf32> to vector<2x8x8xf32>
    %73 = arith.addf %71, %72 : vector<2x8x8xf32>
    %cst_37 = arith.constant dense<0xFF800000> : vector<2x8xf32>
    %74 = vector.multi_reduction <maximumf>, %73, %cst_37 [2] : vector<2x8x8xf32> to vector<2x8xf32>
    %75 = vector.shape_cast %74 : vector<2x8xf32> to vector<2x8x1xf32>
    %76 = vector.broadcast %75 : vector<2x8x1xf32> to vector<2x8x8xf32>
    %77 = arith.subf %73, %76 : vector<2x8x8xf32>
    %78 = math.exp %77 : vector<2x8x8xf32>
    %cst_38 = arith.constant dense<0.000000e+00> : vector<2x8xf32>
    %79 = vector.multi_reduction <add>, %78, %cst_38 [2] : vector<2x8x8xf32> to vector<2x8xf32>
    %80 = vector.shape_cast %79 : vector<2x8xf32> to vector<2x8x1xf32>
    %81 = tpu.reciprocal %80 {approx = true} : vector<2x8x1xf32> -> vector<2x8x1xf32>
    %82 = vector.broadcast %81 : vector<2x8x1xf32> to vector<2x8x8xf32>
    %83 = arith.mulf %78, %82 : vector<2x8x8xf32>
    %84 = arith.truncf %83 : vector<2x8x8xf32> to vector<2x8x8xbf16>
    "tpu.trace_start"() <{level = 10 : i32, message = "bqk,bkd->bqd"}> : () -> ()
    %cst_39 = arith.constant dense<0.000000e+00> : vector<2x8x8xf32>
    %85 = tpu.matmul %84, %70, %cst_39 {dimension_numbers = #tpu.dot_dimension_numbers<[2], [1], [1], [2], [0, 0, 0, 1, 1, 2], [0], [0]>} : vector<2x8x8xbf16>, vector<2x8x8xbf16>, vector<2x8x8xf32> -> vector<2x8x8xf32>
    "tpu.trace_stop"() : () -> ()
    %86 = tpu.concatenate %64, %85 in 2 : vector<2x8x8xf32>, vector<2x8x8xf32> -> vector<2x8x16xf32>
    %87 = vector.shape_cast %86 : vector<2x8x16xf32> to vector<16x16xf32>
    %88 = arith.truncf %87 : vector<16x16xf32> to vector<16x16xbf16>
    %cst_40 = arith.constant dense<0.000000e+00> : vector<16x16xf32>
    %89 = tpu.matmul %88, %27, %cst_40 {dimension_numbers = #tpu.dot_dimension_numbers<[1], [0], [0], [1], [0, 0, 1, 1], [], []>} : vector<16x16xbf16>, vector<16x16xbf16>, vector<16x16xf32> -> vector<16x16xf32>
    %90 = vector.broadcast %28 : vector<1x16xf32> to vector<16x16xf32>
    %91 = arith.addf %89, %90 : vector<16x16xf32>
    %92 = arith.addf %91, %22 : vector<16x16xf32>
    %cst_41 = arith.constant dense<0.000000e+00> : vector<16xf32>
    %93 = vector.multi_reduction <add>, %92, %cst_41 [1] : vector<16x16xf32> to vector<16xf32>
    %94 = vector.shape_cast %93 : vector<16xf32> to vector<16x1xf32>
    %cst_42 = arith.constant 1.600000e+01 : f32
    %95 = vector.broadcast %cst_42 : f32 to vector<16x1xf32>
    %96 = arith.divf %94, %95 : vector<16x1xf32>
    %97 = vector.broadcast %96 : vector<16x1xf32> to vector<16x16xf32>
    %98 = arith.subf %92, %97 : vector<16x16xf32>
    %99 = arith.mulf %98, %98 : vector<16x16xf32>
    %cst_43 = arith.constant dense<0.000000e+00> : vector<16xf32>
    %100 = vector.multi_reduction <add>, %99, %cst_43 [1] : vector<16x16xf32> to vector<16xf32>
    %101 = vector.shape_cast %100 : vector<16xf32> to vector<16x1xf32>
    %cst_44 = arith.constant 1.600000e+01 : f32
    %102 = vector.broadcast %cst_44 : f32 to vector<16x1xf32>
    %103 = arith.divf %101, %102 : vector<16x1xf32>
    %104 = vector.broadcast %96 : vector<16x1xf32> to vector<16x16xf32>
    %105 = arith.subf %92, %104 : vector<16x16xf32>
    %cst_45 = arith.constant 9.99999974E-6 : f32
    %106 = vector.broadcast %cst_45 : f32 to vector<16x1xf32>
    %107 = arith.addf %103, %106 : vector<16x1xf32>
    %108 = math.rsqrt %107 : vector<16x1xf32>
    %109 = vector.broadcast %108 : vector<16x1xf32> to vector<16x16xf32>
    %110 = arith.mulf %105, %109 : vector<16x16xf32>
    %111 = vector.broadcast %29 : vector<1x16xf32> to vector<16x16xf32>
    %112 = arith.mulf %110, %111 : vector<16x16xf32>
    %113 = vector.broadcast %30 : vector<1x16xf32> to vector<16x16xf32>
    %114 = arith.addf %112, %113 : vector<16x16xf32>
    %c0_46 = arith.constant 0 : index
    %c0_47 = arith.constant 0 : index
    %c0_48 = arith.constant 0 : index
    %115 = vector.load %arg13[%c0_46, %c0_47, %c0_48] : memref<2x16x16xbf16, #tpu.memory_space<vmem>>, vector<1x16x16xbf16>
    %116 = vector.shape_cast %115 : vector<1x16x16xbf16> to vector<16x16xbf16>
    %c0_49 = arith.constant 0 : index
    %c0_50 = arith.constant 0 : index
    %c0_51 = arith.constant 0 : index
    %117 = vector.load %arg14[%c0_49, %c0_50, %c0_51] : memref<2x1x16xf32, #tpu.memory_space<vmem>>, vector<1x1x16xf32>
    %118 = vector.shape_cast %117 : vector<1x1x16xf32> to vector<1x16xf32>
    %c0_52 = arith.constant 0 : index
    %c0_53 = arith.constant 0 : index
    %c0_54 = arith.constant 0 : index
    %119 = vector.load %arg15[%c0_52, %c0_53, %c0_54] : memref<2x16x32xbf16, #tpu.memory_space<vmem>>, vector<1x16x32xbf16>
    %120 = vector.shape_cast %119 : vector<1x16x32xbf16> to vector<16x32xbf16>
    %c0_55 = arith.constant 0 : index
    %c0_56 = arith.constant 0 : index
    %c0_57 = arith.constant 0 : index
    %121 = vector.load %arg16[%c0_55, %c0_56, %c0_57] : memref<2x1x32xf32, #tpu.memory_space<vmem>>, vector<1x1x32xf32>
    %122 = vector.shape_cast %121 : vector<1x1x32xf32> to vector<1x32xf32>
    %c0_58 = arith.constant 0 : index
    %c0_59 = arith.constant 0 : index
    %c0_60 = arith.constant 0 : index
    %123 = vector.load %arg17[%c0_58, %c0_59, %c0_60] : memref<2x16x16xbf16, #tpu.memory_space<vmem>>, vector<1x16x16xbf16>
    %124 = vector.shape_cast %123 : vector<1x16x16xbf16> to vector<16x16xbf16>
    %c0_61 = arith.constant 0 : index
    %c0_62 = arith.constant 0 : index
    %c0_63 = arith.constant 0 : index
    %125 = vector.load %arg18[%c0_61, %c0_62, %c0_63] : memref<2x1x16xf32, #tpu.memory_space<vmem>>, vector<1x1x16xf32>
    %126 = vector.shape_cast %125 : vector<1x1x16xf32> to vector<1x16xf32>
    %c0_64 = arith.constant 0 : index
    %c0_65 = arith.constant 0 : index
    %c0_66 = arith.constant 0 : index
    %127 = vector.load %arg19[%c0_64, %c0_65, %c0_66] : memref<2x1x16xf32, #tpu.memory_space<vmem>>, vector<1x1x16xf32>
    %128 = vector.shape_cast %127 : vector<1x1x16xf32> to vector<1x16xf32>
    %c0_67 = arith.constant 0 : index
    %c0_68 = arith.constant 0 : index
    %c0_69 = arith.constant 0 : index
    %129 = vector.load %arg20[%c0_67, %c0_68, %c0_69] : memref<2x1x16xf32, #tpu.memory_space<vmem>>, vector<1x1x16xf32>
    %130 = vector.shape_cast %129 : vector<1x1x16xf32> to vector<1x16xf32>
    %131 = arith.truncf %114 : vector<16x16xf32> to vector<16x16xbf16>
    %cst_70 = arith.constant dense<0.000000e+00> : vector<16x16xf32>
    %132 = tpu.matmul %131, %116, %cst_70 {dimension_numbers = #tpu.dot_dimension_numbers<[1], [0], [0], [1], [0, 0, 1, 1], [], []>} : vector<16x16xbf16>, vector<16x16xbf16>, vector<16x16xf32> -> vector<16x16xf32>
    %133 = vector.broadcast %118 : vector<1x16xf32> to vector<16x16xf32>
    %134 = arith.addf %132, %133 : vector<16x16xf32>
    %135 = arith.truncf %114 : vector<16x16xf32> to vector<16x16xbf16>
    %cst_71 = arith.constant dense<0.000000e+00> : vector<16x32xf32>
    %136 = tpu.matmul %135, %120, %cst_71 {dimension_numbers = #tpu.dot_dimension_numbers<[1], [0], [0], [1], [0, 0, 1, 1], [], []>} : vector<16x16xbf16>, vector<16x32xbf16>, vector<16x32xf32> -> vector<16x32xf32>
    %137 = vector.broadcast %122 : vector<1x32xf32> to vector<16x32xf32>
    %138 = arith.addf %136, %137 : vector<16x32xf32>
    %139 = vector.shape_cast %134 : vector<16x16xf32> to vector<2x8x16xf32>
    %140 = vector.extract_strided_slice %138 {offsets = [0, 0], sizes = [16, 16], strides = [1, 1]} : vector<16x32xf32> to vector<16x16xf32>
    %141 = vector.shape_cast %140 : vector<16x16xf32> to vector<2x8x16xf32>
    %142 = vector.extract_strided_slice %138 {offsets = [0, 16], sizes = [16, 16], strides = [1, 1]} : vector<16x32xf32> to vector<16x16xf32>
    %143 = vector.shape_cast %142 : vector<16x16xf32> to vector<2x8x16xf32>
    %144 = vector.extract_strided_slice %139 {offsets = [0, 0, 0], sizes = [2, 8, 8], strides = [1, 1, 1]} : vector<2x8x16xf32> to vector<2x8x8xf32>
    %145 = arith.truncf %144 : vector<2x8x8xf32> to vector<2x8x8xbf16>
    %146 = vector.extract_strided_slice %141 {offsets = [0, 0, 0], sizes = [2, 8, 8], strides = [1, 1, 1]} : vector<2x8x16xf32> to vector<2x8x8xf32>
    %147 = arith.truncf %146 : vector<2x8x8xf32> to vector<2x8x8xbf16>
    %148 = vector.extract_strided_slice %143 {offsets = [0, 0, 0], sizes = [2, 8, 8], strides = [1, 1, 1]} : vector<2x8x16xf32> to vector<2x8x8xf32>
    %149 = arith.truncf %148 : vector<2x8x8xf32> to vector<2x8x8xbf16>
    "tpu.trace_start"() <{level = 10 : i32, message = "bqd,bkd->bqk"}> : () -> ()
    %cst_72 = arith.constant dense<0.000000e+00> : vector<2x8x8xf32>
    %150 = tpu.matmul %145, %147, %cst_72 {dimension_numbers = #tpu.dot_dimension_numbers<[2], [2], [1], [1], [0, 0, 0, 1, 1, 1], [0], [0]>} : vector<2x8x8xbf16>, vector<2x8x8xbf16>, vector<2x8x8xf32> -> vector<2x8x8xf32>
    "tpu.trace_stop"() : () -> ()
    %151 = vector.broadcast %6 : vector<2x1x8xf32> to vector<2x8x8xf32>
    %152 = arith.addf %150, %151 : vector<2x8x8xf32>
    %cst_73 = arith.constant dense<0xFF800000> : vector<2x8xf32>
    %153 = vector.multi_reduction <maximumf>, %152, %cst_73 [2] : vector<2x8x8xf32> to vector<2x8xf32>
    %154 = vector.shape_cast %153 : vector<2x8xf32> to vector<2x8x1xf32>
    %155 = vector.broadcast %154 : vector<2x8x1xf32> to vector<2x8x8xf32>
    %156 = arith.subf %152, %155 : vector<2x8x8xf32>
    %157 = math.exp %156 : vector<2x8x8xf32>
    %cst_74 = arith.constant dense<0.000000e+00> : vector<2x8xf32>
    %158 = vector.multi_reduction <add>, %157, %cst_74 [2] : vector<2x8x8xf32> to vector<2x8xf32>
    %159 = vector.shape_cast %158 : vector<2x8xf32> to vector<2x8x1xf32>
    %160 = tpu.reciprocal %159 {approx = true} : vector<2x8x1xf32> -> vector<2x8x1xf32>
    %161 = vector.broadcast %160 : vector<2x8x1xf32> to vector<2x8x8xf32>
    %162 = arith.mulf %157, %161 : vector<2x8x8xf32>
    %163 = arith.truncf %162 : vector<2x8x8xf32> to vector<2x8x8xbf16>
    "tpu.trace_start"() <{level = 10 : i32, message = "bqk,bkd->bqd"}> : () -> ()
    %cst_75 = arith.constant dense<0.000000e+00> : vector<2x8x8xf32>
    %164 = tpu.matmul %163, %149, %cst_75 {dimension_numbers = #tpu.dot_dimension_numbers<[2], [1], [1], [2], [0, 0, 0, 1, 1, 2], [0], [0]>} : vector<2x8x8xbf16>, vector<2x8x8xbf16>, vector<2x8x8xf32> -> vector<2x8x8xf32>
    "tpu.trace_stop"() : () -> ()
    %165 = vector.extract_strided_slice %139 {offsets = [0, 0, 8], sizes = [2, 8, 8], strides = [1, 1, 1]} : vector<2x8x16xf32> to vector<2x8x8xf32>
    %166 = arith.truncf %165 : vector<2x8x8xf32> to vector<2x8x8xbf16>
    %167 = vector.extract_strided_slice %141 {offsets = [0, 0, 8], sizes = [2, 8, 8], strides = [1, 1, 1]} : vector<2x8x16xf32> to vector<2x8x8xf32>
    %168 = arith.truncf %167 : vector<2x8x8xf32> to vector<2x8x8xbf16>
    %169 = vector.extract_strided_slice %143 {offsets = [0, 0, 8], sizes = [2, 8, 8], strides = [1, 1, 1]} : vector<2x8x16xf32> to vector<2x8x8xf32>
    %170 = arith.truncf %169 : vector<2x8x8xf32> to vector<2x8x8xbf16>
    "tpu.trace_start"() <{level = 10 : i32, message = "bqd,bkd->bqk"}> : () -> ()
    %cst_76 = arith.constant dense<0.000000e+00> : vector<2x8x8xf32>
    %171 = tpu.matmul %166, %168, %cst_76 {dimension_numbers = #tpu.dot_dimension_numbers<[2], [2], [1], [1], [0, 0, 0, 1, 1, 1], [0], [0]>} : vector<2x8x8xbf16>, vector<2x8x8xbf16>, vector<2x8x8xf32> -> vector<2x8x8xf32>
    "tpu.trace_stop"() : () -> ()
    %172 = vector.broadcast %6 : vector<2x1x8xf32> to vector<2x8x8xf32>
    %173 = arith.addf %171, %172 : vector<2x8x8xf32>
    %cst_77 = arith.constant dense<0xFF800000> : vector<2x8xf32>
    %174 = vector.multi_reduction <maximumf>, %173, %cst_77 [2] : vector<2x8x8xf32> to vector<2x8xf32>
    %175 = vector.shape_cast %174 : vector<2x8xf32> to vector<2x8x1xf32>
    %176 = vector.broadcast %175 : vector<2x8x1xf32> to vector<2x8x8xf32>
    %177 = arith.subf %173, %176 : vector<2x8x8xf32>
    %178 = math.exp %177 : vector<2x8x8xf32>
    %cst_78 = arith.constant dense<0.000000e+00> : vector<2x8xf32>
    %179 = vector.multi_reduction <add>, %178, %cst_78 [2] : vector<2x8x8xf32> to vector<2x8xf32>
    %180 = vector.shape_cast %179 : vector<2x8xf32> to vector<2x8x1xf32>
    %181 = tpu.reciprocal %180 {approx = true} : vector<2x8x1xf32> -> vector<2x8x1xf32>
    %182 = vector.broadcast %181 : vector<2x8x1xf32> to vector<2x8x8xf32>
    %183 = arith.mulf %178, %182 : vector<2x8x8xf32>
    %184 = arith.truncf %183 : vector<2x8x8xf32> to vector<2x8x8xbf16>
    "tpu.trace_start"() <{level = 10 : i32, message = "bqk,bkd->bqd"}> : () -> ()
    %cst_79 = arith.constant dense<0.000000e+00> : vector<2x8x8xf32>
    %185 = tpu.matmul %184, %170, %cst_79 {dimension_numbers = #tpu.dot_dimension_numbers<[2], [1], [1], [2], [0, 0, 0, 1, 1, 2], [0], [0]>} : vector<2x8x8xbf16>, vector<2x8x8xbf16>, vector<2x8x8xf32> -> vector<2x8x8xf32>
    "tpu.trace_stop"() : () -> ()
    %186 = tpu.concatenate %164, %185 in 2 : vector<2x8x8xf32>, vector<2x8x8xf32> -> vector<2x8x16xf32>
    %187 = vector.shape_cast %186 : vector<2x8x16xf32> to vector<16x16xf32>
    %188 = arith.truncf %187 : vector<16x16xf32> to vector<16x16xbf16>
    %cst_80 = arith.constant dense<0.000000e+00> : vector<16x16xf32>
    %189 = tpu.matmul %188, %124, %cst_80 {dimension_numbers = #tpu.dot_dimension_numbers<[1], [0], [0], [1], [0, 0, 1, 1], [], []>} : vector<16x16xbf16>, vector<16x16xbf16>, vector<16x16xf32> -> vector<16x16xf32>
    %190 = vector.broadcast %126 : vector<1x16xf32> to vector<16x16xf32>
    %191 = arith.addf %189, %190 : vector<16x16xf32>
    %192 = arith.addf %191, %114 : vector<16x16xf32>
    %cst_81 = arith.constant dense<0.000000e+00> : vector<16xf32>
    %193 = vector.multi_reduction <add>, %192, %cst_81 [1] : vector<16x16xf32> to vector<16xf32>
    %194 = vector.shape_cast %193 : vector<16xf32> to vector<16x1xf32>
    %cst_82 = arith.constant 1.600000e+01 : f32
    %195 = vector.broadcast %cst_82 : f32 to vector<16x1xf32>
    %196 = arith.divf %194, %195 : vector<16x1xf32>
    %197 = vector.broadcast %196 : vector<16x1xf32> to vector<16x16xf32>
    %198 = arith.subf %192, %197 : vector<16x16xf32>
    %199 = arith.mulf %198, %198 : vector<16x16xf32>
    %cst_83 = arith.constant dense<0.000000e+00> : vector<16xf32>
    %200 = vector.multi_reduction <add>, %199, %cst_83 [1] : vector<16x16xf32> to vector<16xf32>
    %201 = vector.shape_cast %200 : vector<16xf32> to vector<16x1xf32>
    %cst_84 = arith.constant 1.600000e+01 : f32
    %202 = vector.broadcast %cst_84 : f32 to vector<16x1xf32>
    %203 = arith.divf %201, %202 : vector<16x1xf32>
    %204 = vector.broadcast %196 : vector<16x1xf32> to vector<16x16xf32>
    %205 = arith.subf %192, %204 : vector<16x16xf32>
    %cst_85 = arith.constant 9.99999974E-6 : f32
    %206 = vector.broadcast %cst_85 : f32 to vector<16x1xf32>
    %207 = arith.addf %203, %206 : vector<16x1xf32>
    %208 = math.rsqrt %207 : vector<16x1xf32>
    %209 = vector.broadcast %208 : vector<16x1xf32> to vector<16x16xf32>
    %210 = arith.mulf %205, %209 : vector<16x16xf32>
    %211 = vector.broadcast %128 : vector<1x16xf32> to vector<16x16xf32>
    %212 = arith.mulf %210, %211 : vector<16x16xf32>
    %213 = vector.broadcast %130 : vector<1x16xf32> to vector<16x16xf32>
    %214 = arith.addf %212, %213 : vector<16x16xf32>
    %c0_86 = arith.constant 0 : index
    %c0_87 = arith.constant 0 : index
    %c0_88 = arith.constant 0 : index
    %215 = vector.load %arg21[%c0_86, %c0_87, %c0_88] : memref<2x16x16xbf16, #tpu.memory_space<vmem>>, vector<1x16x16xbf16>
    %216 = vector.shape_cast %215 : vector<1x16x16xbf16> to vector<16x16xbf16>
    %c0_89 = arith.constant 0 : index
    %c0_90 = arith.constant 0 : index
    %c0_91 = arith.constant 0 : index
    %217 = vector.load %arg22[%c0_89, %c0_90, %c0_91] : memref<2x1x16xf32, #tpu.memory_space<vmem>>, vector<1x1x16xf32>
    %218 = vector.shape_cast %217 : vector<1x1x16xf32> to vector<1x16xf32>
    %c0_92 = arith.constant 0 : index
    %c0_93 = arith.constant 0 : index
    %c0_94 = arith.constant 0 : index
    %219 = vector.load %arg23[%c0_92, %c0_93, %c0_94] : memref<2x16x32xbf16, #tpu.memory_space<vmem>>, vector<1x16x32xbf16>
    %220 = vector.shape_cast %219 : vector<1x16x32xbf16> to vector<16x32xbf16>
    %c0_95 = arith.constant 0 : index
    %c0_96 = arith.constant 0 : index
    %c0_97 = arith.constant 0 : index
    %221 = vector.load %arg24[%c0_95, %c0_96, %c0_97] : memref<2x1x32xf32, #tpu.memory_space<vmem>>, vector<1x1x32xf32>
    %222 = vector.shape_cast %221 : vector<1x1x32xf32> to vector<1x32xf32>
    %c0_98 = arith.constant 0 : index
    %c0_99 = arith.constant 0 : index
    %c0_100 = arith.constant 0 : index
    %223 = vector.load %arg25[%c0_98, %c0_99, %c0_100] : memref<2x16x16xbf16, #tpu.memory_space<vmem>>, vector<1x16x16xbf16>
    %224 = vector.shape_cast %223 : vector<1x16x16xbf16> to vector<16x16xbf16>
    %c0_101 = arith.constant 0 : index
    %c0_102 = arith.constant 0 : index
    %c0_103 = arith.constant 0 : index
    %225 = vector.load %arg26[%c0_101, %c0_102, %c0_103] : memref<2x1x16xf32, #tpu.memory_space<vmem>>, vector<1x1x16xf32>
    %226 = vector.shape_cast %225 : vector<1x1x16xf32> to vector<1x16xf32>
    %c0_104 = arith.constant 0 : index
    %c0_105 = arith.constant 0 : index
    %c0_106 = arith.constant 0 : index
    %227 = vector.load %arg27[%c0_104, %c0_105, %c0_106] : memref<2x1x16xf32, #tpu.memory_space<vmem>>, vector<1x1x16xf32>
    %228 = vector.shape_cast %227 : vector<1x1x16xf32> to vector<1x16xf32>
    %c0_107 = arith.constant 0 : index
    %c0_108 = arith.constant 0 : index
    %c0_109 = arith.constant 0 : index
    %229 = vector.load %arg28[%c0_107, %c0_108, %c0_109] : memref<2x1x16xf32, #tpu.memory_space<vmem>>, vector<1x1x16xf32>
    %230 = vector.shape_cast %229 : vector<1x1x16xf32> to vector<1x16xf32>
    %231 = arith.truncf %214 : vector<16x16xf32> to vector<16x16xbf16>
    %cst_110 = arith.constant dense<0.000000e+00> : vector<16x16xf32>
    %232 = tpu.matmul %231, %216, %cst_110 {dimension_numbers = #tpu.dot_dimension_numbers<[1], [0], [0], [1], [0, 0, 1, 1], [], []>} : vector<16x16xbf16>, vector<16x16xbf16>, vector<16x16xf32> -> vector<16x16xf32>
    %233 = vector.broadcast %218 : vector<1x16xf32> to vector<16x16xf32>
    %234 = arith.addf %232, %233 : vector<16x16xf32>
    %235 = arith.truncf %15 : vector<32x16xf32> to vector<32x16xbf16>
    %cst_111 = arith.constant dense<0.000000e+00> : vector<32x32xf32>
    %236 = tpu.matmul %235, %220, %cst_111 {dimension_numbers = #tpu.dot_dimension_numbers<[1], [0], [0], [1], [0, 0, 1, 1], [], []>} : vector<32x16xbf16>, vector<16x32xbf16>, vector<32x32xf32> -> vector<32x32xf32>
    %237 = vector.broadcast %222 : vector<1x32xf32> to vector<32x32xf32>
    %238 = arith.addf %236, %237 : vector<32x32xf32>
    %239 = vector.shape_cast %234 : vector<16x16xf32> to vector<2x8x16xf32>
    %240 = vector.extract_strided_slice %238 {offsets = [0, 0], sizes = [32, 16], strides = [1, 1]} : vector<32x32xf32> to vector<32x16xf32>
    %241 = vector.shape_cast %240 : vector<32x16xf32> to vector<2x16x16xf32>
    %242 = vector.extract_strided_slice %238 {offsets = [0, 16], sizes = [32, 16], strides = [1, 1]} : vector<32x32xf32> to vector<32x16xf32>
    %243 = vector.shape_cast %242 : vector<32x16xf32> to vector<2x16x16xf32>
    %244 = vector.extract_strided_slice %239 {offsets = [0, 0, 0], sizes = [2, 8, 8], strides = [1, 1, 1]} : vector<2x8x16xf32> to vector<2x8x8xf32>
    %245 = arith.truncf %244 : vector<2x8x8xf32> to vector<2x8x8xbf16>
    %246 = vector.extract_strided_slice %241 {offsets = [0, 0, 0], sizes = [2, 16, 8], strides = [1, 1, 1]} : vector<2x16x16xf32> to vector<2x16x8xf32>
    %247 = arith.truncf %246 : vector<2x16x8xf32> to vector<2x16x8xbf16>
    %248 = vector.extract_strided_slice %243 {offsets = [0, 0, 0], sizes = [2, 16, 8], strides = [1, 1, 1]} : vector<2x16x16xf32> to vector<2x16x8xf32>
    %249 = arith.truncf %248 : vector<2x16x8xf32> to vector<2x16x8xbf16>
    "tpu.trace_start"() <{level = 10 : i32, message = "bqd,bkd->bqk"}> : () -> ()
    %cst_112 = arith.constant dense<0.000000e+00> : vector<2x8x16xf32>
    %250 = tpu.matmul %245, %247, %cst_112 {dimension_numbers = #tpu.dot_dimension_numbers<[2], [2], [1], [1], [0, 0, 0, 1, 1, 1], [0], [0]>} : vector<2x8x8xbf16>, vector<2x16x8xbf16>, vector<2x8x16xf32> -> vector<2x8x16xf32>
    "tpu.trace_stop"() : () -> ()
    %251 = vector.broadcast %11 : vector<2x1x16xf32> to vector<2x8x16xf32>
    %252 = arith.addf %250, %251 : vector<2x8x16xf32>
    %cst_113 = arith.constant dense<0xFF800000> : vector<2x8xf32>
    %253 = vector.multi_reduction <maximumf>, %252, %cst_113 [2] : vector<2x8x16xf32> to vector<2x8xf32>
    %254 = vector.shape_cast %253 : vector<2x8xf32> to vector<2x8x1xf32>
    %255 = vector.broadcast %254 : vector<2x8x1xf32> to vector<2x8x16xf32>
    %256 = arith.subf %252, %255 : vector<2x8x16xf32>
    %257 = math.exp %256 : vector<2x8x16xf32>
    %cst_114 = arith.constant dense<0.000000e+00> : vector<2x8xf32>
    %258 = vector.multi_reduction <add>, %257, %cst_114 [2] : vector<2x8x16xf32> to vector<2x8xf32>
    %259 = vector.shape_cast %258 : vector<2x8xf32> to vector<2x8x1xf32>
    %260 = tpu.reciprocal %259 {approx = true} : vector<2x8x1xf32> -> vector<2x8x1xf32>
    %261 = vector.broadcast %260 : vector<2x8x1xf32> to vector<2x8x16xf32>
    %262 = arith.mulf %257, %261 : vector<2x8x16xf32>
    %263 = arith.truncf %262 : vector<2x8x16xf32> to vector<2x8x16xbf16>
    "tpu.trace_start"() <{level = 10 : i32, message = "bqk,bkd->bqd"}> : () -> ()
    %cst_115 = arith.constant dense<0.000000e+00> : vector<2x8x8xf32>
    %264 = tpu.matmul %263, %249, %cst_115 {dimension_numbers = #tpu.dot_dimension_numbers<[2], [1], [1], [2], [0, 0, 0, 1, 1, 2], [0], [0]>} : vector<2x8x16xbf16>, vector<2x16x8xbf16>, vector<2x8x8xf32> -> vector<2x8x8xf32>
    "tpu.trace_stop"() : () -> ()
    %265 = vector.extract_strided_slice %239 {offsets = [0, 0, 8], sizes = [2, 8, 8], strides = [1, 1, 1]} : vector<2x8x16xf32> to vector<2x8x8xf32>
    %266 = arith.truncf %265 : vector<2x8x8xf32> to vector<2x8x8xbf16>
    %267 = vector.extract_strided_slice %241 {offsets = [0, 0, 8], sizes = [2, 16, 8], strides = [1, 1, 1]} : vector<2x16x16xf32> to vector<2x16x8xf32>
    %268 = arith.truncf %267 : vector<2x16x8xf32> to vector<2x16x8xbf16>
    %269 = vector.extract_strided_slice %243 {offsets = [0, 0, 8], sizes = [2, 16, 8], strides = [1, 1, 1]} : vector<2x16x16xf32> to vector<2x16x8xf32>
    %270 = arith.truncf %269 : vector<2x16x8xf32> to vector<2x16x8xbf16>
    "tpu.trace_start"() <{level = 10 : i32, message = "bqd,bkd->bqk"}> : () -> ()
    %cst_116 = arith.constant dense<0.000000e+00> : vector<2x8x16xf32>
    %271 = tpu.matmul %266, %268, %cst_116 {dimension_numbers = #tpu.dot_dimension_numbers<[2], [2], [1], [1], [0, 0, 0, 1, 1, 1], [0], [0]>} : vector<2x8x8xbf16>, vector<2x16x8xbf16>, vector<2x8x16xf32> -> vector<2x8x16xf32>
    "tpu.trace_stop"() : () -> ()
    %272 = vector.broadcast %11 : vector<2x1x16xf32> to vector<2x8x16xf32>
    %273 = arith.addf %271, %272 : vector<2x8x16xf32>
    %cst_117 = arith.constant dense<0xFF800000> : vector<2x8xf32>
    %274 = vector.multi_reduction <maximumf>, %273, %cst_117 [2] : vector<2x8x16xf32> to vector<2x8xf32>
    %275 = vector.shape_cast %274 : vector<2x8xf32> to vector<2x8x1xf32>
    %276 = vector.broadcast %275 : vector<2x8x1xf32> to vector<2x8x16xf32>
    %277 = arith.subf %273, %276 : vector<2x8x16xf32>
    %278 = math.exp %277 : vector<2x8x16xf32>
    %cst_118 = arith.constant dense<0.000000e+00> : vector<2x8xf32>
    %279 = vector.multi_reduction <add>, %278, %cst_118 [2] : vector<2x8x16xf32> to vector<2x8xf32>
    %280 = vector.shape_cast %279 : vector<2x8xf32> to vector<2x8x1xf32>
    %281 = tpu.reciprocal %280 {approx = true} : vector<2x8x1xf32> -> vector<2x8x1xf32>
    %282 = vector.broadcast %281 : vector<2x8x1xf32> to vector<2x8x16xf32>
    %283 = arith.mulf %278, %282 : vector<2x8x16xf32>
    %284 = arith.truncf %283 : vector<2x8x16xf32> to vector<2x8x16xbf16>
    "tpu.trace_start"() <{level = 10 : i32, message = "bqk,bkd->bqd"}> : () -> ()
    %cst_119 = arith.constant dense<0.000000e+00> : vector<2x8x8xf32>
    %285 = tpu.matmul %284, %270, %cst_119 {dimension_numbers = #tpu.dot_dimension_numbers<[2], [1], [1], [2], [0, 0, 0, 1, 1, 2], [0], [0]>} : vector<2x8x16xbf16>, vector<2x16x8xbf16>, vector<2x8x8xf32> -> vector<2x8x8xf32>
    "tpu.trace_stop"() : () -> ()
    %286 = tpu.concatenate %264, %285 in 2 : vector<2x8x8xf32>, vector<2x8x8xf32> -> vector<2x8x16xf32>
    %287 = vector.shape_cast %286 : vector<2x8x16xf32> to vector<16x16xf32>
    %288 = arith.truncf %287 : vector<16x16xf32> to vector<16x16xbf16>
    %cst_120 = arith.constant dense<0.000000e+00> : vector<16x16xf32>
    %289 = tpu.matmul %288, %224, %cst_120 {dimension_numbers = #tpu.dot_dimension_numbers<[1], [0], [0], [1], [0, 0, 1, 1], [], []>} : vector<16x16xbf16>, vector<16x16xbf16>, vector<16x16xf32> -> vector<16x16xf32>
    %290 = vector.broadcast %226 : vector<1x16xf32> to vector<16x16xf32>
    %291 = arith.addf %289, %290 : vector<16x16xf32>
    %292 = arith.addf %291, %214 : vector<16x16xf32>
    %cst_121 = arith.constant dense<0.000000e+00> : vector<16xf32>
    %293 = vector.multi_reduction <add>, %292, %cst_121 [1] : vector<16x16xf32> to vector<16xf32>
    %294 = vector.shape_cast %293 : vector<16xf32> to vector<16x1xf32>
    %cst_122 = arith.constant 1.600000e+01 : f32
    %295 = vector.broadcast %cst_122 : f32 to vector<16x1xf32>
    %296 = arith.divf %294, %295 : vector<16x1xf32>
    %297 = vector.broadcast %296 : vector<16x1xf32> to vector<16x16xf32>
    %298 = arith.subf %292, %297 : vector<16x16xf32>
    %299 = arith.mulf %298, %298 : vector<16x16xf32>
    %cst_123 = arith.constant dense<0.000000e+00> : vector<16xf32>
    %300 = vector.multi_reduction <add>, %299, %cst_123 [1] : vector<16x16xf32> to vector<16xf32>
    %301 = vector.shape_cast %300 : vector<16xf32> to vector<16x1xf32>
    %cst_124 = arith.constant 1.600000e+01 : f32
    %302 = vector.broadcast %cst_124 : f32 to vector<16x1xf32>
    %303 = arith.divf %301, %302 : vector<16x1xf32>
    %304 = vector.broadcast %296 : vector<16x1xf32> to vector<16x16xf32>
    %305 = arith.subf %292, %304 : vector<16x16xf32>
    %cst_125 = arith.constant 9.99999974E-6 : f32
    %306 = vector.broadcast %cst_125 : f32 to vector<16x1xf32>
    %307 = arith.addf %303, %306 : vector<16x1xf32>
    %308 = math.rsqrt %307 : vector<16x1xf32>
    %309 = vector.broadcast %308 : vector<16x1xf32> to vector<16x16xf32>
    %310 = arith.mulf %305, %309 : vector<16x16xf32>
    %311 = vector.broadcast %228 : vector<1x16xf32> to vector<16x16xf32>
    %312 = arith.mulf %310, %311 : vector<16x16xf32>
    %313 = vector.broadcast %230 : vector<1x16xf32> to vector<16x16xf32>
    %314 = arith.addf %312, %313 : vector<16x16xf32>
    %c0_126 = arith.constant 0 : index
    %c0_127 = arith.constant 0 : index
    %c0_128 = arith.constant 0 : index
    %315 = vector.load %arg29[%c0_126, %c0_127, %c0_128] : memref<2x16x32xbf16, #tpu.memory_space<vmem>>, vector<1x16x32xbf16>
    %316 = vector.shape_cast %315 : vector<1x16x32xbf16> to vector<16x32xbf16>
    %c0_129 = arith.constant 0 : index
    %c0_130 = arith.constant 0 : index
    %c0_131 = arith.constant 0 : index
    %317 = vector.load %arg30[%c0_129, %c0_130, %c0_131] : memref<2x1x32xf32, #tpu.memory_space<vmem>>, vector<1x1x32xf32>
    %318 = vector.shape_cast %317 : vector<1x1x32xf32> to vector<1x32xf32>
    %c0_132 = arith.constant 0 : index
    %c0_133 = arith.constant 0 : index
    %c0_134 = arith.constant 0 : index
    %319 = vector.load %arg31[%c0_132, %c0_133, %c0_134] : memref<2x32x16xbf16, #tpu.memory_space<vmem>>, vector<1x32x16xbf16>
    %320 = vector.shape_cast %319 : vector<1x32x16xbf16> to vector<32x16xbf16>
    %c0_135 = arith.constant 0 : index
    %c0_136 = arith.constant 0 : index
    %c0_137 = arith.constant 0 : index
    %321 = vector.load %arg32[%c0_135, %c0_136, %c0_137] : memref<2x1x16xf32, #tpu.memory_space<vmem>>, vector<1x1x16xf32>
    %322 = vector.shape_cast %321 : vector<1x1x16xf32> to vector<1x16xf32>
    %c0_138 = arith.constant 0 : index
    %c0_139 = arith.constant 0 : index
    %c0_140 = arith.constant 0 : index
    %323 = vector.load %arg33[%c0_138, %c0_139, %c0_140] : memref<2x1x16xf32, #tpu.memory_space<vmem>>, vector<1x1x16xf32>
    %324 = vector.shape_cast %323 : vector<1x1x16xf32> to vector<1x16xf32>
    %c0_141 = arith.constant 0 : index
    %c0_142 = arith.constant 0 : index
    %c0_143 = arith.constant 0 : index
    %325 = vector.load %arg34[%c0_141, %c0_142, %c0_143] : memref<2x1x16xf32, #tpu.memory_space<vmem>>, vector<1x1x16xf32>
    %326 = vector.shape_cast %325 : vector<1x1x16xf32> to vector<1x16xf32>
    %327 = arith.truncf %314 : vector<16x16xf32> to vector<16x16xbf16>
    %cst_144 = arith.constant dense<0.000000e+00> : vector<16x32xf32>
    %328 = tpu.matmul %327, %316, %cst_144 {dimension_numbers = #tpu.dot_dimension_numbers<[1], [0], [0], [1], [0, 0, 1, 1], [], []>} : vector<16x16xbf16>, vector<16x32xbf16>, vector<16x32xf32> -> vector<16x32xf32>
    %329 = vector.broadcast %318 : vector<1x32xf32> to vector<16x32xf32>
    %330 = arith.addf %328, %329 : vector<16x32xf32>
    %cst_145 = arith.constant 0.000000e+00 : f32
    %331 = vector.broadcast %cst_145 : f32 to vector<16x32xf32>
    %332 = arith.maximumf %330, %331 : vector<16x32xf32>
    %333 = arith.truncf %332 : vector<16x32xf32> to vector<16x32xbf16>
    %cst_146 = arith.constant dense<0.000000e+00> : vector<16x16xf32>
    %334 = tpu.matmul %333, %320, %cst_146 {dimension_numbers = #tpu.dot_dimension_numbers<[1], [0], [0], [1], [0, 0, 1, 1], [], []>} : vector<16x32xbf16>, vector<32x16xbf16>, vector<16x16xf32> -> vector<16x16xf32>
    %335 = vector.broadcast %322 : vector<1x16xf32> to vector<16x16xf32>
    %336 = arith.addf %334, %335 : vector<16x16xf32>
    %337 = arith.addf %336, %314 : vector<16x16xf32>
    %cst_147 = arith.constant dense<0.000000e+00> : vector<16xf32>
    %338 = vector.multi_reduction <add>, %337, %cst_147 [1] : vector<16x16xf32> to vector<16xf32>
    %339 = vector.shape_cast %338 : vector<16xf32> to vector<16x1xf32>
    %cst_148 = arith.constant 1.600000e+01 : f32
    %340 = vector.broadcast %cst_148 : f32 to vector<16x1xf32>
    %341 = arith.divf %339, %340 : vector<16x1xf32>
    %342 = vector.broadcast %341 : vector<16x1xf32> to vector<16x16xf32>
    %343 = arith.subf %337, %342 : vector<16x16xf32>
    %344 = arith.mulf %343, %343 : vector<16x16xf32>
    %cst_149 = arith.constant dense<0.000000e+00> : vector<16xf32>
    %345 = vector.multi_reduction <add>, %344, %cst_149 [1] : vector<16x16xf32> to vector<16xf32>
    %346 = vector.shape_cast %345 : vector<16xf32> to vector<16x1xf32>
    %cst_150 = arith.constant 1.600000e+01 : f32
    %347 = vector.broadcast %cst_150 : f32 to vector<16x1xf32>
    %348 = arith.divf %346, %347 : vector<16x1xf32>
    %349 = vector.broadcast %341 : vector<16x1xf32> to vector<16x16xf32>
    %350 = arith.subf %337, %349 : vector<16x16xf32>
    %cst_151 = arith.constant 9.99999974E-6 : f32
    %351 = vector.broadcast %cst_151 : f32 to vector<16x1xf32>
    %352 = arith.addf %348, %351 : vector<16x1xf32>
    %353 = math.rsqrt %352 : vector<16x1xf32>
    %354 = vector.broadcast %353 : vector<16x1xf32> to vector<16x16xf32>
    %355 = arith.mulf %350, %354 : vector<16x16xf32>
    %356 = vector.broadcast %324 : vector<1x16xf32> to vector<16x16xf32>
    %357 = arith.mulf %355, %356 : vector<16x16xf32>
    %358 = vector.broadcast %326 : vector<1x16xf32> to vector<16x16xf32>
    %359 = arith.addf %357, %358 : vector<16x16xf32>
    %c1 = arith.constant 1 : index
    %c0_152 = arith.constant 0 : index
    %c0_153 = arith.constant 0 : index
    %360 = vector.load %arg13[%c1, %c0_152, %c0_153] : memref<2x16x16xbf16, #tpu.memory_space<vmem>>, vector<1x16x16xbf16>
    %361 = vector.shape_cast %360 : vector<1x16x16xbf16> to vector<16x16xbf16>
    %c1_154 = arith.constant 1 : index
    %c0_155 = arith.constant 0 : index
    %c0_156 = arith.constant 0 : index
    %362 = vector.load %arg14[%c1_154, %c0_155, %c0_156] : memref<2x1x16xf32, #tpu.memory_space<vmem>>, vector<1x1x16xf32>
    %363 = vector.shape_cast %362 : vector<1x1x16xf32> to vector<1x16xf32>
    %c1_157 = arith.constant 1 : index
    %c0_158 = arith.constant 0 : index
    %c0_159 = arith.constant 0 : index
    %364 = vector.load %arg15[%c1_157, %c0_158, %c0_159] : memref<2x16x32xbf16, #tpu.memory_space<vmem>>, vector<1x16x32xbf16>
    %365 = vector.shape_cast %364 : vector<1x16x32xbf16> to vector<16x32xbf16>
    %c1_160 = arith.constant 1 : index
    %c0_161 = arith.constant 0 : index
    %c0_162 = arith.constant 0 : index
    %366 = vector.load %arg16[%c1_160, %c0_161, %c0_162] : memref<2x1x32xf32, #tpu.memory_space<vmem>>, vector<1x1x32xf32>
    %367 = vector.shape_cast %366 : vector<1x1x32xf32> to vector<1x32xf32>
    %c1_163 = arith.constant 1 : index
    %c0_164 = arith.constant 0 : index
    %c0_165 = arith.constant 0 : index
    %368 = vector.load %arg17[%c1_163, %c0_164, %c0_165] : memref<2x16x16xbf16, #tpu.memory_space<vmem>>, vector<1x16x16xbf16>
    %369 = vector.shape_cast %368 : vector<1x16x16xbf16> to vector<16x16xbf16>
    %c1_166 = arith.constant 1 : index
    %c0_167 = arith.constant 0 : index
    %c0_168 = arith.constant 0 : index
    %370 = vector.load %arg18[%c1_166, %c0_167, %c0_168] : memref<2x1x16xf32, #tpu.memory_space<vmem>>, vector<1x1x16xf32>
    %371 = vector.shape_cast %370 : vector<1x1x16xf32> to vector<1x16xf32>
    %c1_169 = arith.constant 1 : index
    %c0_170 = arith.constant 0 : index
    %c0_171 = arith.constant 0 : index
    %372 = vector.load %arg19[%c1_169, %c0_170, %c0_171] : memref<2x1x16xf32, #tpu.memory_space<vmem>>, vector<1x1x16xf32>
    %373 = vector.shape_cast %372 : vector<1x1x16xf32> to vector<1x16xf32>
    %c1_172 = arith.constant 1 : index
    %c0_173 = arith.constant 0 : index
    %c0_174 = arith.constant 0 : index
    %374 = vector.load %arg20[%c1_172, %c0_173, %c0_174] : memref<2x1x16xf32, #tpu.memory_space<vmem>>, vector<1x1x16xf32>
    %375 = vector.shape_cast %374 : vector<1x1x16xf32> to vector<1x16xf32>
    %376 = arith.truncf %359 : vector<16x16xf32> to vector<16x16xbf16>
    %cst_175 = arith.constant dense<0.000000e+00> : vector<16x16xf32>
    %377 = tpu.matmul %376, %361, %cst_175 {dimension_numbers = #tpu.dot_dimension_numbers<[1], [0], [0], [1], [0, 0, 1, 1], [], []>} : vector<16x16xbf16>, vector<16x16xbf16>, vector<16x16xf32> -> vector<16x16xf32>
    %378 = vector.broadcast %363 : vector<1x16xf32> to vector<16x16xf32>
    %379 = arith.addf %377, %378 : vector<16x16xf32>
    %380 = arith.truncf %359 : vector<16x16xf32> to vector<16x16xbf16>
    %cst_176 = arith.constant dense<0.000000e+00> : vector<16x32xf32>
    %381 = tpu.matmul %380, %365, %cst_176 {dimension_numbers = #tpu.dot_dimension_numbers<[1], [0], [0], [1], [0, 0, 1, 1], [], []>} : vector<16x16xbf16>, vector<16x32xbf16>, vector<16x32xf32> -> vector<16x32xf32>
    %382 = vector.broadcast %367 : vector<1x32xf32> to vector<16x32xf32>
    %383 = arith.addf %381, %382 : vector<16x32xf32>
    %384 = vector.shape_cast %379 : vector<16x16xf32> to vector<2x8x16xf32>
    %385 = vector.extract_strided_slice %383 {offsets = [0, 0], sizes = [16, 16], strides = [1, 1]} : vector<16x32xf32> to vector<16x16xf32>
    %386 = vector.shape_cast %385 : vector<16x16xf32> to vector<2x8x16xf32>
    %387 = vector.extract_strided_slice %383 {offsets = [0, 16], sizes = [16, 16], strides = [1, 1]} : vector<16x32xf32> to vector<16x16xf32>
    %388 = vector.shape_cast %387 : vector<16x16xf32> to vector<2x8x16xf32>
    %389 = vector.extract_strided_slice %384 {offsets = [0, 0, 0], sizes = [2, 8, 8], strides = [1, 1, 1]} : vector<2x8x16xf32> to vector<2x8x8xf32>
    %390 = arith.truncf %389 : vector<2x8x8xf32> to vector<2x8x8xbf16>
    %391 = vector.extract_strided_slice %386 {offsets = [0, 0, 0], sizes = [2, 8, 8], strides = [1, 1, 1]} : vector<2x8x16xf32> to vector<2x8x8xf32>
    %392 = arith.truncf %391 : vector<2x8x8xf32> to vector<2x8x8xbf16>
    %393 = vector.extract_strided_slice %388 {offsets = [0, 0, 0], sizes = [2, 8, 8], strides = [1, 1, 1]} : vector<2x8x16xf32> to vector<2x8x8xf32>
    %394 = arith.truncf %393 : vector<2x8x8xf32> to vector<2x8x8xbf16>
    "tpu.trace_start"() <{level = 10 : i32, message = "bqd,bkd->bqk"}> : () -> ()
    %cst_177 = arith.constant dense<0.000000e+00> : vector<2x8x8xf32>
    %395 = tpu.matmul %390, %392, %cst_177 {dimension_numbers = #tpu.dot_dimension_numbers<[2], [2], [1], [1], [0, 0, 0, 1, 1, 1], [0], [0]>} : vector<2x8x8xbf16>, vector<2x8x8xbf16>, vector<2x8x8xf32> -> vector<2x8x8xf32>
    "tpu.trace_stop"() : () -> ()
    %396 = vector.broadcast %6 : vector<2x1x8xf32> to vector<2x8x8xf32>
    %397 = arith.addf %395, %396 : vector<2x8x8xf32>
    %cst_178 = arith.constant dense<0xFF800000> : vector<2x8xf32>
    %398 = vector.multi_reduction <maximumf>, %397, %cst_178 [2] : vector<2x8x8xf32> to vector<2x8xf32>
    %399 = vector.shape_cast %398 : vector<2x8xf32> to vector<2x8x1xf32>
    %400 = vector.broadcast %399 : vector<2x8x1xf32> to vector<2x8x8xf32>
    %401 = arith.subf %397, %400 : vector<2x8x8xf32>
    %402 = math.exp %401 : vector<2x8x8xf32>
    %cst_179 = arith.constant dense<0.000000e+00> : vector<2x8xf32>
    %403 = vector.multi_reduction <add>, %402, %cst_179 [2] : vector<2x8x8xf32> to vector<2x8xf32>
    %404 = vector.shape_cast %403 : vector<2x8xf32> to vector<2x8x1xf32>
    %405 = tpu.reciprocal %404 {approx = true} : vector<2x8x1xf32> -> vector<2x8x1xf32>
    %406 = vector.broadcast %405 : vector<2x8x1xf32> to vector<2x8x8xf32>
    %407 = arith.mulf %402, %406 : vector<2x8x8xf32>
    %408 = arith.truncf %407 : vector<2x8x8xf32> to vector<2x8x8xbf16>
    "tpu.trace_start"() <{level = 10 : i32, message = "bqk,bkd->bqd"}> : () -> ()
    %cst_180 = arith.constant dense<0.000000e+00> : vector<2x8x8xf32>
    %409 = tpu.matmul %408, %394, %cst_180 {dimension_numbers = #tpu.dot_dimension_numbers<[2], [1], [1], [2], [0, 0, 0, 1, 1, 2], [0], [0]>} : vector<2x8x8xbf16>, vector<2x8x8xbf16>, vector<2x8x8xf32> -> vector<2x8x8xf32>
    "tpu.trace_stop"() : () -> ()
    %410 = vector.extract_strided_slice %384 {offsets = [0, 0, 8], sizes = [2, 8, 8], strides = [1, 1, 1]} : vector<2x8x16xf32> to vector<2x8x8xf32>
    %411 = arith.truncf %410 : vector<2x8x8xf32> to vector<2x8x8xbf16>
    %412 = vector.extract_strided_slice %386 {offsets = [0, 0, 8], sizes = [2, 8, 8], strides = [1, 1, 1]} : vector<2x8x16xf32> to vector<2x8x8xf32>
    %413 = arith.truncf %412 : vector<2x8x8xf32> to vector<2x8x8xbf16>
    %414 = vector.extract_strided_slice %388 {offsets = [0, 0, 8], sizes = [2, 8, 8], strides = [1, 1, 1]} : vector<2x8x16xf32> to vector<2x8x8xf32>
    %415 = arith.truncf %414 : vector<2x8x8xf32> to vector<2x8x8xbf16>
    "tpu.trace_start"() <{level = 10 : i32, message = "bqd,bkd->bqk"}> : () -> ()
    %cst_181 = arith.constant dense<0.000000e+00> : vector<2x8x8xf32>
    %416 = tpu.matmul %411, %413, %cst_181 {dimension_numbers = #tpu.dot_dimension_numbers<[2], [2], [1], [1], [0, 0, 0, 1, 1, 1], [0], [0]>} : vector<2x8x8xbf16>, vector<2x8x8xbf16>, vector<2x8x8xf32> -> vector<2x8x8xf32>
    "tpu.trace_stop"() : () -> ()
    %417 = vector.broadcast %6 : vector<2x1x8xf32> to vector<2x8x8xf32>
    %418 = arith.addf %416, %417 : vector<2x8x8xf32>
    %cst_182 = arith.constant dense<0xFF800000> : vector<2x8xf32>
    %419 = vector.multi_reduction <maximumf>, %418, %cst_182 [2] : vector<2x8x8xf32> to vector<2x8xf32>
    %420 = vector.shape_cast %419 : vector<2x8xf32> to vector<2x8x1xf32>
    %421 = vector.broadcast %420 : vector<2x8x1xf32> to vector<2x8x8xf32>
    %422 = arith.subf %418, %421 : vector<2x8x8xf32>
    %423 = math.exp %422 : vector<2x8x8xf32>
    %cst_183 = arith.constant dense<0.000000e+00> : vector<2x8xf32>
    %424 = vector.multi_reduction <add>, %423, %cst_183 [2] : vector<2x8x8xf32> to vector<2x8xf32>
    %425 = vector.shape_cast %424 : vector<2x8xf32> to vector<2x8x1xf32>
    %426 = tpu.reciprocal %425 {approx = true} : vector<2x8x1xf32> -> vector<2x8x1xf32>
    %427 = vector.broadcast %426 : vector<2x8x1xf32> to vector<2x8x8xf32>
    %428 = arith.mulf %423, %427 : vector<2x8x8xf32>
    %429 = arith.truncf %428 : vector<2x8x8xf32> to vector<2x8x8xbf16>
    "tpu.trace_start"() <{level = 10 : i32, message = "bqk,bkd->bqd"}> : () -> ()
    %cst_184 = arith.constant dense<0.000000e+00> : vector<2x8x8xf32>
    %430 = tpu.matmul %429, %415, %cst_184 {dimension_numbers = #tpu.dot_dimension_numbers<[2], [1], [1], [2], [0, 0, 0, 1, 1, 2], [0], [0]>} : vector<2x8x8xbf16>, vector<2x8x8xbf16>, vector<2x8x8xf32> -> vector<2x8x8xf32>
    "tpu.trace_stop"() : () -> ()
    %431 = tpu.concatenate %409, %430 in 2 : vector<2x8x8xf32>, vector<2x8x8xf32> -> vector<2x8x16xf32>
    %432 = vector.shape_cast %431 : vector<2x8x16xf32> to vector<16x16xf32>
    %433 = arith.truncf %432 : vector<16x16xf32> to vector<16x16xbf16>
    %cst_185 = arith.constant dense<0.000000e+00> : vector<16x16xf32>
    %434 = tpu.matmul %433, %369, %cst_185 {dimension_numbers = #tpu.dot_dimension_numbers<[1], [0], [0], [1], [0, 0, 1, 1], [], []>} : vector<16x16xbf16>, vector<16x16xbf16>, vector<16x16xf32> -> vector<16x16xf32>
    %435 = vector.broadcast %371 : vector<1x16xf32> to vector<16x16xf32>
    %436 = arith.addf %434, %435 : vector<16x16xf32>
    %437 = arith.addf %436, %359 : vector<16x16xf32>
    %cst_186 = arith.constant dense<0.000000e+00> : vector<16xf32>
    %438 = vector.multi_reduction <add>, %437, %cst_186 [1] : vector<16x16xf32> to vector<16xf32>
    %439 = vector.shape_cast %438 : vector<16xf32> to vector<16x1xf32>
    %cst_187 = arith.constant 1.600000e+01 : f32
    %440 = vector.broadcast %cst_187 : f32 to vector<16x1xf32>
    %441 = arith.divf %439, %440 : vector<16x1xf32>
    %442 = vector.broadcast %441 : vector<16x1xf32> to vector<16x16xf32>
    %443 = arith.subf %437, %442 : vector<16x16xf32>
    %444 = arith.mulf %443, %443 : vector<16x16xf32>
    %cst_188 = arith.constant dense<0.000000e+00> : vector<16xf32>
    %445 = vector.multi_reduction <add>, %444, %cst_188 [1] : vector<16x16xf32> to vector<16xf32>
    %446 = vector.shape_cast %445 : vector<16xf32> to vector<16x1xf32>
    %cst_189 = arith.constant 1.600000e+01 : f32
    %447 = vector.broadcast %cst_189 : f32 to vector<16x1xf32>
    %448 = arith.divf %446, %447 : vector<16x1xf32>
    %449 = vector.broadcast %441 : vector<16x1xf32> to vector<16x16xf32>
    %450 = arith.subf %437, %449 : vector<16x16xf32>
    %cst_190 = arith.constant 9.99999974E-6 : f32
    %451 = vector.broadcast %cst_190 : f32 to vector<16x1xf32>
    %452 = arith.addf %448, %451 : vector<16x1xf32>
    %453 = math.rsqrt %452 : vector<16x1xf32>
    %454 = vector.broadcast %453 : vector<16x1xf32> to vector<16x16xf32>
    %455 = arith.mulf %450, %454 : vector<16x16xf32>
    %456 = vector.broadcast %373 : vector<1x16xf32> to vector<16x16xf32>
    %457 = arith.mulf %455, %456 : vector<16x16xf32>
    %458 = vector.broadcast %375 : vector<1x16xf32> to vector<16x16xf32>
    %459 = arith.addf %457, %458 : vector<16x16xf32>
    %c1_191 = arith.constant 1 : index
    %c0_192 = arith.constant 0 : index
    %c0_193 = arith.constant 0 : index
    %460 = vector.load %arg21[%c1_191, %c0_192, %c0_193] : memref<2x16x16xbf16, #tpu.memory_space<vmem>>, vector<1x16x16xbf16>
    %461 = vector.shape_cast %460 : vector<1x16x16xbf16> to vector<16x16xbf16>
    %c1_194 = arith.constant 1 : index
    %c0_195 = arith.constant 0 : index
    %c0_196 = arith.constant 0 : index
    %462 = vector.load %arg22[%c1_194, %c0_195, %c0_196] : memref<2x1x16xf32, #tpu.memory_space<vmem>>, vector<1x1x16xf32>
    %463 = vector.shape_cast %462 : vector<1x1x16xf32> to vector<1x16xf32>
    %c1_197 = arith.constant 1 : index
    %c0_198 = arith.constant 0 : index
    %c0_199 = arith.constant 0 : index
    %464 = vector.load %arg23[%c1_197, %c0_198, %c0_199] : memref<2x16x32xbf16, #tpu.memory_space<vmem>>, vector<1x16x32xbf16>
    %465 = vector.shape_cast %464 : vector<1x16x32xbf16> to vector<16x32xbf16>
    %c1_200 = arith.constant 1 : index
    %c0_201 = arith.constant 0 : index
    %c0_202 = arith.constant 0 : index
    %466 = vector.load %arg24[%c1_200, %c0_201, %c0_202] : memref<2x1x32xf32, #tpu.memory_space<vmem>>, vector<1x1x32xf32>
    %467 = vector.shape_cast %466 : vector<1x1x32xf32> to vector<1x32xf32>
    %c1_203 = arith.constant 1 : index
    %c0_204 = arith.constant 0 : index
    %c0_205 = arith.constant 0 : index
    %468 = vector.load %arg25[%c1_203, %c0_204, %c0_205] : memref<2x16x16xbf16, #tpu.memory_space<vmem>>, vector<1x16x16xbf16>
    %469 = vector.shape_cast %468 : vector<1x16x16xbf16> to vector<16x16xbf16>
    %c1_206 = arith.constant 1 : index
    %c0_207 = arith.constant 0 : index
    %c0_208 = arith.constant 0 : index
    %470 = vector.load %arg26[%c1_206, %c0_207, %c0_208] : memref<2x1x16xf32, #tpu.memory_space<vmem>>, vector<1x1x16xf32>
    %471 = vector.shape_cast %470 : vector<1x1x16xf32> to vector<1x16xf32>
    %c1_209 = arith.constant 1 : index
    %c0_210 = arith.constant 0 : index
    %c0_211 = arith.constant 0 : index
    %472 = vector.load %arg27[%c1_209, %c0_210, %c0_211] : memref<2x1x16xf32, #tpu.memory_space<vmem>>, vector<1x1x16xf32>
    %473 = vector.shape_cast %472 : vector<1x1x16xf32> to vector<1x16xf32>
    %c1_212 = arith.constant 1 : index
    %c0_213 = arith.constant 0 : index
    %c0_214 = arith.constant 0 : index
    %474 = vector.load %arg28[%c1_212, %c0_213, %c0_214] : memref<2x1x16xf32, #tpu.memory_space<vmem>>, vector<1x1x16xf32>
    %475 = vector.shape_cast %474 : vector<1x1x16xf32> to vector<1x16xf32>
    %476 = arith.truncf %459 : vector<16x16xf32> to vector<16x16xbf16>
    %cst_215 = arith.constant dense<0.000000e+00> : vector<16x16xf32>
    %477 = tpu.matmul %476, %461, %cst_215 {dimension_numbers = #tpu.dot_dimension_numbers<[1], [0], [0], [1], [0, 0, 1, 1], [], []>} : vector<16x16xbf16>, vector<16x16xbf16>, vector<16x16xf32> -> vector<16x16xf32>
    %478 = vector.broadcast %463 : vector<1x16xf32> to vector<16x16xf32>
    %479 = arith.addf %477, %478 : vector<16x16xf32>
    %480 = arith.truncf %15 : vector<32x16xf32> to vector<32x16xbf16>
    %cst_216 = arith.constant dense<0.000000e+00> : vector<32x32xf32>
    %481 = tpu.matmul %480, %465, %cst_216 {dimension_numbers = #tpu.dot_dimension_numbers<[1], [0], [0], [1], [0, 0, 1, 1], [], []>} : vector<32x16xbf16>, vector<16x32xbf16>, vector<32x32xf32> -> vector<32x32xf32>
    %482 = vector.broadcast %467 : vector<1x32xf32> to vector<32x32xf32>
    %483 = arith.addf %481, %482 : vector<32x32xf32>
    %484 = vector.shape_cast %479 : vector<16x16xf32> to vector<2x8x16xf32>
    %485 = vector.extract_strided_slice %483 {offsets = [0, 0], sizes = [32, 16], strides = [1, 1]} : vector<32x32xf32> to vector<32x16xf32>
    %486 = vector.shape_cast %485 : vector<32x16xf32> to vector<2x16x16xf32>
    %487 = vector.extract_strided_slice %483 {offsets = [0, 16], sizes = [32, 16], strides = [1, 1]} : vector<32x32xf32> to vector<32x16xf32>
    %488 = vector.shape_cast %487 : vector<32x16xf32> to vector<2x16x16xf32>
    %489 = vector.extract_strided_slice %484 {offsets = [0, 0, 0], sizes = [2, 8, 8], strides = [1, 1, 1]} : vector<2x8x16xf32> to vector<2x8x8xf32>
    %490 = arith.truncf %489 : vector<2x8x8xf32> to vector<2x8x8xbf16>
    %491 = vector.extract_strided_slice %486 {offsets = [0, 0, 0], sizes = [2, 16, 8], strides = [1, 1, 1]} : vector<2x16x16xf32> to vector<2x16x8xf32>
    %492 = arith.truncf %491 : vector<2x16x8xf32> to vector<2x16x8xbf16>
    %493 = vector.extract_strided_slice %488 {offsets = [0, 0, 0], sizes = [2, 16, 8], strides = [1, 1, 1]} : vector<2x16x16xf32> to vector<2x16x8xf32>
    %494 = arith.truncf %493 : vector<2x16x8xf32> to vector<2x16x8xbf16>
    "tpu.trace_start"() <{level = 10 : i32, message = "bqd,bkd->bqk"}> : () -> ()
    %cst_217 = arith.constant dense<0.000000e+00> : vector<2x8x16xf32>
    %495 = tpu.matmul %490, %492, %cst_217 {dimension_numbers = #tpu.dot_dimension_numbers<[2], [2], [1], [1], [0, 0, 0, 1, 1, 1], [0], [0]>} : vector<2x8x8xbf16>, vector<2x16x8xbf16>, vector<2x8x16xf32> -> vector<2x8x16xf32>
    "tpu.trace_stop"() : () -> ()
    %496 = vector.broadcast %11 : vector<2x1x16xf32> to vector<2x8x16xf32>
    %497 = arith.addf %495, %496 : vector<2x8x16xf32>
    %cst_218 = arith.constant dense<0xFF800000> : vector<2x8xf32>
    %498 = vector.multi_reduction <maximumf>, %497, %cst_218 [2] : vector<2x8x16xf32> to vector<2x8xf32>
    %499 = vector.shape_cast %498 : vector<2x8xf32> to vector<2x8x1xf32>
    %500 = vector.broadcast %499 : vector<2x8x1xf32> to vector<2x8x16xf32>
    %501 = arith.subf %497, %500 : vector<2x8x16xf32>
    %502 = math.exp %501 : vector<2x8x16xf32>
    %cst_219 = arith.constant dense<0.000000e+00> : vector<2x8xf32>
    %503 = vector.multi_reduction <add>, %502, %cst_219 [2] : vector<2x8x16xf32> to vector<2x8xf32>
    %504 = vector.shape_cast %503 : vector<2x8xf32> to vector<2x8x1xf32>
    %505 = tpu.reciprocal %504 {approx = true} : vector<2x8x1xf32> -> vector<2x8x1xf32>
    %506 = vector.broadcast %505 : vector<2x8x1xf32> to vector<2x8x16xf32>
    %507 = arith.mulf %502, %506 : vector<2x8x16xf32>
    %508 = arith.truncf %507 : vector<2x8x16xf32> to vector<2x8x16xbf16>
    "tpu.trace_start"() <{level = 10 : i32, message = "bqk,bkd->bqd"}> : () -> ()
    %cst_220 = arith.constant dense<0.000000e+00> : vector<2x8x8xf32>
    %509 = tpu.matmul %508, %494, %cst_220 {dimension_numbers = #tpu.dot_dimension_numbers<[2], [1], [1], [2], [0, 0, 0, 1, 1, 2], [0], [0]>} : vector<2x8x16xbf16>, vector<2x16x8xbf16>, vector<2x8x8xf32> -> vector<2x8x8xf32>
    "tpu.trace_stop"() : () -> ()
    %510 = vector.extract_strided_slice %484 {offsets = [0, 0, 8], sizes = [2, 8, 8], strides = [1, 1, 1]} : vector<2x8x16xf32> to vector<2x8x8xf32>
    %511 = arith.truncf %510 : vector<2x8x8xf32> to vector<2x8x8xbf16>
    %512 = vector.extract_strided_slice %486 {offsets = [0, 0, 8], sizes = [2, 16, 8], strides = [1, 1, 1]} : vector<2x16x16xf32> to vector<2x16x8xf32>
    %513 = arith.truncf %512 : vector<2x16x8xf32> to vector<2x16x8xbf16>
    %514 = vector.extract_strided_slice %488 {offsets = [0, 0, 8], sizes = [2, 16, 8], strides = [1, 1, 1]} : vector<2x16x16xf32> to vector<2x16x8xf32>
    %515 = arith.truncf %514 : vector<2x16x8xf32> to vector<2x16x8xbf16>
    "tpu.trace_start"() <{level = 10 : i32, message = "bqd,bkd->bqk"}> : () -> ()
    %cst_221 = arith.constant dense<0.000000e+00> : vector<2x8x16xf32>
    %516 = tpu.matmul %511, %513, %cst_221 {dimension_numbers = #tpu.dot_dimension_numbers<[2], [2], [1], [1], [0, 0, 0, 1, 1, 1], [0], [0]>} : vector<2x8x8xbf16>, vector<2x16x8xbf16>, vector<2x8x16xf32> -> vector<2x8x16xf32>
    "tpu.trace_stop"() : () -> ()
    %517 = vector.broadcast %11 : vector<2x1x16xf32> to vector<2x8x16xf32>
    %518 = arith.addf %516, %517 : vector<2x8x16xf32>
    %cst_222 = arith.constant dense<0xFF800000> : vector<2x8xf32>
    %519 = vector.multi_reduction <maximumf>, %518, %cst_222 [2] : vector<2x8x16xf32> to vector<2x8xf32>
    %520 = vector.shape_cast %519 : vector<2x8xf32> to vector<2x8x1xf32>
    %521 = vector.broadcast %520 : vector<2x8x1xf32> to vector<2x8x16xf32>
    %522 = arith.subf %518, %521 : vector<2x8x16xf32>
    %523 = math.exp %522 : vector<2x8x16xf32>
    %cst_223 = arith.constant dense<0.000000e+00> : vector<2x8xf32>
    %524 = vector.multi_reduction <add>, %523, %cst_223 [2] : vector<2x8x16xf32> to vector<2x8xf32>
    %525 = vector.shape_cast %524 : vector<2x8xf32> to vector<2x8x1xf32>
    %526 = tpu.reciprocal %525 {approx = true} : vector<2x8x1xf32> -> vector<2x8x1xf32>
    %527 = vector.broadcast %526 : vector<2x8x1xf32> to vector<2x8x16xf32>
    %528 = arith.mulf %523, %527 : vector<2x8x16xf32>
    %529 = arith.truncf %528 : vector<2x8x16xf32> to vector<2x8x16xbf16>
    "tpu.trace_start"() <{level = 10 : i32, message = "bqk,bkd->bqd"}> : () -> ()
    %cst_224 = arith.constant dense<0.000000e+00> : vector<2x8x8xf32>
    %530 = tpu.matmul %529, %515, %cst_224 {dimension_numbers = #tpu.dot_dimension_numbers<[2], [1], [1], [2], [0, 0, 0, 1, 1, 2], [0], [0]>} : vector<2x8x16xbf16>, vector<2x16x8xbf16>, vector<2x8x8xf32> -> vector<2x8x8xf32>
    "tpu.trace_stop"() : () -> ()
    %531 = tpu.concatenate %509, %530 in 2 : vector<2x8x8xf32>, vector<2x8x8xf32> -> vector<2x8x16xf32>
    %532 = vector.shape_cast %531 : vector<2x8x16xf32> to vector<16x16xf32>
    %533 = arith.truncf %532 : vector<16x16xf32> to vector<16x16xbf16>
    %cst_225 = arith.constant dense<0.000000e+00> : vector<16x16xf32>
    %534 = tpu.matmul %533, %469, %cst_225 {dimension_numbers = #tpu.dot_dimension_numbers<[1], [0], [0], [1], [0, 0, 1, 1], [], []>} : vector<16x16xbf16>, vector<16x16xbf16>, vector<16x16xf32> -> vector<16x16xf32>
    %535 = vector.broadcast %471 : vector<1x16xf32> to vector<16x16xf32>
    %536 = arith.addf %534, %535 : vector<16x16xf32>
    %537 = arith.addf %536, %459 : vector<16x16xf32>
    %cst_226 = arith.constant dense<0.000000e+00> : vector<16xf32>
    %538 = vector.multi_reduction <add>, %537, %cst_226 [1] : vector<16x16xf32> to vector<16xf32>
    %539 = vector.shape_cast %538 : vector<16xf32> to vector<16x1xf32>
    %cst_227 = arith.constant 1.600000e+01 : f32
    %540 = vector.broadcast %cst_227 : f32 to vector<16x1xf32>
    %541 = arith.divf %539, %540 : vector<16x1xf32>
    %542 = vector.broadcast %541 : vector<16x1xf32> to vector<16x16xf32>
    %543 = arith.subf %537, %542 : vector<16x16xf32>
    %544 = arith.mulf %543, %543 : vector<16x16xf32>
    %cst_228 = arith.constant dense<0.000000e+00> : vector<16xf32>
    %545 = vector.multi_reduction <add>, %544, %cst_228 [1] : vector<16x16xf32> to vector<16xf32>
    %546 = vector.shape_cast %545 : vector<16xf32> to vector<16x1xf32>
    %cst_229 = arith.constant 1.600000e+01 : f32
    %547 = vector.broadcast %cst_229 : f32 to vector<16x1xf32>
    %548 = arith.divf %546, %547 : vector<16x1xf32>
    %549 = vector.broadcast %541 : vector<16x1xf32> to vector<16x16xf32>
    %550 = arith.subf %537, %549 : vector<16x16xf32>
    %cst_230 = arith.constant 9.99999974E-6 : f32
    %551 = vector.broadcast %cst_230 : f32 to vector<16x1xf32>
    %552 = arith.addf %548, %551 : vector<16x1xf32>
    %553 = math.rsqrt %552 : vector<16x1xf32>
    %554 = vector.broadcast %553 : vector<16x1xf32> to vector<16x16xf32>
    %555 = arith.mulf %550, %554 : vector<16x16xf32>
    %556 = vector.broadcast %473 : vector<1x16xf32> to vector<16x16xf32>
    %557 = arith.mulf %555, %556 : vector<16x16xf32>
    %558 = vector.broadcast %475 : vector<1x16xf32> to vector<16x16xf32>
    %559 = arith.addf %557, %558 : vector<16x16xf32>
    %c1_231 = arith.constant 1 : index
    %c0_232 = arith.constant 0 : index
    %c0_233 = arith.constant 0 : index
    %560 = vector.load %arg29[%c1_231, %c0_232, %c0_233] : memref<2x16x32xbf16, #tpu.memory_space<vmem>>, vector<1x16x32xbf16>
    %561 = vector.shape_cast %560 : vector<1x16x32xbf16> to vector<16x32xbf16>
    %c1_234 = arith.constant 1 : index
    %c0_235 = arith.constant 0 : index
    %c0_236 = arith.constant 0 : index
    %562 = vector.load %arg30[%c1_234, %c0_235, %c0_236] : memref<2x1x32xf32, #tpu.memory_space<vmem>>, vector<1x1x32xf32>
    %563 = vector.shape_cast %562 : vector<1x1x32xf32> to vector<1x32xf32>
    %c1_237 = arith.constant 1 : index
    %c0_238 = arith.constant 0 : index
    %c0_239 = arith.constant 0 : index
    %564 = vector.load %arg31[%c1_237, %c0_238, %c0_239] : memref<2x32x16xbf16, #tpu.memory_space<vmem>>, vector<1x32x16xbf16>
    %565 = vector.shape_cast %564 : vector<1x32x16xbf16> to vector<32x16xbf16>
    %c1_240 = arith.constant 1 : index
    %c0_241 = arith.constant 0 : index
    %c0_242 = arith.constant 0 : index
    %566 = vector.load %arg32[%c1_240, %c0_241, %c0_242] : memref<2x1x16xf32, #tpu.memory_space<vmem>>, vector<1x1x16xf32>
    %567 = vector.shape_cast %566 : vector<1x1x16xf32> to vector<1x16xf32>
    %c1_243 = arith.constant 1 : index
    %c0_244 = arith.constant 0 : index
    %c0_245 = arith.constant 0 : index
    %568 = vector.load %arg33[%c1_243, %c0_244, %c0_245] : memref<2x1x16xf32, #tpu.memory_space<vmem>>, vector<1x1x16xf32>
    %569 = vector.shape_cast %568 : vector<1x1x16xf32> to vector<1x16xf32>
    %c1_246 = arith.constant 1 : index
    %c0_247 = arith.constant 0 : index
    %c0_248 = arith.constant 0 : index
    %570 = vector.load %arg34[%c1_246, %c0_247, %c0_248] : memref<2x1x16xf32, #tpu.memory_space<vmem>>, vector<1x1x16xf32>
    %571 = vector.shape_cast %570 : vector<1x1x16xf32> to vector<1x16xf32>
    %572 = arith.truncf %559 : vector<16x16xf32> to vector<16x16xbf16>
    %cst_249 = arith.constant dense<0.000000e+00> : vector<16x32xf32>
    %573 = tpu.matmul %572, %561, %cst_249 {dimension_numbers = #tpu.dot_dimension_numbers<[1], [0], [0], [1], [0, 0, 1, 1], [], []>} : vector<16x16xbf16>, vector<16x32xbf16>, vector<16x32xf32> -> vector<16x32xf32>
    %574 = vector.broadcast %563 : vector<1x32xf32> to vector<16x32xf32>
    %575 = arith.addf %573, %574 : vector<16x32xf32>
    %cst_250 = arith.constant 0.000000e+00 : f32
    %576 = vector.broadcast %cst_250 : f32 to vector<16x32xf32>
    %577 = arith.maximumf %575, %576 : vector<16x32xf32>
    %578 = arith.truncf %577 : vector<16x32xf32> to vector<16x32xbf16>
    %cst_251 = arith.constant dense<0.000000e+00> : vector<16x16xf32>
    %579 = tpu.matmul %578, %565, %cst_251 {dimension_numbers = #tpu.dot_dimension_numbers<[1], [0], [0], [1], [0, 0, 1, 1], [], []>} : vector<16x32xbf16>, vector<32x16xbf16>, vector<16x16xf32> -> vector<16x16xf32>
    %580 = vector.broadcast %567 : vector<1x16xf32> to vector<16x16xf32>
    %581 = arith.addf %579, %580 : vector<16x16xf32>
    %582 = arith.addf %581, %559 : vector<16x16xf32>
    %cst_252 = arith.constant dense<0.000000e+00> : vector<16xf32>
    %583 = vector.multi_reduction <add>, %582, %cst_252 [1] : vector<16x16xf32> to vector<16xf32>
    %584 = vector.shape_cast %583 : vector<16xf32> to vector<16x1xf32>
    %cst_253 = arith.constant 1.600000e+01 : f32
    %585 = vector.broadcast %cst_253 : f32 to vector<16x1xf32>
    %586 = arith.divf %584, %585 : vector<16x1xf32>
    %587 = vector.broadcast %586 : vector<16x1xf32> to vector<16x16xf32>
    %588 = arith.subf %582, %587 : vector<16x16xf32>
    %589 = arith.mulf %588, %588 : vector<16x16xf32>
    %cst_254 = arith.constant dense<0.000000e+00> : vector<16xf32>
    %590 = vector.multi_reduction <add>, %589, %cst_254 [1] : vector<16x16xf32> to vector<16xf32>
    %591 = vector.shape_cast %590 : vector<16xf32> to vector<16x1xf32>
    %cst_255 = arith.constant 1.600000e+01 : f32
    %592 = vector.broadcast %cst_255 : f32 to vector<16x1xf32>
    %593 = arith.divf %591, %592 : vector<16x1xf32>
    %594 = vector.broadcast %586 : vector<16x1xf32> to vector<16x16xf32>
    %595 = arith.subf %582, %594 : vector<16x16xf32>
    %cst_256 = arith.constant 9.99999974E-6 : f32
    %596 = vector.broadcast %cst_256 : f32 to vector<16x1xf32>
    %597 = arith.addf %593, %596 : vector<16x1xf32>
    %598 = math.rsqrt %597 : vector<16x1xf32>
    %599 = vector.broadcast %598 : vector<16x1xf32> to vector<16x16xf32>
    %600 = arith.mulf %595, %599 : vector<16x16xf32>
    %601 = vector.broadcast %569 : vector<1x16xf32> to vector<16x16xf32>
    %602 = arith.mulf %600, %601 : vector<16x16xf32>
    %603 = vector.broadcast %571 : vector<1x16xf32> to vector<16x16xf32>
    %604 = arith.addf %602, %603 : vector<16x16xf32>
    %605 = arith.truncf %604 : vector<16x16xf32> to vector<16x16xbf16>
    %c0_257 = arith.constant 0 : index
    %c0_258 = arith.constant 0 : index
    %606 = vector.load %arg35[%c0_257, %c0_258] : memref<16x128xbf16, #tpu.memory_space<vmem>>, vector<16x128xbf16>
    %cst_259 = arith.constant dense<0.000000e+00> : vector<16x128xf32>
    %607 = tpu.matmul %605, %606, %cst_259 {dimension_numbers = #tpu.dot_dimension_numbers<[1], [0], [0], [1], [0, 0, 1, 1], [], []>} : vector<16x16xbf16>, vector<16x128xbf16>, vector<16x128xf32> -> vector<16x128xf32>
    %c0_260 = arith.constant 0 : index
    %c0_261 = arith.constant 0 : index
    %608 = vector.load %arg36[%c0_260, %c0_261] : memref<1x128xf32, #tpu.memory_space<vmem>>, vector<1x128xf32>
    %609 = vector.broadcast %608 : vector<1x128xf32> to vector<16x128xf32>
    %610 = arith.addf %607, %609 : vector<16x128xf32>
    %c0_262 = arith.constant 0 : index
    %c0_263 = arith.constant 0 : index
    %611 = vector.load %arg37[%c0_262, %c0_263] : memref<16x128xf32, #tpu.memory_space<vmem>>, vector<16x128xf32>
    tpu.vector_store %arg37[%c0_262, %c0_263], %610 {strides = array<i32>} : memref<16x128xf32, #tpu.memory_space<vmem>>, vector<16x128xf32>,
    return
  }
}

</mosaic_0001>

<bundles_post_ra>
// kernel: decoder_forward.1
= control target key start
LH: loop header
LB: loop body
LE: loop exit
PB: predicated region body
PF: predicated region fallthrough
CT: control target
= control target key end

     0   :  { %s3499_s6 = smov 1   ;;  %s3500_s10 = smov 2   ;;  %s4268_s0 = inlined_call_operand.smem [shape: u32[38], index: -1, kind: input, shape index: {}] }
   0x1   :  { %s3566_s5 = sld [smem:[%s4268_s0]]   ;;  %s3501_s14 = smov 3  }
   0x2   :  { %s3571_s9 = sld [smem:[%s4268_s0 + %s3499_s6]]   ;;  %s3502_s18 = smov 4  }
   0x3   :  { %s3576_s13 = sld [smem:[%s4268_s0 + %s3500_s10]]   ;;  %s3503_s22 = smov 5  }
   0x4   :  { %s3581_s17 = sld [smem:[%s4268_s0 + %s3501_s14]]   ;;  %s3504_s26 = smov 6  }
   0x5   :  { %s3586_s21 = sld [smem:[%s4268_s0 + %s3502_s18]]   ;;  %s3505_s30 = smov 7  }
   0x6   :  { %s3591_s25 = sld [smem:[%s4268_s0 + %s3503_s22]]   ;;  %s3506_s4 = smov 8  }
   0x7   :  { %4284 = sst [smem:[#allocation32_spill]] %s3566_s5  ;;  %s3507_s10 = smov 9  }
   0x8   :  { %s3596_s29 = sld [smem:[%s4268_s0 + %s3504_s26]]   ;;  %s3508_s15 = smov 10  }
   0x9   :  { %s3601_s3 = sld [smem:[%s4268_s0 + %s3505_s30]]   ;;  %s3509_s20 = smov 11  }
   0xa   :  { %4285 = sst [smem:[#allocation33_spill]] %s3581_s17  ;;  %s3510_s26 = smov 12  }
   0xb   :  { %4286 = sst [smem:[#allocation34_spill]] %s3586_s21  ;;  %s3511_s1 = smov 13  }
   0xc   :  { %4287 = sst [smem:[#allocation35_spill]] %s3591_s25  ;;  %s3512_s7 = smov 14  }
   0xd   :  { %s3606_s8 = sld [smem:[%s4268_s0 + %s3506_s4]]   ;;  %s3514_s22 = smov 16  }
   0xe   :  { %4288 = sst [smem:[#allocation36_spill]] %s3596_s29  ;;  %s3515_s28 = smov 17  }
   0xf   :  { %s3611_s14 = sld [smem:[%s4268_s0 + %s3507_s10]]  }
  0x10   :  { %s3616_s19 = sld [smem:[%s4268_s0 + %s3508_s15]]   ;;  %s3513_s15 = smov 15  }
  0x11   :  { %s3621_s24 = sld [smem:[%s4268_s0 + %s3509_s20]]  }
  0x12   :  { %s3626_s30 = sld [smem:[%s4268_s0 + %s3510_s26]]  }
  0x13   :  { %s3631_s6 = sld [smem:[%s4268_s0 + %s3511_s1]]  }
  0x14   :  { %s3636_s12 = sld [smem:[%s4268_s0 + %s3512_s7]]   ;;  %s3516_s7 = smov 18  }
  0x15   :  { %4289 = sst [smem:[#allocation37_spill]] %s3611_s14 }
  0x16   :  { %s3641_s20 = sld [smem:[%s4268_s0 + %s3513_s15]]   ;;  %s3517_s15 = smov 19  }
  0x17   :  { %s3646_s27 = sld [smem:[%s4268_s0 + %s3514_s22]]   ;;  %s3518_s22 = smov 20  }
  0x18   :  { %s3651_s4 = sld [smem:[%s4268_s0 + %s3515_s28]]   ;;  %s3519_s28 = smov 21  }
  0x19   :  { %4290 = sst [smem:[#allocation38_spill]] %s3631_s6 }
  0x1a   :  { %4291 = sst [smem:[#allocation39_spill]] %s3636_s12 }
  0x1b   :  { %s3656_s21 = sld [smem:[%s4268_s0 + %s3516_s7]]   ;;  %s3520_s7 = smov 22  }
  0x1c   :  { %4292 = sst [smem:[#allocation40_spill]] %s3641_s20 }
  0x1d   :  { %4293 = sst [smem:[#allocation41_spill]] %s3646_s27 }
  0x1e   :  { %4294 = sst [smem:[#allocation42_spill]] %s3651_s4 }
  0x1f   :  { %s3661_s17 = sld [smem:[%s4268_s0 + %s3517_s15]]   ;;  %s3521_s15 = smov 23  }
  0x20   :  { %s3666_s12 = sld [smem:[%s4268_s0 + %s3518_s22]]   ;;  %s3522_s22 = smov 24  }
  0x21   :  { %s3671_s4 = sld [smem:[%s4268_s0 + %s3519_s28]]   ;;  %s3523_s28 = smov 25  }
  0x22   :  { %s3676_s27 = sld [smem:[%s4268_s0 + %s3520_s7]]   ;;  %s3524_s7 = smov 26  }
  0x23   :  { %s3681_s20 = sld [smem:[%s4268_s0 + %s3521_s15]]   ;;  %s3525_s15 = smov 27  }
  0x24   :  { %s3686_s6 = sld [smem:[%s4268_s0 + %s3522_s22]]   ;;  %s3526_s22 = smov 28  }
  0x27   :  { %4295 = sst [smem:[#allocation43_spill]] %s3671_s4 }
  0x28   :  { %4296 = sst [smem:[#allocation44_spill]] %s3676_s27 }
  0x29   :  { %4297 = sst [smem:[#allocation45_spill]] %s3681_s20 }
  0x2a   :  { %4298 = sst [smem:[#allocation46_spill]] %s3686_s6 }
  0x2b   :  { %s3691_s4 = sld [smem:[%s4268_s0 + %s3523_s28]]   ;;  %s3527_s28 = smov 29  }
  0x2c   :  { %s3696_s27 = sld [smem:[%s4268_s0 + %s3524_s7]]   ;;  %s3528_s7 = smov 30  }
  0x2d   :  { %s3701_s20 = sld [smem:[%s4268_s0 + %s3525_s15]]   ;;  %s3529_s15 = smov 31  }
  0x2e   :  { %s3706_s6 = sld [smem:[%s4268_s0 + %s3526_s22]]   ;;  %s3530_s22 = smov 32  }
  0x2f   :  { %s3726_s14 = sld [smem:[%s4268_s0 + %s3530_s22]]   ;;  %s3534_s22 = smov 36  }
  0x30   :  { %s3746_s5 = sld [smem:[%s4268_s0 + %s3534_s22]]  }
  0x31   :  { %4299 = sst [smem:[#allocation47_spill]] %s3691_s4 }
  0x32   :  { %4300 = sst [smem:[#allocation48_spill]] %s3696_s27 }
  0x33   :  { %4301 = sst [smem:[#allocation49_spill]] %s3701_s20 }
  0x34   :  { %s3711_s4 = sld [smem:[%s4268_s0 + %s3527_s28]]   ;;  %s3531_s28 = smov 33  }
  0x35   :  { %s3716_s27 = sld [smem:[%s4268_s0 + %s3528_s7]]   ;;  %s3532_s7 = smov 34  }
  0x36   :  { %s3721_s20 = sld [smem:[%s4268_s0 + %s3529_s15]]   ;;  %s3533_s15 = smov 35  }
  0x37   :  { %s3736_s29 = sld [smem:[%s4268_s0 + %s3532_s7]]  }
  0x3a   :  { %4302 = sst [smem:[#allocation50_spill]] %s3711_s4 }
  0x3b   :  { %s3731_s4 = sld [smem:[%s4268_s0 + %s3531_s28]]   ;;  %s3535_s28 = smov 37  }
  0x3c   :  { %4303 = sst [smem:[#allocation51_spill]] %s3721_s20 }
  0x3d   :  { %s3741_s20 = sld [smem:[%s4268_s0 + %s3533_s15]]  }
  0x3e   :  { %s3751_s25 = sld [smem:[%s4268_s0 + %s3535_s28]]  }
  0x3f   :  { %80 = vsyncpa [#allocation3], 0 }
  0x40   :  { %81 = vsyncpa [#allocation6], 0 }
  0x41   :  { %82 = vsyncpa [#allocation9], 0 }
  0x42   :  { %83 = vsyncpa [#allocation12], 0 }
  0x43   :  { %84 = vsyncpa [#allocation15], 0 }
  0x44   :  { %85 = vsyncpa [#allocation18], 0 }
  0x45   :  { %86 = vsyncpa [#allocation21], 0  ;;  %s122_s7 = sshll.u32 %s3616_s19, 4  ;;  %s123_s7 = int_to_ptr.hbm [resolvable:$true] %s122_s7 }
  0x46   :  { %87 = vsyncpa [#allocation4], 0  ;;  %s3536_s10 = smov [#allocation5]   ;;  %s144_s15 = sshll.u32 %s3626_s30, 4  ;;  %s145_s15 = int_to_ptr.hbm [resolvable:$true] %s144_s15 }
  0x47   :  { %s124_s11 = sshll.u32 %s3536_s10, 4  ;;  %s3147_s0 = sshra.s32 %s123_s7, 4  ;;  %s125_s11 = int_to_ptr.vmem [resolvable:$true] %s124_s11  ;;  %s3148_s0 = int_to_ptr.hbm [resolvable:$true] %s3147_s0 }
  0x48   :  { %s3149_s16 = scalar_lea.hbm %s3148_s0, 1  ;;  %s3151_s18 = scalar_lea.hbm %s3616_s19, 1 }
  0x49   :  { %p3150_p0 = scmp.ne.s32.totalorder %s3148_s0, %s3149_s16  ;;  %p3152_p1 = scmp.lt.s32.totalorder %s3148_s0, %s3616_s19 }
  0x4a   :  { %p3153_p2 = scmp.lt.s32.totalorder %s3151_s18, %s3149_s16 }
  0x4c   :  { %p3154_p3 = por %p3153_p2, %p3152_p1 }
  0x4e   :  { %p3155_p4 = pnand %p3154_p3, %p3150_p0 }
  0x50   :  { %3158 = shalt.err (!%p3155_p4)
}
  0x51   :  { %127 = dma.hbm_to_vmem [thread:$0]  %s123_s7, 16, %s125_s11, [#allocation6]  }
  0x52   :  { %s3537_s22 = smov [#allocation8]   ;;  %s3171_s26 = sshra.s32 %s145_s15, 4  ;;  %s3172_s26 = int_to_ptr.hbm [resolvable:$true] %s3171_s26 }
  0x53   :  { %s146_s23 = sshll.u32 %s3537_s22, 4  ;;  %s3173_s28 = scalar_lea.hbm %s3172_s26, 1  ;;  %s147_s23 = int_to_ptr.vmem [resolvable:$true] %s146_s23 }
  0x54   :  { %p3174_p5 = scmp.ne.s32.totalorder %s3172_s26, %s3173_s28  ;;  %s3175_s1 = scalar_lea.hbm %s3626_s30, 1 }
  0x55   :  { %p3176_p6 = scmp.lt.s32.totalorder %s3172_s26, %s3626_s30  ;;  %p3177_p7 = scmp.lt.s32.totalorder %s3175_s1, %s3173_s28 }
  0x57   :  { %p3178_p8 = por %p3177_p7, %p3176_p6 }
  0x59   :  { %p3179_p9 = pnand %p3178_p8, %p3174_p5 }
  0x5b   :  { %3182 = shalt.err (!%p3179_p9)
}
  0x5c   :  { %149 = dma.hbm_to_vmem [thread:$0]  %s145_s15, 16, %s147_s23, [#allocation9]  }
  0x5d   :  { %s177_s19 = sshll.u32 %s3661_s17, 4  ;;  %s3538_s2 = smov [#allocation11]   ;;  %s178_s19 = int_to_ptr.hbm [resolvable:$true] %s177_s19 }
  0x5e   :  { %s179_s7 = sshll.u32 %s3538_s2, 4  ;;  %s217_s10 = sshll.u32 %s3706_s6, 4  ;;  %s180_s7 = int_to_ptr.vmem [resolvable:$true] %s179_s7  ;;  %s218_s10 = int_to_ptr.hbm [resolvable:$true] %s217_s10 }
  0x5f   :  { %s3195_s11 = sshra.s32 %s178_s19, 4  ;;  %s3199_s30 = scalar_lea.hbm %s3661_s17, 2  ;;  %s3196_s11 = int_to_ptr.hbm [resolvable:$true] %s3195_s11 }
  0x60   :  { %s3197_s0 = scalar_lea.hbm %s3196_s11, 2  ;;  %p3200_p11 = scmp.lt.s32.totalorder %s3196_s11, %s3661_s17 }
  0x61   :  { %p3198_p10 = scmp.ne.s32.totalorder %s3196_s11, %s3197_s0  ;;  %p3201_p12 = scmp.lt.s32.totalorder %s3199_s30, %s3197_s0 }
  0x63   :  { %p3202_p13 = por %p3201_p12, %p3200_p11 }
  0x65   :  { %p3203_p0 = pnand %p3202_p13, %p3198_p10 }
  0x67   :  { %3206 = shalt.err (!%p3203_p0)
}
  0x68   :  { %s3539_s15 = smov 16   ;;  %s3540_s16 = smov 1  }
  0x69   :  { %185 = dma.hbm_to_vmem [thread:$0]  %s178_s19, 32, %s180_s7, [#allocation12], %s3539_s15, %s3539_s15, %s3540_s16  }
  0x6a   :  { %s3541_s18 = smov [#allocation14]   ;;  %s247_s23 = sshll.u32 %s3726_s14, 4  ;;  %s3767_s23 = int_to_ptr.hbm [resolvable:$true] %s247_s23 }
  0x6b   :  { %s219_s22 = sshll.u32 %s3541_s18, 4  ;;  %s3219_s17 = sshra.s32 %s218_s10, 4  ;;  %s220_s22 = int_to_ptr.vmem [resolvable:$true] %s219_s22  ;;  %s3220_s17 = int_to_ptr.hbm [resolvable:$true] %s3219_s17 }
  0x6c   :  { %s3221_s26 = scalar_lea.hbm %s3220_s17, 2  ;;  %s3223_s28 = scalar_lea.hbm %s3706_s6, 2 }
  0x6d   :  { %p3222_p1 = scmp.ne.s32.totalorder %s3220_s17, %s3221_s26  ;;  %p3224_p2 = scmp.lt.s32.totalorder %s3220_s17, %s3706_s6 }
  0x6e   :  { %p3225_p3 = scmp.lt.s32.totalorder %s3223_s28, %s3221_s26 }
  0x70   :  { %p3226_p4 = por %p3225_p3, %p3224_p2 }
  0x72   :  { %p3227_p5 = pnand %p3226_p4, %p3222_p1 }
  0x74   :  { %3230 = shalt.err (!%p3227_p5)
}
  0x75   :  { %225 = dma.hbm_to_vmem [thread:$0]  %s218_s10, 32, %s220_s22, [#allocation15], %s3539_s15, %s3539_s15, %s3540_s16  }
  0x76   :  { %s273_s1 = sshll.u32 %s3736_s29, 4  ;;  %s3542_s19 = smov [#allocation17]   ;;  %s3775_s1 = int_to_ptr.hbm [resolvable:$true] %s273_s1 }
  0x77   :  { %s249_s2 = sshll.u32 %s3542_s19, 4  ;;  %s3243_s7 = sshra.s32 %s3767_s23, 4  ;;  %s250_s2 = int_to_ptr.vmem [resolvable:$true] %s249_s2  ;;  %s3244_s7 = int_to_ptr.hbm [resolvable:$true] %s3243_s7 }
  0x78   :  { %s3245_s6 = scalar_lea.hbm %s3244_s7, 2  ;;  %s3247_s11 = scalar_lea.hbm %s3726_s14, 2 }
  0x79   :  { %p3246_p6 = scmp.ne.s32.totalorder %s3244_s7, %s3245_s6  ;;  %p3248_p7 = scmp.lt.s32.totalorder %s3244_s7, %s3726_s14 }
  0x7a   :  { %p3249_p8 = scmp.lt.s32.totalorder %s3247_s11, %s3245_s6 }
  0x7c   :  { %p3250_p9 = por %p3249_p8, %p3248_p7 }
  0x7e   :  { %p3251_p10 = pnand %p3250_p9, %p3246_p6 }
  0x80   :  { %3254 = shalt.err (!%p3251_p10)
}
  0x81   :  { %255 = dma.hbm_to_vmem [thread:$0]  %s3767_s23, 32, %s250_s2, [#allocation18], %s3539_s15, %s3539_s15, %s3540_s16  }
  0x82   :  { %s3543_s10 = smov [#allocation20]   ;;  %s109_s30 = sshll.u32 %s3606_s8, 4  ;;  %s110_s30 = int_to_ptr.hbm [resolvable:$true] %s109_s30 }
  0x83   :  { %s275_s0 = sshll.u32 %s3543_s10, 4  ;;  %s3267_s18 = sshra.s32 %s3775_s1, 4  ;;  %s276_s0 = int_to_ptr.vmem [resolvable:$true] %s275_s0  ;;  %s3268_s18 = int_to_ptr.hbm [resolvable:$true] %s3267_s18 }
  0x84   :  { %s3269_s14 = scalar_lea.hbm %s3268_s18, 2  ;;  %s3271_s22 = scalar_lea.hbm %s3736_s29, 2 }
  0x85   :  { %p3270_p11 = scmp.ne.s32.totalorder %s3268_s18, %s3269_s14  ;;  %p3272_p12 = scmp.lt.s32.totalorder %s3268_s18, %s3736_s29 }
  0x86   :  { %p3273_p13 = scmp.lt.s32.totalorder %s3271_s22, %s3269_s14 }
  0x88   :  { %p3274_p0 = por %p3273_p13, %p3272_p12 }
  0x8a   :  { %p3275_p1 = pnand %p3274_p0, %p3270_p11 }
  0x8c   :  { %3278 = shalt.err (!%p3275_p1)
}
  0x8d   :  { %281 = dma.hbm_to_vmem [thread:$0]  %s3775_s1, 32, %s276_s0, [#allocation21], %s3539_s15, %s3539_s15, %s3540_s16  }
  0x8e   :  { %s133_s23 = sshll.u32 %s3621_s24, 4  ;;  %s3544_s17 = smov [#allocation2]   ;;  %s134_s23 = int_to_ptr.hbm [resolvable:$true] %s133_s23 }
  0x8f   :  { %s111_s26 = sshll.u32 %s3544_s17, 4  ;;  %s3291_s28 = sshra.s32 %s110_s30, 4  ;;  %s112_s26 = int_to_ptr.vmem [resolvable:$true] %s111_s26  ;;  %s3292_s28 = int_to_ptr.hbm [resolvable:$true] %s3291_s28 }
  0x90   :  { %s3293_s29 = scalar_lea.hbm %s3292_s28, 1  ;;  %s3295_s19 = scalar_lea.hbm %s3606_s8, 1 }
  0x91   :  { %p3294_p2 = scmp.ne.s32.totalorder %s3292_s28, %s3293_s29  ;;  %p3296_p3 = scmp.lt.s32.totalorder %s3292_s28, %s3606_s8 }
  0x92   :  { %p3297_p4 = scmp.lt.s32.totalorder %s3295_s19, %s3293_s29 }
  0x94   :  { %p3298_p5 = por %p3297_p4, %p3296_p3 }
  0x96   :  { %p3299_p6 = pnand %p3298_p5, %p3294_p2 }
  0x98   :  { %3302 = shalt.err (!%p3299_p6)
}
  0x99   :  { %114 = dma.hbm_to_vmem [thread:$0]  %s110_s30, 16, %s112_s26, [#allocation3]  }
  0x9a   :  { %s3545_s1 = smov [#allocation7]   ;;  %s164_s7 = sshll.u32 %s3656_s21, 4  ;;  %s3796_s7 = int_to_ptr.hbm [resolvable:$true] %s164_s7 }
  0x9b   :  { %s135_s2 = sshll.u32 %s3545_s1, 4  ;;  %s3315_s6 = sshra.s32 %s134_s23, 4  ;;  %s136_s2 = int_to_ptr.vmem [resolvable:$true] %s135_s2  ;;  %s3316_s6 = int_to_ptr.hbm [resolvable:$true] %s3315_s6 }
  0x9c   :  { %s3317_s11 = scalar_lea.hbm %s3316_s6, 1  ;;  %s3319_s10 = scalar_lea.hbm %s3621_s24, 1 }
  0x9d   :  { %p3318_p7 = scmp.ne.s32.totalorder %s3316_s6, %s3317_s11  ;;  %p3320_p8 = scmp.lt.s32.totalorder %s3316_s6, %s3621_s24 }
  0x9e   :  { %p3321_p9 = scmp.lt.s32.totalorder %s3319_s10, %s3317_s11 }
  0xa0   :  { %p3322_p10 = por %p3321_p9, %p3320_p8 }
  0xa2   :  { %p3323_p11 = pnand %p3322_p10, %p3318_p7 }
  0xa4   :  { %3326 = shalt.err (!%p3323_p11)
}
  0xa5   :  { %138 = dma.hbm_to_vmem [thread:$0]  %s134_s23, 16, %s136_s2, [#allocation6]  }
  0xa6   :  { %s190_s8 = sshll.u32 %s3666_s12, 4  ;;  %s3546_s0 = smov [#allocation10]   ;;  %s3801_s8 = int_to_ptr.hbm [resolvable:$true] %s190_s8 }
  0xa7   :  { %s166_s30 = sshll.u32 %s3546_s0, 4  ;;  %s3339_s18 = sshra.s32 %s3796_s7, 4  ;;  %s167_s30 = int_to_ptr.vmem [resolvable:$true] %s166_s30  ;;  %s3340_s18 = int_to_ptr.hbm [resolvable:$true] %s3339_s18 }
  0xa8   :  { %s3341_s14 = scalar_lea.hbm %s3340_s18, 2  ;;  %s3343_s24 = scalar_lea.hbm %s3656_s21, 2 }
  0xa9   :  { %p3342_p12 = scmp.ne.s32.totalorder %s3340_s18, %s3341_s14  ;;  %p3344_p13 = scmp.lt.s32.totalorder %s3340_s18, %s3656_s21 }
  0xaa   :  { %p3345_p0 = scmp.lt.s32.totalorder %s3343_s24, %s3341_s14 }
  0xac   :  { %p3346_p1 = por %p3345_p0, %p3344_p13 }
  0xae   :  { %p3347_p2 = pnand %p3346_p1, %p3342_p12 }
  0xb0   :  { %3350 = shalt.err (!%p3347_p2)
}
  0xb1   :  { %172 = dma.hbm_to_vmem [thread:$0]  %s3796_s7, 32, %s167_s30, [#allocation9], %s3539_s15, %s3539_s15, %s3540_s16  }
  0xb2   :  { %s3547_s22 = smov [#allocation13]   ;;  %s232_s17 = sshll.u32 %s3716_s27, 4  ;;  %s3811_s17 = int_to_ptr.hbm [resolvable:$true] %s232_s17 }
  0xb3   :  { %s192_s23 = sshll.u32 %s3547_s22, 4  ;;  %s3363_s21 = sshra.s32 %s3801_s8, 4  ;;  %s193_s23 = int_to_ptr.vmem [resolvable:$true] %s192_s23  ;;  %s3364_s21 = int_to_ptr.hbm [resolvable:$true] %s3363_s21 }
  0xb4   :  { %s3365_s26 = scalar_lea.hbm %s3364_s21, 2  ;;  %s3367_s28 = scalar_lea.hbm %s3666_s12, 2 }
  0xb5   :  { %p3366_p3 = scmp.ne.s32.totalorder %s3364_s21, %s3365_s26  ;;  %p3368_p4 = scmp.lt.s32.totalorder %s3364_s21, %s3666_s12 }
  0xb6   :  { %p3369_p5 = scmp.lt.s32.totalorder %s3367_s28, %s3365_s26 }
  0xb8   :  { %p3370_p6 = por %p3369_p5, %p3368_p4 }
  0xba   :  { %p3371_p7 = pnand %p3370_p6, %p3366_p3 }
  0xbc   :  { %3374 = shalt.err (!%p3371_p7)
}
  0xbd   :  { %198 = dma.hbm_to_vmem [thread:$0]  %s3801_s8, 32, %s193_s23, [#allocation12], %s3539_s15, %s3539_s15, %s3540_s16  }
  0xbe   :  { %s260_s29 = sshll.u32 %s3731_s4, 4  ;;  %s3548_s19 = smov [#allocation16]   ;;  %s3821_s29 = int_to_ptr.hbm [resolvable:$true] %s260_s29 }
  0xbf   :  { %s234_s1 = sshll.u32 %s3548_s19, 4  ;;  %s3387_s12 = sshra.s32 %s3811_s17, 4  ;;  %s235_s1 = int_to_ptr.vmem [resolvable:$true] %s234_s1  ;;  %s3388_s12 = int_to_ptr.hbm [resolvable:$true] %s3387_s12 }
  0xc0   :  { %s3389_s2 = scalar_lea.hbm %s3388_s12, 2  ;;  %s3391_s7 = scalar_lea.hbm %s3716_s27, 2 }
  0xc1   :  { %p3390_p8 = scmp.ne.s32.totalorder %s3388_s12, %s3389_s2  ;;  %p3392_p9 = scmp.lt.s32.totalorder %s3388_s12, %s3716_s27 }
  0xc2   :  { %p3393_p10 = scmp.lt.s32.totalorder %s3391_s7, %s3389_s2 }
  0xc4   :  { %p3394_p11 = por %p3393_p10, %p3392_p9 }
  0xc6   :  { %p3395_p12 = pnand %p3394_p11, %p3390_p8 }
  0xc8   :  { %3398 = shalt.err (!%p3395_p12)
}
  0xc9   :  { %240 = dma.hbm_to_vmem [thread:$0]  %s3811_s17, 32, %s235_s1, [#allocation15], %s3539_s15, %s3539_s15, %s3540_s16  }
  0xca   :  { %s3549_s6 = smov [#allocation19]   ;;  %s289_s10 = sshll.u32 %s3746_s5, 4  ;;  %s290_s10 = int_to_ptr.hbm [resolvable:$true] %s289_s10 }
  0xcb   :  { %s262_s11 = sshll.u32 %s3549_s6, 4  ;;  %s3411_s8 = sshra.s32 %s3821_s29, 4  ;;  %s263_s11 = int_to_ptr.vmem [resolvable:$true] %s262_s11  ;;  %s3412_s8 = int_to_ptr.hbm [resolvable:$true] %s3411_s8 }
  0xcc   :  { %s3413_s27 = scalar_lea.hbm %s3412_s8, 2  ;;  %s3415_s0 = scalar_lea.hbm %s3731_s4, 2 }
  0xcd   :  { %p3414_p13 = scmp.ne.s32.totalorder %s3412_s8, %s3413_s27  ;;  %p3416_p0 = scmp.lt.s32.totalorder %s3412_s8, %s3731_s4 }
  0xce   :  { %p3417_p1 = scmp.lt.s32.totalorder %s3415_s0, %s3413_s27 }
  0xd0   :  { %p3418_p2 = por %p3417_p1, %p3416_p0 }
  0xd2   :  { %p3419_p3 = pnand %p3418_p2, %p3414_p13 }
  0xd4   :  { %3422 = shalt.err (!%p3419_p3)
}
  0xd5   :  { %268 = dma.hbm_to_vmem [thread:$0]  %s3821_s29, 32, %s263_s11, [#allocation18], %s3539_s15, %s3539_s15, %s3540_s16  }
  0xd6   :  { %s3550_s30 = smov [#allocation22]   ;;  %s3435_s14 = sshra.s32 %s290_s10, 4  ;;  %s3436_s14 = int_to_ptr.hbm [resolvable:$true] %s3435_s14 }
  0xd7   :  { %s291_s18 = sshll.u32 %s3550_s30, 4  ;;  %s3437_s24 = scalar_lea.hbm %s3436_s14, 1  ;;  %s292_s18 = int_to_ptr.vmem [resolvable:$true] %s291_s18 }
  0xd8   :  { %p3438_p4 = scmp.ne.s32.totalorder %s3436_s14, %s3437_s24  ;;  %s3439_s4 = scalar_lea.hbm %s3746_s5, 1 }
  0xd9   :  { %p3440_p5 = scmp.lt.s32.totalorder %s3436_s14, %s3746_s5  ;;  %p3441_p6 = scmp.lt.s32.totalorder %s3439_s4, %s3437_s24 }
  0xdb   :  { %p3442_p7 = por %p3441_p6, %p3440_p5 }
  0xdd   :  { %p3443_p8 = pnand %p3442_p7, %p3438_p4 }
  0xdf   :  { %3446 = shalt.err (!%p3443_p8)
}
  0xe0   :  { %294 = dma.hbm_to_vmem [thread:$0]  %s290_s10, 16, %s292_s18, [#allocation21]  }
  0xe1   :  { %3483 = dma.done.wait [#allocation3], 16  }
  0xe2   :  { %3484 = vsyncadd [#allocation3], 4294967280 }
  0xe3   :  { %3485 = dma.done.wait [#allocation6], 32  }
  0xe4   :  { %3486 = vsyncadd [#allocation6], 4294967264 }
  0xe5   :  { %3487 = dma.done.wait [#allocation9], 48  }
  0xe6   :  { %3488 = vsyncadd [#allocation9], 4294967248 }
  0xe7   :  { %3489 = dma.done.wait [#allocation12], 64  }
  0xe8   :  { %3490 = vsyncadd [#allocation12], 4294967232 }
  0xe9   :  { %3491 = dma.done.wait [#allocation15], 64  }
  0xea   :  { %3492 = vsyncadd [#allocation15], 4294967232 }
  0xeb   :  { %3493 = dma.done.wait [#allocation18], 64  }
  0xec   :  { %3494 = vsyncadd [#allocation18], 4294967232 }
  0xed   :  { %3495 = dma.done.wait [#allocation21], 48  }
  0xee   :  { %3496 = vsyncadd [#allocation21], 4294967248  ;;  %s4304_s5 = sld [smem:[#allocation35_spill]]  ;;  %v366_v0 = vlaneseq  ;;  %v3841_v2 = vld [vmem:[%s3571_s9] sm:$0x3]  ;;  %v359_v6 = vld [vmem:[%s3576_s13 + $0x8] sm:$0xff] }
  0xef   :  { %s4305_s15 = sld [smem:[#allocation32_spill]]  ;;  %v2897_v3 = vld [vmem:[%s3601_s3] sm:$0xff]  ;;  %v365_v5 = vperm.slane %v3841_v2, 0  ;;  %vm402_vm0 = vcmask 130048   ;;  %v372_v8 = vperm.slane %v3841_v2, 1  ;;  %vm455_vm1 = vcmask 64512  }
  0xf0   :  { %v367_v1 = vshrl.u32 %v366_v0, 7  ;;  %v358_v4 = vld [vmem:[%s3576_s13] sm:$0xff]  ;;  %440 = vmatpush.bf16.msra.mxu1 %v2897_v3  ;;  %s4306_s9 = sld [smem:[#allocation36_spill]]  ;;  %s3551_s13 = smov 120   ;;  %v2720_v46 = vadd.f32 -1.0, %v3841_v2  ;;  %vm526_vm2 = vcmask 1043456  }
  0xf1   :  { %v420_v7 = vpack.c.bf16 %v359_v6, %v358_v4  ;;  %v3003_v13 = vld [vmem:[#allocation2] ss:$0 sm:$0xff]  ;;  %s3552_s3 = smov 112   ;;  %s3553_s16 = smov 104  }
  0xf2   :  { %2977 = vset.pattern.permute.xlu0 %v367_v1  ;;  %v351_v47 = vmul.f32 1e+09, %v2720_v46  ;;  %s4307_s22 = sld [smem:[#allocation37_spill]]  ;;  %s3554_s23 = smov 8  }
  0xf3   :  { %2731 = vmatmul.msk.bf16.vlgmr.msra.gmra.mxu1 %vm402_vm0, %v420_v7  ;;  %s4308_s17 = sld [smem:[#allocation38_spill]]  ;;  %s2664_s18 = sshll.u32 %s3751_s25, 4  ;;  %s2665_s18 = int_to_ptr.hbm [resolvable:$true] %s2664_s18 }
  0xf4   :  { %v2896_v9 = vld [vmem:[%s4304_s5] sm:$0xff]  ;;  %v3878_v48 = vperm.slane %v351_v47, 0  ;;  %v353_v50 = vrot.slane %v351_v47, 1  ;;  %s4309_s21 = sld [smem:[#allocation40_spill]]  ;;  %s3471_s14 = sshra.s32 %s2665_s18, 4  ;;  %s3472_s14 = int_to_ptr.hbm [resolvable:$true] %s3471_s14 }
  0xf5   :  { %413 = vmatpush.bf16.msra.mxu0 %v2896_v9  ;;  %v364_v11 = vld [vmem:[%s4305_s15] sm:$0xff]  ;;  %s4310_s26 = sld [smem:[#allocation41_spill]]  ;;  %s3473_s24 = scalar_lea.hbm %s3472_s14, 16 }
  0xf6   :  { %v3004_v30 = vld [vmem:[%s4306_s9] ss:$0 sm:$0xff]  ;;  %v3882_v53 = vperm.slane %v353_v50, 0  ;;  %s4311_s28 = sld [smem:[#allocation39_spill]]  ;;  %p3474_p9 = scmp.ne.s32.totalorder %s3472_s14, %s3473_s24 }
  0xf7   :  { %s4312_s29 = sld [smem:[#allocation42_spill]]  ;;  %s3475_s4 = scalar_lea.hbm %s3751_s25, 16 }
  0xf8   :  { %s4313_s19 = sld [smem:[#allocation45_spill]]  ;;  %p3476_p10 = scmp.lt.s32.totalorder %s3472_s14, %s3751_s25 }
  0xf9   :  { %s4314_s1 = sld [smem:[#allocation33_spill]]  ;;  %p3477_p11 = scmp.lt.s32.totalorder %s3475_s4, %s3473_s24 }
  0xfa   :  { %370 = vperm.xlu0 %2977, %v365_v5   ;;  %s4315_s12 = sld [smem:[#allocation43_spill]] }
  0xfb   :  { %s4316_s2 = sld [smem:[#allocation46_spill]]  ;;  %p3478_p12 = por %p3477_p11, %p3476_p10 }
  0xfc   :  { %s4317_s7 = sld [smem:[#allocation44_spill]] }
  0xfd   :  { %s4318_s6 = sld [smem:[#allocation34_spill]]  ;;  %p3479_p13 = pnand %p3478_p12, %p3474_p9 }
  0xfe   :  { %s4319_s11 = sld [smem:[#allocation47_spill]] }
  0xff   :  { %s4320_s10 = sld [smem:[#allocation48_spill]] }
 0x100   :  { %s4321_s8 = sld [smem:[#allocation50_spill]] }
 0x101   :  { %s4322_s27 = sld [smem:[#allocation49_spill]] }
 0x102   :  { %377 = vperm.xlu0 %2977, %v372_v8   ;;  %s4323_s0 = sld [smem:[#allocation51_spill]] }
 0x16c   :  { %v371_v10 = vpop.permute.xlu0 %370 }
 0x16d   :  { %v3851_v14 = vmul.f32 %v371_v10, %v364_v11 }
 0x170   :  { %v442_v17 = vpop.f32.mrf.mxu1 }
 0x171   :  { %v443_v18 = vadd.f32 %v3003_v13, %v442_v17 }
 0x173   :  { %v449_v19 = vpack.c.bf16 %v443_v18, %v443_v18 }
 0x174   :  { %v378_v12 = vpop.permute.xlu0 %377 }
 0x175   :  { %v3853_v15 = vmul.f32 %v378_v12, %v364_v11  ;;  %v519_v20 = vunpack.c.l.b16 %v449_v19  ;;  %v460_v21 = vsel %vm455_vm1, %v449_v19, 0 }
 0x176   :  { %469 = vmatpush.bf16.xpose.msra.mxu2 %v460_v21 }
 0x177   :  { %v392_v16 = vpack.c.bf16 %v3853_v15, %v3851_v14  ;;  %v3859_v22 = vpack.c.b16 %v519_v20, %v519_v20 }
 0x178   :  { %v444_v23 = vpop.f32.mrf.mxu1 }
 0x179   :  { %2726 = vmatmul.msk.bf16.vlgmr.msra.gmra.mxu0 %vm402_vm0, %v392_v16  ;;  %v445_v24 = vadd.f32 %v3003_v13, %v444_v23  ;;  %572 = vrot.lane.b32.xlu1 %v3859_v22, %s3551_s13 }
 0x17b   :  { %v450_v25 = vpack.c.bf16 %v445_v24, %v445_v24 }
 0x17d   :  { %v479_v26 = vsel %vm455_vm1, %v450_v25, 0  ;;  %v544_v27 = vunpack.c.l.b16 %v450_v25 }
 0x17e   :  { %488 = vmatpush.bf16.xpose.msra.mxu3 %v479_v26 }
 0x17f   :  { %v3864_v28 = vpack.c.b16 %v544_v27, %v544_v27 }
 0x181   :  { %598 = vrot.lane.b32.xlu1 %v3864_v28, %s3551_s13 }
 0x1eb   :  { %v573_v29 = vpop.permute.xlu1 %572 }
 0x1ec   :  { %v578_v31 = vsel %vm455_vm1, %v573_v29, 0 }
 0x1ed   :  { %587 = vmatpush.bf16.xpose.msrb.mxu2 %v578_v31 }
 0x1f3   :  { %v599_v35 = vpop.permute.xlu1 %598 }
 0x1f4   :  { %v604_v37 = vsel %vm455_vm1, %v599_v35, 0 }
 0x1f5   :  { %613 = vmatpush.bf16.xpose.msrb.mxu3 %v604_v37 }
 0x1f6   :  { %v415_v32 = vpop.f32.mrf.mxu0 }
 0x1f7   :  { %v416_v33 = vadd.f32 %v3004_v30, %v415_v32 }
 0x1f9   :  { %v447_v34 = vpack.c.bf16 %v416_v33, %v416_v33 }
 0x1fb   :  { %2732 = vmatmul.msk.bf16.vlgmr.msra.gmra.mxu2 %vm455_vm1, %v447_v34  ;;  %v568_v36 = vunpack.c.l.b16 %v447_v34 }
 0x1fd   :  { %v569_v38 = vpack.c.b16 %v568_v36, %v568_v36 }
 0x1fe   :  { %v417_v39 = vpop.f32.mrf.mxu0 }
 0x1ff   :  { %v418_v40 = vadd.f32 %v3004_v30, %v417_v39  ;;  %570 = vrot.lane.b32.xlu2 %v569_v38, %s3551_s13 }
 0x201   :  { %v448_v41 = vpack.c.bf16 %v418_v40, %v418_v40 }
 0x203   :  { %v594_v42 = vunpack.c.l.b16 %v448_v41  ;;  %2733 = vmatmul.msk.bf16.vlgmr.msra.gmra.mxu3 %vm455_vm1, %v448_v41 }
 0x205   :  { %v595_v43 = vpack.c.b16 %v594_v42, %v594_v42 }
 0x207   :  { %596 = vrot.lane.b32.xlu2 %v595_v43, %s3551_s13 }
 0x259   :  { %v571_v44 = vpop.permute.xlu2 %570 }
 0x25a   :  { %2736 = vmatmul.msk.bf16.vlgmr.msrb.gmra.mxu2 %vm455_vm1, %v571_v44 }
 0x261   :  { %v597_v45 = vpop.permute.xlu2 %596 }
 0x262   :  { %2737 = vmatmul.msk.bf16.vlgmr.msrb.gmra.mxu3 %vm455_vm1, %v597_v45 }
 0x27e   :  { %v471_v49 = vpop.f32.mrf.mxu2 }
 0x27f   :  { %v472_v51 = vadd.f32 %v471_v49, %v3878_v48 }
 0x281   :  { %v494_v52 = vsel %vm455_vm1, %v472_v51, -inf }
 0x282   :  { %495 = vmax.xlane.f32.xlu0 %v494_v52 }
 0x286   :  { %v473_v54 = vpop.f32.mrf.mxu2  ;;  %v490_v55 = vpop.f32.mrf.mxu3 }
 0x287   :  { %v491_v56 = vadd.f32 %v490_v55, %v3882_v53 }
 0x289   :  { %v497_v57 = vsel %vm455_vm1, %v491_v56, -inf }
 0x28a   :  { %498 = vmax.xlane.f32.xlu1 %v497_v57 }
 0x28e   :  { %v492_v58 = vpop.f32.mrf.mxu3 }
 0x296   :  { %546 = vrot.lane.b32.xlu0 %v3864_v28, %s3552_s3 }
 0x2dd   :  { %v589_v59 = vpop.f32.mrf.mxu2 }
 0x2de   :  { %v590_v60 = vadd.f32 %v589_v59, %v3878_v48 }
 0x2e0   :  { %v619_v61 = vsel %vm455_vm1, %v590_v60, -inf }
 0x2e1   :  { %620 = vmax.xlane.f32.xlu2 %v619_v61 }
 0x2e5   :  { %v591_v62 = vpop.f32.mrf.mxu2  ;;  %v615_v63 = vpop.f32.mrf.mxu3 }
 0x2e6   :  { %v616_v0 = vadd.f32 %v615_v63, %v3882_v53 }
 0x2e8   :  { %v622_v1 = vsel %vm455_vm1, %v616_v0, -inf }
 0x2e9   :  { %623 = vmax.xlane.f32.xlu2 %v622_v1 }
 0x2ed   :  { %v617_v2 = vpop.f32.mrf.mxu3 }
 0x2f5   :  { %v496_v3 = vpop.xlane.xlu0 %495 }
 0x2f6   :  { %v500_v4 = vsub.f32 %v472_v51, %v496_v3  ;;  %v3005_v3 = vld [vmem:[#allocation5] ss:$0 sm:$0xff] }
 0x2f8   :  { %v502_v5 = vmul.f32 1.442695, %v500_v4 }
 0x2fa   :  { %3037 = vpow2.f32 %v502_v5 }
 0x2fd   :  { %v499_v6 = vpop.xlane.xlu1 %498 }
 0x2fe   :  { %v501_v7 = vsub.f32 %v491_v56, %v499_v6 }
 0x300   :  { %v3038_v8 = vpop.eup %3037  ;;  %v504_v9 = vmul.f32 1.442695, %v501_v7 }
 0x301   :  { %521 = vrot.lane.b32.xlu2 %v3859_v22, %s3552_s3  ;;  %v506_v10 = vsel %vm455_vm1, %v3038_v8, 0.0 }
 0x302   :  { %3039 = vpow2.f32 %v504_v9  ;;  %507 = vadd.xlane.f32.xlu0 %v506_v10 }
 0x308   :  { %v3040_v11 = vpop.eup %3039  ;;  %v547_v12 = vpop.permute.xlu0 %546 }
 0x309   :  { %v552_v13 = vsel %vm526_vm2, %v547_v12, 0  ;;  %v509_v16 = vsel %vm455_vm1, %v3040_v11, 0.0  ;;  %v3555_v12 = vmov 16.0  }
 0x30a   :  { %561 = vmatpush.bf16.msrb.mxu1 %v552_v13  ;;  %510 = vadd.xlane.f32.xlu1 %v509_v16 }
 0x316   :  { %664 = vrot.lane.b32.xlu0 %v3864_v28, %s3553_s16 }
 0x354   :  { %v621_v17 = vpop.xlane.xlu2 %620 }
 0x355   :  { %v625_v18 = vsub.f32 %v590_v60, %v621_v17  ;;  %v2898_v60 = vld [vmem:[%s4307_s22] sm:$0xff] }
 0x356   :  { %715 = vmatpush.bf16.msra.mxu2 %v2898_v60 }
 0x357   :  { %v627_v19 = vmul.f32 1.442695, %v625_v18 }
 0x359   :  { %3041 = vpow2.f32 %v627_v19 }
 0x35c   :  { %v624_v20 = vpop.xlane.xlu2 %623 }
 0x35d   :  { %v626_v21 = vsub.f32 %v616_v0, %v624_v20 }
 0x35f   :  { %v3042_v23 = vpop.eup %3041  ;;  %v629_v24 = vmul.f32 1.442695, %v626_v21 }
 0x360   :  { %v631_v25 = vsel %vm455_vm1, %v3042_v23, 0.0 }
 0x361   :  { %3043 = vpow2.f32 %v629_v24  ;;  %632 = vadd.xlane.f32.xlu1 %v631_v25 }
 0x364   :  { %v522_v26 = vpop.permute.xlu2 %521 }
 0x365   :  { %v528_v27 = vsel %vm526_vm2, %v522_v26, 0 }
 0x366   :  { %537 = vmatpush.bf16.msrb.mxu0 %v528_v27 }
 0x367   :  { %v3044_v29 = vpop.eup %3043 }
 0x368   :  { %v634_v30 = vsel %vm455_vm1, %v3044_v29, 0.0 }
 0x369   :  { %635 = vadd.xlane.f32.xlu1 %v634_v30 }
 0x375   :  { %v508_v28 = vpop.xlane.xlu0 %507 }
 0x376   :  { %3045 = vrcp.f32 %v508_v28 }
 0x37c   :  { %v3046_v31 = vpop.eup %3045 }
 0x37d   :  { %v514_v32 = vmul.f32 %v3046_v31, %v3038_v8  ;;  %v511_v33 = vpop.xlane.xlu1 %510 }
 0x37e   :  { %3047 = vrcp.f32 %v511_v33  ;;  %v2900_v33 = vld [vmem:[%s4309_s21] sm:$0xff] }
 0x37f   :  { %v516_v34 = vpack.c.bf16 %v514_v32, %v514_v32  ;;  %v2899_v32 = vld [vmem:[%s4308_s17] sm:$0xff] }
 0x380   :  { %816 = vmatpush.bf16.msra.mxu3 %v2899_v32 }
 0x381   :  { %2734 = vmatmul.msk.bf16.vlgmr.msrb.gmra.mxu0 %vm455_vm1, %v516_v34 }
 0x382   :  { %643 = vrot.lane.b32.xlu1 %v3859_v22, %s3553_s16 }
 0x384   :  { %v3048_v35 = vpop.eup %3047 }
 0x385   :  { %v515_v36 = vmul.f32 %v3048_v35, %v3040_v11 }
 0x387   :  { %v517_v37 = vpack.c.bf16 %v515_v36, %v515_v36 }
 0x388   :  { %v665_v38 = vpop.permute.xlu0 %664 }
 0x389   :  { %v670_v39 = vsel %vm526_vm2, %v665_v38, 0  ;;  %2735 = vmatmul.msk.bf16.vlgmr.msrb.gmra.mxu1 %vm455_vm1, %v517_v37 }
 0x38a   :  { %679 = vmatpush.bf16.msra.mxu1 %v670_v39 }
 0x3d4   :  { %v633_v40 = vpop.xlane.xlu1 %632 }
 0x3dc   :  { %v636_v41 = vpop.xlane.xlu1 %635 }
 0x3dd   :  { %3049 = vrcp.f32 %v636_v41 }
 0x3de   :  { %3051 = vrcp.f32 %v633_v40 }
 0x3df   :  { %3053 = vrcp.f32 %v3555_v12 }
 0x3e3   :  { %v3050_v42 = vpop.eup %3049 }
 0x3e4   :  { %v640_v43 = vmul.f32 %v3050_v42, %v3044_v29  ;;  %v3052_v45 = vpop.eup %3051 }
 0x3e5   :  { %v639_v22 = vmul.f32 %v3052_v45, %v3042_v23  ;;  %v3054_v13 = vpop.eup %3053 }
 0x3e6   :  { %v642_v44 = vpack.c.bf16 %v640_v43, %v640_v43  ;;  %v731_v16 = vmul.f32 16.0, %v3054_v13  ;;  %vm735_vm3 = vweird.f32 %v3054_v13 }
 0x3e7   :  { %v641_v49 = vpack.c.bf16 %v639_v22, %v639_v22 }
 0x3e8   :  { %2739 = vmatmul.msk.bf16.vlgmr.msra.gmra.mxu1 %vm455_vm1, %v642_v44  ;;  %v732_v17 = vsub.f32 1.0, %v731_v16 }
 0x3ea   :  { %v733_v18 = vmul.f32 %v3054_v13, %v732_v17 }
 0x3ec   :  { %v734_v19 = vadd.f32 %v3054_v13, %v733_v18 }
 0x3f4   :  { %v644_v46 = vpop.permute.xlu1 %643 }
 0x3f5   :  { %v649_v47 = vsel %vm526_vm2, %v644_v46, 0 }
 0x3f6   :  { %658 = vmatpush.bf16.msra.mxu0 %v649_v47 }
 0x3f9   :  { %2738 = vmatmul.msk.bf16.vlgmr.msra.gmra.mxu0 %vm455_vm1, %v641_v49 }
 0x3fa   :  { %839 = vmatpush.bf16.msrb.mxu0 %v2900_v33 }
 0x3fe   :  { %v539_v50 = vpop.f32.mrf.mxu0 }
 0x406   :  { %v541_v51 = vpop.f32.mrf.mxu0  ;;  %v563_v52 = vpop.f32.mrf.mxu1 }
 0x40e   :  { %v565_v54 = vpop.f32.mrf.mxu1 }
 0x465   :  { %v681_v55 = vpop.f32.mrf.mxu1 }
 0x46d   :  { %v683_v56 = vpop.f32.mrf.mxu1 }
 0x476   :  { %v660_v57 = vpop.f32.mrf.mxu0 }
 0x477   :  { %v2978_v58 = vpack.i.bf16 %v681_v55, %v660_v57  ;;  %v3007_v55 = vld [vmem:[#allocation8] ss:$0 sm:$0xff] }
 0x479   :  { %2979 = vrot.lane.b32.xlu2 %v2978_v58, %s3554_s23 }
 0x47e   :  { %v662_v59 = vpop.f32.mrf.mxu0 }
 0x4d3   :  { %v2980_v61 = vpop.permute.xlu2 %2979 }
 0x4d4   :  { %v2982_v62 = vunpack.i.h.bf16 %v2980_v61  ;;  %v2981_v63 = vunpack.i.l.bf16 %v2980_v61 }
 0x4d6   :  { %v694_v0 = vsel %vm455_vm1, %v563_v52, %v2982_v62  ;;  %v693_v1 = vsel %vm455_vm1, %v539_v50, %v2981_v63  ;;  %v3006_v50 = vld [vmem:[#allocation7] ss:$0 sm:$0xff]  ;;  %v3008_v62 = vld [vmem:[%s4310_s26] ss:$0 sm:$0xff] }
 0x4d7   :  { %v695_v2 = vpack.c.bf16 %v694_v0, %v693_v1 }
 0x4d9   :  { %2744 = vmatmul.msk.bf16.vlgmr.msra.gmra.mxu2 %vm402_vm0, %v695_v2  ;;  %v3009_v2 = vld [vmem:[%s4311_s28] ss:$0 sm:$0xff] }
 0x55c   :  { %v717_v4 = vpop.f32.mrf.mxu2 }
 0x55d   :  { %v718_v5 = vadd.f32 %v3005_v3, %v717_v4 }
 0x55f   :  { %v722_v6 = vadd.f32 %v718_v5, %v3851_v14  ;;  %v3919_v14 = vsel %vm735_vm3, %v3054_v13, %v734_v19 }
 0x561   :  { %v724_v7 = vsel %vm402_vm0, %v722_v6, 0.0 }
 0x562   :  { %725 = vadd.xlane.f32.xlu0 %v724_v7 }
 0x564   :  { %v719_v8 = vpop.f32.mrf.mxu2 }
 0x565   :  { %v720_v9 = vadd.f32 %v3005_v3, %v719_v8 }
 0x567   :  { %v723_v10 = vadd.f32 %v720_v9, %v3853_v15 }
 0x569   :  { %v727_v11 = vsel %vm402_vm0, %v723_v10, 0.0 }
 0x56a   :  { %728 = vadd.xlane.f32.xlu2 %v727_v11 }
 0x5d5   :  { %v726_v20 = vpop.xlane.xlu0 %725 }
 0x5d6   :  { %v737_v21 = vmul.f32 %v3919_v14, %v726_v20 }
 0x5d8   :  { %v739_v23 = vsub.f32 %v722_v6, %v737_v21 }
 0x5da   :  { %v741_v15 = vmul.f32 %v739_v23, %v739_v23 }
 0x5dc   :  { %v743_v24 = vsel %vm402_vm0, %v741_v15, 0.0 }
 0x5dd   :  { %v729_v25 = vpop.xlane.xlu2 %728  ;;  %744 = vadd.xlane.f32.xlu1 %v743_v24 }
 0x5de   :  { %v738_v26 = vmul.f32 %v3919_v14, %v729_v25 }
 0x5e0   :  { %v740_v27 = vsub.f32 %v723_v10, %v738_v26 }
 0x5e2   :  { %v742_v29 = vmul.f32 %v740_v27, %v740_v27 }
 0x5e4   :  { %v746_v30 = vsel %vm402_vm0, %v742_v29, 0.0 }
 0x5e5   :  { %747 = vadd.xlane.f32.xlu0 %v746_v30 }
 0x650   :  { %v745_v28 = vpop.xlane.xlu1 %744 }
 0x651   :  { %v749_v31 = vmul.f32 %v745_v28, %v3919_v14 }
 0x653   :  { %v751_v34 = vadd.f32 1e-05, %v749_v31 }
 0x655   :  { %3055 = vrsqrt.f32 %v751_v34  ;;  %vm759_vm5 = vweird.f32 %v751_v34 }
 0x658   :  { %v748_v35 = vpop.xlane.xlu0 %747 }
 0x659   :  { %v750_v36 = vmul.f32 %v748_v35, %v3919_v14 }
 0x65b   :  { %v3056_v37 = vpop.eup %3055  ;;  %v752_v38 = vadd.f32 1e-05, %v750_v36 }
 0x65c   :  { %v754_v39 = vmul.f32 %v3056_v37, %v751_v34  ;;  %vm760_vm4 = vweird.f32 %v3056_v37 }
 0x65d   :  { %3057 = vrsqrt.f32 %v752_v38  ;;  %vm761_vm6 = vmor %vm759_vm5, %vm760_vm4  ;;  %vm769_vm8 = vweird.f32 %v752_v38 }
 0x65e   :  { %v755_v40 = vmul.f32 %v3056_v37, %v754_v39 }
 0x660   :  { %v756_v41 = vmul.f32 0.5, %v755_v40 }
 0x662   :  { %v757_v42 = vsub.f32 1.5, %v756_v41 }
 0x663   :  { %v3058_v43 = vpop.eup %3057 }
 0x664   :  { %v758_v44 = vmul.f32 %v3056_v37, %v757_v42  ;;  %v764_v45 = vmul.f32 %v3058_v43, %v752_v38  ;;  %vm770_vm7 = vweird.f32 %v3058_v43 }
 0x665   :  { %vm771_vm9 = vmor %vm769_vm8, %vm770_vm7 }
 0x666   :  { %v765_v22 = vmul.f32 %v3058_v43, %v764_v45  ;;  %v762_v46 = vsel %vm761_vm6, %v3056_v37, %v758_v44 }
 0x667   :  { %v773_v51 = vmul.f32 %v762_v46, %v739_v23 }
 0x668   :  { %v766_v47 = vmul.f32 0.5, %v765_v22 }
 0x669   :  { %v778_v56 = vmul.f32 %v3006_v50, %v773_v51 }
 0x66a   :  { %v767_v49 = vsub.f32 1.5, %v766_v47 }
 0x66b   :  { %v3929_v59 = vadd.f32 %v3007_v55, %v778_v56 }
 0x66c   :  { %v768_v52 = vmul.f32 %v3058_v43, %v767_v49 }
 0x66e   :  { %v772_v54 = vsel %vm771_vm9, %v3058_v43, %v768_v52  ;;  %vm1627_vm9 = vcmask 261120  }
 0x66f   :  { %v774_v57 = vmul.f32 %v772_v54, %v740_v27 }
 0x671   :  { %v779_v58 = vmul.f32 %v3006_v50, %v774_v57 }
 0x673   :  { %v3931_v60 = vadd.f32 %v3007_v55, %v779_v58 }
 0x675   :  { %v796_v61 = vpack.c.bf16 %v3931_v60, %v3929_v59 }
 0x677   :  { %2749 = vmatmul.msk.bf16.vlgmr.msra.gmra.mxu3 %vm402_vm0, %v796_v61  ;;  %2754 = vmatmul.msk.bf16.vlgmr.msrb.gmra.mxu0 %vm402_vm0, %v796_v61 }
 0x6f4   :  { %v841_v63 = vpop.f32.mrf.mxu0 }
 0x6f5   :  { %v842_v0 = vadd.f32 %v3008_v62, %v841_v63 }
 0x6f7   :  { %v848_v1 = vpack.c.bf16 %v842_v0, %v842_v0 }
 0x6f9   :  { %v854_v3 = vsel %vm455_vm1, %v848_v1, 0  ;;  %v913_v4 = vunpack.c.l.b16 %v848_v1 }
 0x6fa   :  { %v818_v5 = vpop.f32.mrf.mxu3  ;;  %863 = vmatpush.bf16.xpose.msrb.mxu1 %v854_v3 }
 0x6fb   :  { %v3940_v6 = vpack.c.b16 %v913_v4, %v913_v4  ;;  %v819_v7 = vadd.f32 %v3009_v2, %v818_v5 }
 0x6fc   :  { %v843_v8 = vpop.f32.mrf.mxu0 }
 0x6fd   :  { %v846_v9 = vpack.c.bf16 %v819_v7, %v819_v7  ;;  %v844_v10 = vadd.f32 %v3008_v62, %v843_v8  ;;  %965 = vrot.lane.b32.xlu2 %v3940_v6, %s3551_s13 }
 0x6ff   :  { %v961_v11 = vunpack.c.l.b16 %v846_v9  ;;  %v849_v12 = vpack.c.bf16 %v844_v10, %v844_v10 }
 0x701   :  { %v962_v13 = vpack.c.b16 %v961_v11, %v961_v11  ;;  %v937_v16 = vunpack.c.l.b16 %v849_v12  ;;  %2755 = vmatmul.msk.bf16.vlgmr.msrb.gmra.mxu1 %vm455_vm1, %v846_v9  ;;  %v873_v17 = vsel %vm455_vm1, %v849_v12, 0 }
 0x702   :  { %v820_v18 = vpop.f32.mrf.mxu3  ;;  %882 = vmatpush.bf16.xpose.msrb.mxu2 %v873_v17 }
 0x703   :  { %v821_v19 = vadd.f32 %v3009_v2, %v820_v18  ;;  %963 = vrot.lane.b32.xlu1 %v962_v13, %s3551_s13  ;;  %v938_v20 = vpack.c.b16 %v937_v16, %v937_v16 }
 0x705   :  { %v847_v21 = vpack.c.bf16 %v821_v19, %v821_v19  ;;  %991 = vrot.lane.b32.xlu0 %v938_v20, %s3551_s13 }
 0x707   :  { %v987_v23 = vunpack.c.l.b16 %v847_v21 }
 0x709   :  { %2756 = vmatmul.msk.bf16.vlgmr.msrb.gmra.mxu2 %vm455_vm1, %v847_v21  ;;  %v988_v15 = vpack.c.b16 %v987_v23, %v987_v23 }
 0x70b   :  { %989 = vrot.lane.b32.xlu2 %v988_v15, %s3551_s13 }
 0x757   :  { %v966_v24 = vpop.permute.xlu2 %965 }
 0x758   :  { %v971_v25 = vsel %vm455_vm1, %v966_v24, 0 }
 0x759   :  { %980 = vmatpush.bf16.xpose.msra.mxu1 %v971_v25 }
 0x765   :  { %v990_v28 = vpop.permute.xlu2 %989 }
 0x775   :  { %v964_v26 = vpop.permute.xlu1 %963 }
 0x776   :  { %2759 = vmatmul.msk.bf16.vlgmr.msra.gmra.mxu1 %vm455_vm1, %v964_v26 }
 0x777   :  { %v992_v27 = vpop.permute.xlu0 %991 }
 0x778   :  { %v997_v29 = vsel %vm455_vm1, %v992_v27, 0 }
 0x779   :  { %1006 = vmatpush.bf16.xpose.msra.mxu2 %v997_v29 }
 0x77e   :  { %v865_v30 = vpop.f32.mrf.mxu1 }
 0x77f   :  { %v866_v31 = vadd.f32 %v865_v30, %v3878_v48 }
 0x780   :  { %2760 = vmatmul.msk.bf16.vlgmr.msra.gmra.mxu2 %vm455_vm1, %v990_v28 }
 0x781   :  { %v888_v32 = vsel %vm455_vm1, %v866_v31, -inf }
 0x782   :  { %889 = vmax.xlane.f32.xlu0 %v888_v32 }
 0x786   :  { %v867_v33 = vpop.f32.mrf.mxu1 }
 0x78c   :  { %v884_v34 = vpop.f32.mrf.mxu2 }
 0x78d   :  { %v885_v35 = vadd.f32 %v884_v34, %v3882_v53 }
 0x78f   :  { %v891_v36 = vsel %vm455_vm1, %v885_v35, -inf }
 0x790   :  { %892 = vmax.xlane.f32.xlu2 %v891_v36 }
 0x794   :  { %v886_v37 = vpop.f32.mrf.mxu2 }
 0x7f3   :  { %v982_v38 = vpop.f32.mrf.mxu1 }
 0x7f4   :  { %v983_v39 = vadd.f32 %v982_v38, %v3878_v48 }
 0x7f5   :  { %v890_v40 = vpop.xlane.xlu0 %889 }
 0x7f6   :  { %v894_v41 = vsub.f32 %v866_v31, %v890_v40  ;;  %v1012_v42 = vsel %vm455_vm1, %v983_v39, -inf  ;;  %v2901_v40 = vld [vmem:[%s4312_s29] sm:$0xff] }
 0x7f7   :  { %1013 = vmax.xlane.f32.xlu1 %v1012_v42  ;;  %1108 = vmatpush.bf16.msrb.mxu1 %v2901_v40 }
 0x7f8   :  { %v896_v43 = vmul.f32 1.442695, %v894_v41 }
 0x7fa   :  { %3059 = vpow2.f32 %v896_v43 }
 0x7fb   :  { %v984_v44 = vpop.f32.mrf.mxu1 }
 0x800   :  { %v3060_v45 = vpop.eup %3059 }
 0x801   :  { %v900_v22 = vsel %vm455_vm1, %v3060_v45, 0.0 }
 0x802   :  { %901 = vadd.xlane.f32.xlu2 %v900_v22 }
 0x803   :  { %v1008_v46 = vpop.f32.mrf.mxu2  ;;  %v893_v47 = vpop.xlane.xlu2 %892 }
 0x804   :  { %v1009_v49 = vadd.f32 %v1008_v46, %v3882_v53  ;;  %v895_v50 = vsub.f32 %v885_v35, %v893_v47  ;;  %v3010_v46 = vld [vmem:[#allocation10] ss:$0 sm:$0xff] }
 0x806   :  { %v898_v51 = vmul.f32 1.442695, %v895_v50  ;;  %v1015_v52 = vsel %vm455_vm1, %v1009_v49, -inf }
 0x807   :  { %1016 = vmax.xlane.f32.xlu0 %v1015_v52 }
 0x808   :  { %3061 = vpow2.f32 %v898_v51 }
 0x80b   :  { %v1010_v54 = vpop.f32.mrf.mxu2 }
 0x80e   :  { %v3062_v55 = vpop.eup %3061 }
 0x80f   :  { %v903_v56 = vsel %vm455_vm1, %v3062_v55, 0.0 }
 0x810   :  { %915 = vrot.lane.b32.xlu1 %v3940_v6, %s3552_s3  ;;  %904 = vadd.xlane.f32.xlu0 %v903_v56 }
 0x818   :  { %1057 = vrot.lane.b32.xlu1 %v938_v20, %s3553_s16 }
 0x81a   :  { %939 = vrot.lane.b32.xlu2 %v938_v20, %s3552_s3 }
 0x86a   :  { %v1014_v57 = vpop.xlane.xlu1 %1013 }
 0x86b   :  { %v1018_v58 = vsub.f32 %v983_v39, %v1014_v57 }
 0x86d   :  { %v1020_v61 = vmul.f32 1.442695, %v1018_v58 }
 0x86f   :  { %3063 = vpow2.f32 %v1020_v61 }
 0x875   :  { %v3064_v62 = vpop.eup %3063  ;;  %v902_v63 = vpop.xlane.xlu2 %901 }
 0x876   :  { %v1024_v0 = vsel %vm455_vm1, %v3064_v62, 0.0  ;;  %3065 = vrcp.f32 %v902_v63 }
 0x877   :  { %1025 = vadd.xlane.f32.xlu0 %v1024_v0 }
 0x87a   :  { %v1017_v1 = vpop.xlane.xlu0 %1016 }
 0x87b   :  { %v1019_v2 = vsub.f32 %v1009_v49, %v1017_v1 }
 0x87c   :  { %v3066_v5 = vpop.eup %3065 }
 0x87d   :  { %v1022_v3 = vmul.f32 1.442695, %v1019_v2  ;;  %v940_v4 = vpop.permute.xlu2 %939  ;;  %v908_v8 = vmul.f32 %v3066_v5, %v3060_v45  ;;  %v361_v5 = vld [vmem:[%s4314_s1 + $0x8] sm:$0xff] }
 0x87e   :  { %v945_v7 = vsel %vm526_vm2, %v940_v4, 0  ;;  %v360_v4 = vld [vmem:[%s4314_s1] sm:$0xff] }
 0x87f   :  { %3067 = vpow2.f32 %v1022_v3  ;;  %954 = vmatpush.bf16.msra.mxu0 %v945_v7  ;;  %v910_v13 = vpack.c.bf16 %v908_v8, %v908_v8  ;;  %v2903_v3 = vld [vmem:[%s4313_s19] sm:$0xff]  ;;  %v3996_v7 = vpack.c.bf16 %v361_v5, %v360_v4  ;;  %v362_v8 = vld [vmem:[%s4314_s1 + $0x10] sm:$0xff] }
 0x882   :  { %v916_v9 = vpop.permute.xlu1 %915 }
 0x883   :  { %v921_v10 = vsel %vm526_vm2, %v916_v9, 0  ;;  %v905_v11 = vpop.xlane.xlu0 %904  ;;  %v363_v9 = vld [vmem:[%s4314_s1 + $0x18] sm:$0xff] }
 0x884   :  { %3069 = vrcp.f32 %v905_v11  ;;  %930 = vmatpush.bf16.msrb.mxu3 %v921_v10  ;;  %v4002_v10 = vpack.c.bf16 %v363_v9, %v362_v8 }
 0x885   :  { %v3068_v12 = vpop.eup %3067 }
 0x886   :  { %v1027_v16 = vsel %vm455_vm1, %v3068_v12, 0.0 }
 0x887   :  { %2757 = vmatmul.msk.bf16.vlgmr.msrb.gmra.mxu3 %vm455_vm1, %v910_v13  ;;  %1028 = vadd.xlane.f32.xlu0 %v1027_v16  ;;  %v2902_v13 = vld [vmem:[%s4315_s12] sm:$0xff] }
 0x888   :  { %1202 = vmatpush.bf16.msrb.mxu2 %v2902_v13  ;;  %v349_v13 = vld [vmem:[%s4318_s6] sm:$0x3] }
 0x88a   :  { %v3070_v17 = vpop.eup %3069  ;;  %v1058_v18 = vpop.permute.xlu1 %1057 }
 0x88b   :  { %v909_v19 = vmul.f32 %v3070_v17, %v3062_v55  ;;  %v1063_v20 = vsel %vm526_vm2, %v1058_v18, 0 }
 0x88c   :  { %1072 = vmatpush.bf16.msrb.mxu0 %v1063_v20 }
 0x88d   :  { %v911_v21 = vpack.c.bf16 %v909_v19, %v909_v19 }
 0x88f   :  { %2758 = vmatmul.msk.bf16.vlgmr.msra.gmra.mxu0 %vm455_vm1, %v911_v21 }
 0x89b   :  { %1036 = vrot.lane.b32.xlu0 %v3940_v6, %s3553_s16 }
 0x8ea   :  { %v1026_v23 = vpop.xlane.xlu0 %1025 }
 0x8fa   :  { %v1029_v15 = vpop.xlane.xlu0 %1028 }
 0x8fb   :  { %3071 = vrcp.f32 %v1029_v15 }
 0x8fc   :  { %3073 = vrcp.f32 %v1026_v23 }
 0x901   :  { %v3072_v24 = vpop.eup %3071 }
 0x902   :  { %v1033_v25 = vmul.f32 %v3072_v24, %v3068_v12  ;;  %v3074_v27 = vpop.eup %3073 }
 0x903   :  { %v1032_v30 = vmul.f32 %v3074_v27, %v3064_v62 }
 0x904   :  { %v1035_v26 = vpack.c.bf16 %v1033_v25, %v1033_v25 }
 0x905   :  { %v1034_v33 = vpack.c.bf16 %v1032_v30, %v1032_v30 }
 0x906   :  { %2762 = vmatmul.msk.bf16.vlgmr.msrb.gmra.mxu0 %vm455_vm1, %v1035_v26 }
 0x90a   :  { %v932_v29 = vpop.f32.mrf.mxu3 }
 0x90c   :  { %v956_v28 = vpop.f32.mrf.mxu0 }
 0x90d   :  { %v1037_v31 = vpop.permute.xlu0 %1036 }
 0x90e   :  { %v1042_v32 = vsel %vm526_vm2, %v1037_v31, 0 }
 0x90f   :  { %1051 = vmatpush.bf16.msra.mxu3 %v1042_v32  ;;  %v3011_v32 = vld [vmem:[#allocation11] ss:$0 sm:$0xff] }
 0x912   :  { %v934_v6 = vpop.f32.mrf.mxu3  ;;  %2761 = vmatmul.msk.bf16.vlgmr.msra.gmra.mxu3 %vm455_vm1, %v1034_v33 }
 0x913   :  { %1233 = vmatpush.bf16.msrb.mxu3 %v2903_v3 }
 0x914   :  { %v958_v34 = vpop.f32.mrf.mxu0 }
 0x922   :  { %2777 = vmatmul.msk.bf16.vlgmr.msrb.gmra.mxu3 %vm402_vm0, %v3996_v7 }
 0x932   :  { %2778 = vmatmul.msk.bf16.gmra.mxu3 %vm402_vm0, %v4002_v10 }
 0x983   :  { %v1074_v35 = vpop.f32.mrf.mxu0 }
 0x98b   :  { %v1076_v36 = vpop.f32.mrf.mxu0 }
 0x995   :  { %v1053_v37 = vpop.f32.mrf.mxu3 }
 0x996   :  { %v2983_v38 = vpack.i.bf16 %v1074_v35, %v1053_v37  ;;  %v3012_v35 = vld [vmem:[#allocation13] ss:$0 sm:$0xff] }
 0x998   :  { %2984 = vrot.lane.b32.xlu2 %v2983_v38, %s3554_s23 }
 0x99d   :  { %v1055_v39 = vpop.f32.mrf.mxu3 }
 0x9f2   :  { %v2985_v41 = vpop.permute.xlu2 %2984 }
 0x9f3   :  { %v2987_v42 = vunpack.i.h.bf16 %v2985_v41  ;;  %v2986_v43 = vunpack.i.l.bf16 %v2985_v41 }
 0x9f5   :  { %v1087_v44 = vsel %vm455_vm1, %v956_v28, %v2987_v42  ;;  %v1086_v45 = vsel %vm455_vm1, %v932_v29, %v2986_v43  ;;  %v3013_v42 = vld [vmem:[%s4316_s2] ss:$0 sm:$0xff]  ;;  %v1235_v43 = vpop.f32.mrf.mxu3 }
 0x9f6   :  { %v1088_v22 = vpack.c.bf16 %v1087_v44, %v1086_v45  ;;  %v1236_v44 = vadd.f32 %v3013_v42, %v1235_v43 }
 0x9f8   :  { %2767 = vmatmul.msk.bf16.vlgmr.msrb.gmra.mxu1 %vm402_vm0, %v1088_v22  ;;  %v1247_v45 = vpack.c.bf16 %v1236_v44, %v1236_v44 }
 0x9fd   :  { %v1237_v22 = vpop.f32.mrf.mxu3 }
 0xa75   :  { %v1110_v47 = vpop.f32.mrf.mxu1 }
 0xa76   :  { %v1111_v49 = vadd.f32 %v3010_v46, %v1110_v47  ;;  %v1257_v47 = vunpack.c.l.b16 %v1247_v45 }
 0xa78   :  { %v1115_v50 = vadd.f32 %v1111_v49, %v3929_v59 }
 0xa7a   :  { %v1117_v51 = vsel %vm402_vm0, %v1115_v50, 0.0 }
 0xa7b   :  { %1118 = vadd.xlane.f32.xlu1 %v1117_v51 }
 0xa7d   :  { %v1112_v52 = vpop.f32.mrf.mxu1 }
 0xa7e   :  { %v1113_v54 = vadd.f32 %v3010_v46, %v1112_v52  ;;  %v1238_v46 = vadd.f32 %v3013_v42, %v1237_v22  ;;  %v1240_v52 = vpop.f32.mrf.mxu3 }
 0xa80   :  { %v1116_v55 = vadd.f32 %v1113_v54, %v3931_v60  ;;  %v1248_v49 = vpack.c.bf16 %v1238_v46, %v1238_v46 }
 0xa82   :  { %v1120_v56 = vsel %vm402_vm0, %v1116_v55, 0.0 }
 0xa83   :  { %1121 = vadd.xlane.f32.xlu2 %v1120_v56 }
 0xaee   :  { %v1119_v57 = vpop.xlane.xlu1 %1118 }
 0xaef   :  { %v1123_v58 = vmul.f32 %v1119_v57, %v3919_v14  ;;  %v1242_v57 = vpop.f32.mrf.mxu3 }
 0xaf1   :  { %v1125_v61 = vsub.f32 %v1115_v50, %v1123_v58  ;;  %v1258_v50 = vunpack.c.l.b16 %v1248_v49  ;;  %v1243_v58 = vadd.f32 %v3013_v42, %v1242_v57 }
 0xaf3   :  { %v1127_v62 = vmul.f32 %v1125_v61, %v1125_v61  ;;  %v4017_v51 = vpack.c.b16 %v1258_v50, %v1257_v47 }
 0xaf5   :  { %v1129_v59 = vsel %vm402_vm0, %v1127_v62, 0.0  ;;  %v1264_v54 = vsel %vm455_vm1, %v4017_v51, 0  ;;  %v1250_v62 = vpack.c.bf16 %v1243_v58, %v1243_v58 }
 0xaf6   :  { %v1122_v63 = vpop.xlane.xlu2 %1121  ;;  %1130 = vadd.xlane.f32.xlu0 %v1129_v59  ;;  %1273 = vmatpush.bf16.xpose.msra.mxu0 %v1264_v54 }
 0xaf7   :  { %v1124_v0 = vmul.f32 %v1122_v63, %v3919_v14  ;;  %v1282_v59 = vunpack.c.l.b16 %v1250_v62 }
 0xaf9   :  { %v1126_v1 = vsub.f32 %v1116_v55, %v1124_v0  ;;  %v1241_v55 = vadd.f32 %v3013_v42, %v1240_v52 }
 0xafb   :  { %v1128_v60 = vmul.f32 %v1126_v1, %v1126_v1  ;;  %v1249_v56 = vpack.c.bf16 %v1241_v55, %v1241_v55 }
 0xafd   :  { %v1132_v2 = vsel %vm402_vm0, %v1128_v60, 0.0 }
 0xafe   :  { %1133 = vadd.xlane.f32.xlu1 %v1132_v2 }
 0xb0a   :  { %1327 = vrot.lane.b32.xlu0 %v4017_v51, %s3552_s3 }
 0xb69   :  { %v1131_v11 = vpop.xlane.xlu0 %1130 }
 0xb6a   :  { %v1135_v12 = vmul.f32 %v1131_v11, %v3919_v14 }
 0xb6c   :  { %v1137_v16 = vadd.f32 1e-05, %v1135_v12 }
 0xb6e   :  { %3075 = vrsqrt.f32 %v1137_v16  ;;  %vm1145_vm11 = vweird.f32 %v1137_v16 }
 0xb71   :  { %v1134_v17 = vpop.xlane.xlu1 %1133 }
 0xb72   :  { %v1136_v18 = vmul.f32 %v1134_v17, %v3919_v14 }
 0xb74   :  { %v3076_v19 = vpop.eup %3075  ;;  %v1138_v20 = vadd.f32 1e-05, %v1136_v18 }
 0xb75   :  { %v1140_v21 = vmul.f32 %v3076_v19, %v1137_v16  ;;  %vm1146_vm10 = vweird.f32 %v3076_v19  ;;  %v2721_v16 = vadd.f32 -1.0, %v349_v13 }
 0xb76   :  { %3077 = vrsqrt.f32 %v1138_v20  ;;  %vm1147_vm12 = vmor %vm1145_vm11, %vm1146_vm10  ;;  %vm1155_vm14 = vweird.f32 %v1138_v20 }
 0xb77   :  { %v1141_v23 = vmul.f32 %v3076_v19, %v1140_v21  ;;  %v355_v17 = vmul.f32 1e+09, %v2721_v16 }
 0xb79   :  { %v1142_v15 = vmul.f32 0.5, %v1141_v23  ;;  %v4032_v18 = vperm.slane %v355_v17, 0  ;;  %v357_v21 = vrot.slane %v355_v17, 1 }
 0xb7b   :  { %v1143_v24 = vsub.f32 1.5, %v1142_v15  ;;  %v4036_v15 = vperm.slane %v357_v21, 0 }
 0xb7c   :  { %v3078_v25 = vpop.eup %3077  ;;  %v1328_v12 = vpop.permute.xlu0 %1327 }
 0xb7d   :  { %v1144_v26 = vmul.f32 %v3076_v19, %v1143_v24  ;;  %v1150_v27 = vmul.f32 %v3078_v25, %v1138_v20  ;;  %vm1156_vm13 = vweird.f32 %v3078_v25  ;;  %1340 = vmatpush.bf16.msra.mxu2 %v1328_v12 }
 0xb7e   :  { %vm1157_vm15 = vmor %vm1155_vm14, %vm1156_vm13 }
 0xb7f   :  { %v1151_v29 = vmul.f32 %v3078_v25, %v1150_v27  ;;  %v1148_v30 = vsel %vm1147_vm12, %v3076_v19, %v1144_v26 }
 0xb80   :  { %v1159_v33 = vmul.f32 %v1148_v30, %v1125_v61  ;;  %v1281_v61 = vunpack.c.l.b16 %v1249_v56 }
 0xb81   :  { %v1152_v28 = vmul.f32 0.5, %v1151_v29 }
 0xb82   :  { %v1164_v36 = vmul.f32 %v3011_v32, %v1159_v33  ;;  %v4023_v63 = vpack.c.b16 %v1282_v59, %v1281_v61 }
 0xb83   :  { %v1153_v31 = vsub.f32 1.5, %v1152_v28 }
 0xb84   :  { %v4009_v39 = vadd.f32 %v3012_v35, %v1164_v36  ;;  %v1288_v0 = vsel %vm455_vm1, %v4023_v63, 0 }
 0xb85   :  { %v1154_v6 = vmul.f32 %v3078_v25, %v1153_v31  ;;  %1297 = vmatpush.bf16.xpose.msra.mxu1 %v1288_v0 }
 0xb87   :  { %v1158_v34 = vsel %vm1157_vm15, %v3078_v25, %v1154_v6 }
 0xb88   :  { %v1160_v37 = vmul.f32 %v1158_v34, %v1126_v1  ;;  %v3014_v1 = vld [vmem:[%s4317_s7] ss:$0 sm:$0xff] }
 0xb8a   :  { %v1165_v38 = vmul.f32 %v3011_v32, %v1160_v37 }
 0xb8c   :  { %v4011_v40 = vadd.f32 %v3012_v35, %v1165_v38 }
 0xb8e   :  { %v1182_v41 = vpack.c.bf16 %v4011_v40, %v4009_v39 }
 0xb90   :  { %2772 = vmatmul.msk.bf16.vlgmr.msrb.gmra.mxu2 %vm402_vm0, %v1182_v41 }
 0xc13   :  { %v1204_v60 = vpop.f32.mrf.mxu2 }
 0xc14   :  { %v1205_v2 = vadd.f32 %v3014_v1, %v1204_v60 }
 0xc16   :  { %v1245_v3 = vpack.c.bf16 %v1205_v2, %v1205_v2 }
 0xc18   :  { %v1366_v4 = vunpack.c.l.b16 %v1245_v3  ;;  %2779 = vmatmul.msk.bf16.vlgmr.msra.gmra.mxu0 %vm455_vm1, %v1245_v3 }
 0xc1a   :  { %v1367_v5 = vpack.c.b16 %v1366_v4, %v1366_v4 }
 0xc1b   :  { %v1206_v8 = vpop.f32.mrf.mxu2 }
 0xc1c   :  { %v1207_v9 = vadd.f32 %v3014_v1, %v1206_v8  ;;  %1368 = vrot.lane.b32.xlu0 %v1367_v5, %s3551_s13 }
 0xc1e   :  { %v1246_v11 = vpack.c.bf16 %v1207_v9, %v1207_v9 }
 0xc20   :  { %2780 = vmatmul.msk.bf16.vlgmr.msra.gmra.mxu1 %vm455_vm1, %v1246_v11  ;;  %v1392_v30 = vunpack.c.l.b16 %v1246_v11 }
 0xc22   :  { %v1393_v28 = vpack.c.b16 %v1392_v30, %v1392_v30 }
 0xc8e   :  { %v1369_v31 = vpop.permute.xlu0 %1368 }
 0xc95   :  { %v1275_v19 = vpop.f32.mrf.mxu0 }
 0xc96   :  { %v1276_v20 = vadd.f32 %v1275_v19, %v4032_v18 }
 0xc98   :  { %v1303_v23 = vsel %vm402_vm0, %v1276_v20, -inf }
 0xc99   :  { %1304 = vmax.xlane.f32.xlu2 %v1303_v23 }
 0xc9d   :  { %v1277_v24 = vpop.f32.mrf.mxu0  ;;  %v1299_v25 = vpop.f32.mrf.mxu1 }
 0xc9e   :  { %v1300_v26 = vadd.f32 %v1299_v25, %v4036_v15 }
 0xca0   :  { %v1306_v27 = vsel %vm402_vm0, %v1300_v26, -inf }
 0xca1   :  { %1307 = vmax.xlane.f32.xlu0 %v1306_v27 }
 0xca5   :  { %v1301_v29 = vpop.f32.mrf.mxu1 }
 0xcb1   :  { %1370 = vrot.lane.b32.xlu2 %v4017_v51, %s3551_s13 }
 0xcb9   :  { %1394 = vrot.lane.b32.xlu2 %v1393_v28, %s3551_s13 }
 0xd0c   :  { %v1305_v32 = vpop.xlane.xlu2 %1304 }
 0xd0d   :  { %v1309_v33 = vsub.f32 %v1276_v20, %v1305_v32 }
 0xd0f   :  { %v1311_v6 = vmul.f32 1.442695, %v1309_v33 }
 0xd11   :  { %3079 = vpow2.f32 %v1311_v6 }
 0xd14   :  { %v1308_v34 = vpop.xlane.xlu0 %1307  ;;  %v1371_v35 = vpop.permute.xlu2 %1370 }
 0xd15   :  { %v1310_v36 = vsub.f32 %v1300_v26, %v1308_v34  ;;  %v1376_v37 = vsel %vm455_vm1, %v1371_v35, 0 }
 0xd16   :  { %1385 = vmatpush.bf16.xpose.msrb.mxu1 %v1376_v37  ;;  %v2904_v37 = vld [vmem:[%s4319_s11] sm:$0xff] }
 0xd17   :  { %v3080_v38 = vpop.eup %3079  ;;  %v1313_v41 = vmul.f32 1.442695, %v1310_v36 }
 0xd18   :  { %v1315_v42 = vsel %vm402_vm0, %v3080_v38, 0.0 }
 0xd19   :  { %3081 = vpow2.f32 %v1313_v41  ;;  %1316 = vadd.xlane.f32.xlu1 %v1315_v42 }
 0xd1c   :  { %v1395_v57 = vpop.permute.xlu2 %1394 }
 0xd1d   :  { %2783 = vmatmul.msk.bf16.vlgmr.msrb.gmra.mxu1 %vm455_vm1, %v1369_v31 }
 0xd1e   :  { %1509 = vmatpush.bf16.msra.mxu1 %v2904_v37  ;;  %v2906_v37 = vld [vmem:[%s4323_s0] sm:$0xff] }
 0xd1f   :  { %v3082_v43 = vpop.eup %3081 }
 0xd20   :  { %v1318_v44 = vsel %vm402_vm0, %v3082_v43, 0.0 }
 0xd21   :  { %1319 = vadd.xlane.f32.xlu0 %v1318_v44 }
 0xd32   :  { %1396 = vrot.lane.b32.xlu1 %v4023_v63, %s3551_s13 }
 0xd8c   :  { %v1317_v45 = vpop.xlane.xlu1 %1316 }
 0xd8d   :  { %3083 = vrcp.f32 %v1317_v45 }
 0xd93   :  { %v3084_v22 = vpop.eup %3083 }
 0xd94   :  { %v1323_v46 = vmul.f32 %v3084_v22, %v3080_v38  ;;  %v1320_v9 = vpop.xlane.xlu0 %1319  ;;  %v3015_v22 = vld [vmem:[%s4320_s10] ss:$0 sm:$0xff] }
 0xd96   :  { %v1325_v47 = vpack.c.bf16 %v1323_v46, %v1323_v46 }
 0xd98   :  { %2781 = vmatmul.msk.bf16.vlgmr.msra.gmra.mxu2 %vm402_vm0, %v1325_v47 }
 0xd9a   :  { %v1387_v49 = vpop.f32.mrf.mxu1 }
 0xd9b   :  { %v1388_v50 = vadd.f32 %v1387_v49, %v4032_v18 }
 0xd9d   :  { %v1417_v52 = vsel %vm402_vm0, %v1388_v50, -inf }
 0xd9e   :  { %1418 = vmax.xlane.f32.xlu1 %v1417_v52 }
 0xda2   :  { %v1389_v54 = vpop.f32.mrf.mxu1 }
 0xda4   :  { %v1397_v55 = vpop.permute.xlu1 %1396 }
 0xda5   :  { %v1402_v56 = vsel %vm455_vm1, %v1397_v55, 0 }
 0xda6   :  { %1411 = vmatpush.bf16.xpose.msrb.mxu2 %v1402_v56 }
 0xdad   :  { %2784 = vmatmul.msk.bf16.vlgmr.msrb.gmra.mxu2 %vm455_vm1, %v1395_v57 }
 0xe11   :  { %v1419_v58 = vpop.xlane.xlu1 %1418 }
 0xe12   :  { %v1423_v61 = vsub.f32 %v1388_v50, %v1419_v58 }
 0xe14   :  { %v1425_v62 = vmul.f32 1.442695, %v1423_v61 }
 0xe16   :  { %3085 = vpow2.f32 %v1425_v62 }
 0xe1b   :  { %v1342_v59 = vpop.f32.mrf.mxu2 }
 0xe1c   :  { %v3086_v0 = vpop.eup %3085 }
 0xe1d   :  { %v1429_v1 = vsel %vm402_vm0, %v3086_v0, 0.0 }
 0xe1e   :  { %1430 = vadd.xlane.f32.xlu1 %v1429_v1 }
 0xe23   :  { %v1344_v60 = vpop.f32.mrf.mxu2 }
 0xe30   :  { %v1413_v2 = vpop.f32.mrf.mxu2 }
 0xe31   :  { %v1414_v3 = vadd.f32 %v1413_v2, %v4036_v15 }
 0xe33   :  { %v1420_v4 = vsel %vm402_vm0, %v1414_v3, -inf }
 0xe34   :  { %1421 = vmax.xlane.f32.xlu2 %v1420_v4  ;;  %v2905_v4 = vld [vmem:[%s4321_s8] sm:$0xff] }
 0xe35   :  { %1602 = vmatpush.bf16.msra.mxu2 %v2905_v4 }
 0xe37   :  { %1441 = vrot.lane.b32.xlu1 %v4017_v51, %s3553_s16 }
 0xe38   :  { %v1415_v5 = vpop.f32.mrf.mxu2 }
 0xe4c   :  { %1346 = vrot.lane.b32.xlu2 %v4023_v63, %s3552_s3 }
 0xe91   :  { %v1431_v8 = vpop.xlane.xlu1 %1430 }
 0xe92   :  { %3087 = vrcp.f32 %v1431_v8 }
 0xe93   :  { %3089 = vrcp.f32 %v1320_v9 }
 0xe98   :  { %v3088_v11 = vpop.eup %3087 }
 0xe99   :  { %v1437_v12 = vmul.f32 %v3088_v11, %v3086_v0  ;;  %v3090_v19 = vpop.eup %3089 }
 0xe9a   :  { %v1324_v23 = vmul.f32 %v3090_v19, %v3082_v43 }
 0xe9b   :  { %v1439_v21 = vpack.c.bf16 %v1437_v12, %v1437_v12 }
 0xe9c   :  { %v1326_v24 = vpack.c.bf16 %v1324_v23, %v1324_v23 }
 0xea7   :  { %v1422_v13 = vpop.xlane.xlu2 %1421 }
 0xea8   :  { %v1424_v16 = vsub.f32 %v1414_v3, %v1422_v13 }
 0xea9   :  { %v1442_v17 = vpop.permute.xlu1 %1441 }
 0xeaa   :  { %v1427_v20 = vmul.f32 1.442695, %v1424_v16  ;;  %1454 = vmatpush.bf16.msra.mxu3 %v1442_v17 }
 0xeac   :  { %3091 = vpow2.f32 %v1427_v20 }
 0xead   :  { %2785 = vmatmul.msk.bf16.vlgmr.msra.gmra.mxu3 %vm402_vm0, %v1439_v21 }
 0xeaf   :  { %v1347_v51 = vpop.permute.xlu2 %1346 }
 0xeb0   :  { %1359 = vmatpush.bf16.msrb.mxu0 %v1347_v51 }
 0xeb2   :  { %v3092_v25 = vpop.eup %3091 }
 0xeb3   :  { %2782 = vmatmul.msk.bf16.vlgmr.msrb.gmra.mxu0 %vm402_vm0, %v1326_v24  ;;  %v1432_v26 = vsel %vm402_vm0, %v3092_v25, 0.0 }
 0xeb4   :  { %1433 = vadd.xlane.f32.xlu0 %v1432_v26 }
 0xec8   :  { %1460 = vrot.lane.b32.xlu0 %v4023_v63, %s3553_s16 }
 0xf27   :  { %v1434_v27 = vpop.xlane.xlu0 %1433 }
 0xf28   :  { %3093 = vrcp.f32 %v1434_v27  ;;  %v3016_v27 = vld [vmem:[%s4322_s27] ss:$0 sm:$0xff] }
 0xf2e   :  { %v3094_v28 = vpop.eup %3093 }
 0xf2f   :  { %v1438_v31 = vmul.f32 %v3094_v28, %v3092_v25 }
 0xf30   :  { %v1361_v29 = vpop.f32.mrf.mxu0  ;;  %v1456_v30 = vpop.f32.mrf.mxu3 }
 0xf31   :  { %v1440_v34 = vpack.c.bf16 %v1438_v31, %v1438_v31  ;;  %v3017_v31 = vld [vmem:[#allocation14] ss:$0 sm:$0xff] }
 0xf38   :  { %v1363_v32 = vpop.f32.mrf.mxu0  ;;  %v1458_v33 = vpop.f32.mrf.mxu3 }
 0xf3a   :  { %v1461_v6 = vpop.permute.xlu0 %1460 }
 0xf3b   :  { %1473 = vmatpush.bf16.msra.mxu0 %v1461_v6 }
 0xf3e   :  { %2786 = vmatmul.msk.bf16.vlgmr.msra.gmra.mxu0 %vm402_vm0, %v1440_v34 }
 0xfbb   :  { %v1475_v35 = vpop.f32.mrf.mxu0 }
 0xfbc   :  { %v2988_v36 = vpack.i.bf16 %v1475_v35, %v1456_v30 }
 0xfbe   :  { %2989 = vrot.lane.b32.xlu2 %v2988_v36, %s3554_s23 }
 0xfc3   :  { %v1477_v63 = vpop.f32.mrf.mxu0 }
 0xfc4   :  { %v2907_v63 = vld [vmem:[%s4323_s0 + $0x8] sm:$0xff] }
 0xfc5   :  { %1637 = vmatpush.bf16.msrb.mxu3 %v2907_v63 }
 0xfc9   :  { %1638 = vmatpush.bf16.msrb.mxu3 %v2906_v37 }
0x1018   :  { %v2990_v38 = vpop.permute.xlu2 %2989 }
0x1019   :  { %v2992_v41 = vunpack.i.h.bf16 %v2990_v38  ;;  %v2991_v42 = vunpack.i.l.bf16 %v2990_v38 }
0x101b   :  { %v1488_v43 = vsel %vm455_vm1, %v1361_v29, %v2992_v41  ;;  %v1487_v44 = vsel %vm455_vm1, %v1342_v59, %v2991_v42  ;;  %v3018_v41 = vld [vmem:[#allocation16] ss:$0 sm:$0xff] }
0x101c   :  { %v1489_v45 = vpack.c.bf16 %v1488_v43, %v1487_v44 }
0x101e   :  { %2791 = vmatmul.msk.bf16.vlgmr.msra.gmra.mxu1 %vm402_vm0, %v1489_v45 }
0x109b   :  { %v1511_v46 = vpop.f32.mrf.mxu1 }
0x109c   :  { %v1512_v47 = vadd.f32 %v3015_v22, %v1511_v46 }
0x109e   :  { %v1516_v49 = vadd.f32 %v1512_v47, %v4009_v39  ;;  %v3019_v47 = vld [vmem:[#allocation17] ss:$0 sm:$0xff] }
0x10a0   :  { %v1518_v50 = vsel %vm402_vm0, %v1516_v49, 0.0 }
0x10a1   :  { %1519 = vadd.xlane.f32.xlu2 %v1518_v50 }
0x10a3   :  { %v1513_v52 = vpop.f32.mrf.mxu1 }
0x10a4   :  { %v1514_v54 = vadd.f32 %v3015_v22, %v1513_v52 }
0x10a6   :  { %v1517_v55 = vadd.f32 %v1514_v54, %v4011_v40 }
0x10a8   :  { %v1521_v56 = vsel %vm402_vm0, %v1517_v55, 0.0 }
0x10a9   :  { %1522 = vadd.xlane.f32.xlu0 %v1521_v56 }
0x1114   :  { %v1520_v57 = vpop.xlane.xlu2 %1519 }
0x1115   :  { %v1524_v58 = vmul.f32 %v1520_v57, %v3919_v14 }
0x1117   :  { %v1526_v61 = vsub.f32 %v1516_v49, %v1524_v58 }
0x1119   :  { %v1528_v62 = vmul.f32 %v1526_v61, %v1526_v61 }
0x111b   :  { %v1530_v59 = vsel %vm402_vm0, %v1528_v62, 0.0 }
0x111c   :  { %v1523_v0 = vpop.xlane.xlu0 %1522  ;;  %1531 = vadd.xlane.f32.xlu1 %v1530_v59 }
0x111d   :  { %v1525_v39 = vmul.f32 %v1523_v0, %v3919_v14 }
0x111f   :  { %v1527_v1 = vsub.f32 %v1517_v55, %v1525_v39 }
0x1121   :  { %v1529_v60 = vmul.f32 %v1527_v1, %v1527_v1 }
0x1123   :  { %v1533_v2 = vsel %vm402_vm0, %v1529_v60, 0.0 }
0x1124   :  { %1534 = vadd.xlane.f32.xlu2 %v1533_v2 }
0x118f   :  { %v1532_v40 = vpop.xlane.xlu1 %1531 }
0x1190   :  { %v1536_v3 = vmul.f32 %v1532_v40, %v3919_v14 }
0x1192   :  { %v1538_v5 = vadd.f32 1e-05, %v1536_v3 }
0x1194   :  { %3095 = vrsqrt.f32 %v1538_v5  ;;  %vm1546_vm4 = vweird.f32 %v1538_v5 }
0x1197   :  { %v1535_v8 = vpop.xlane.xlu2 %1534 }
0x1198   :  { %v1537_v9 = vmul.f32 %v1535_v8, %v3919_v14  ;;  %v2908_v8 = vld [vmem:[%s4308_s17 + $0x8] sm:$0xff] }
0x1199   :  { %1740 = vmatpush.bf16.msrb.mxu0 %v2908_v8 }
0x119a   :  { %v3096_v11 = vpop.eup %3095  ;;  %v1539_v12 = vadd.f32 1e-05, %v1537_v9  ;;  %v2909_v9 = vld [vmem:[%s4309_s21 + $0x8] sm:$0xff] }
0x119b   :  { %v1541_v13 = vmul.f32 %v3096_v11, %v1538_v5  ;;  %vm1547_vm3 = vweird.f32 %v3096_v11  ;;  %1763 = vmatpush.bf16.msrb.mxu1 %v2909_v9 }
0x119c   :  { %3097 = vrsqrt.f32 %v1539_v12  ;;  %vm1548_vm5 = vmor %vm1546_vm4, %vm1547_vm3  ;;  %vm1556_vm7 = vweird.f32 %v1539_v12 }
0x119d   :  { %v1542_v16 = vmul.f32 %v3096_v11, %v1541_v13 }
0x119f   :  { %v1543_v17 = vmul.f32 0.5, %v1542_v16 }
0x11a1   :  { %v1544_v19 = vsub.f32 1.5, %v1543_v17 }
0x11a2   :  { %v3098_v20 = vpop.eup %3097 }
0x11a3   :  { %v1545_v21 = vmul.f32 %v3096_v11, %v1544_v19  ;;  %v1551_v23 = vmul.f32 %v3098_v20, %v1539_v12  ;;  %vm1557_vm6 = vweird.f32 %v3098_v20 }
0x11a4   :  { %vm1558_vm8 = vmor %vm1556_vm7, %vm1557_vm6 }
0x11a5   :  { %v1552_v51 = vmul.f32 %v3098_v20, %v1551_v23  ;;  %v1549_v24 = vsel %vm1548_vm5, %v3096_v11, %v1545_v21 }
0x11a6   :  { %v1560_v29 = vmul.f32 %v1549_v24, %v1526_v61 }
0x11a7   :  { %v1553_v25 = vmul.f32 0.5, %v1552_v51 }
0x11a8   :  { %v1565_v32 = vmul.f32 %v3016_v27, %v1560_v29 }
0x11a9   :  { %v1554_v26 = vsub.f32 1.5, %v1553_v25 }
0x11aa   :  { %v1570_v34 = vadd.f32 %v3017_v31, %v1565_v32 }
0x11ab   :  { %v1555_v30 = vmul.f32 %v3098_v20, %v1554_v26 }
0x11ad   :  { %v1559_v28 = vsel %vm1558_vm8, %v3098_v20, %v1555_v30 }
0x11ae   :  { %v1561_v33 = vmul.f32 %v1559_v28, %v1527_v1  ;;  %v3020_v28 = vld [vmem:[#allocation19] ss:$0 sm:$0xff] }
0x11b0   :  { %v1566_v6 = vmul.f32 %v3016_v27, %v1561_v33 }
0x11b2   :  { %v1571_v35 = vadd.f32 %v3017_v31, %v1566_v6  ;;  %v3021_v6 = vld [vmem:[#allocation20] ss:$0 sm:$0xff] }
0x11b4   :  { %v1582_v36 = vpack.c.bf16 %v1571_v35, %v1570_v34 }
0x11b6   :  { %2796 = vmatmul.msk.bf16.vlgmr.msra.gmra.mxu2 %vm402_vm0, %v1582_v36 }
0x1239   :  { %v1604_v38 = vpop.f32.mrf.mxu2 }
0x123a   :  { %v1605_v42 = vadd.f32 %v3018_v41, %v1604_v38 }
0x123c   :  { %v1609_v45 = vmax.f32 %v1605_v42, 0.0  ;;  %v3023_v42 = vld [vmem:[%s4310_s26 + $0x1] ss:$0 sm:$0xff] }
0x1241   :  { %v1606_v43 = vpop.f32.mrf.mxu2 }
0x1242   :  { %v1607_v44 = vadd.f32 %v3018_v41, %v1606_v43  ;;  %v3022_v41 = vld [vmem:[%s4311_s28 + $0x1] ss:$0 sm:$0xff] }
0x1244   :  { %v1610_v22 = vmax.f32 %v1607_v44, 0.0 }
0x1246   :  { %v1611_v46 = vpack.c.bf16 %v1610_v22, %v1609_v45 }
0x1248   :  { %2805 = vmatmul.msk.bf16.vlgmr.msrb.gmra.mxu3 %vm1627_vm9, %v1611_v46 }
0x12cb   :  { %v1640_v49 = vpop.f32.mrf.mxu3 }
0x12cc   :  { %v1641_v50 = vadd.f32 %v3019_v47, %v1640_v49 }
0x12ce   :  { %v1645_v52 = vadd.f32 %v1641_v50, %v1570_v34 }
0x12d0   :  { %v1647_v54 = vsel %vm402_vm0, %v1645_v52, 0.0 }
0x12d1   :  { %1648 = vadd.xlane.f32.xlu0 %v1647_v54 }
0x12d3   :  { %v1642_v55 = vpop.f32.mrf.mxu3 }
0x12d4   :  { %v1643_v56 = vadd.f32 %v3019_v47, %v1642_v55 }
0x12d6   :  { %v1646_v57 = vadd.f32 %v1643_v56, %v1571_v35 }
0x12d8   :  { %v1650_v58 = vsel %vm402_vm0, %v1646_v57, 0.0 }
0x12d9   :  { %1651 = vadd.xlane.f32.xlu1 %v1650_v58 }
0x1344   :  { %v1649_v61 = vpop.xlane.xlu0 %1648 }
0x1345   :  { %v1653_v62 = vmul.f32 %v1649_v61, %v3919_v14 }
0x1347   :  { %v1655_v59 = vsub.f32 %v1645_v52, %v1653_v62 }
0x1349   :  { %v1657_v0 = vmul.f32 %v1655_v59, %v1655_v59 }
0x134b   :  { %v1659_v39 = vsel %vm402_vm0, %v1657_v0, 0.0 }
0x134c   :  { %v1652_v1 = vpop.xlane.xlu1 %1651  ;;  %1660 = vadd.xlane.f32.xlu2 %v1659_v39 }
0x134d   :  { %v1654_v60 = vmul.f32 %v1652_v1, %v3919_v14 }
0x134f   :  { %v1656_v2 = vsub.f32 %v1646_v57, %v1654_v60 }
0x1351   :  { %v1658_v40 = vmul.f32 %v1656_v2, %v1656_v2 }
0x1353   :  { %v1662_v3 = vsel %vm402_vm0, %v1658_v40, 0.0 }
0x1354   :  { %1663 = vadd.xlane.f32.xlu0 %v1662_v3 }
0x13bf   :  { %v1661_v4 = vpop.xlane.xlu2 %1660 }
0x13c0   :  { %v1665_v5 = vmul.f32 %v1661_v4, %v3919_v14 }
0x13c2   :  { %v1667_v11 = vadd.f32 1e-05, %v1665_v5 }
0x13c4   :  { %3099 = vrsqrt.f32 %v1667_v11  ;;  %vm1675_vm11 = vweird.f32 %v1667_v11 }
0x13c7   :  { %v1664_v12 = vpop.xlane.xlu0 %1663 }
0x13c8   :  { %v1666_v13 = vmul.f32 %v1664_v12, %v3919_v14 }
0x13ca   :  { %v3100_v16 = vpop.eup %3099  ;;  %v1668_v17 = vadd.f32 1e-05, %v1666_v13 }
0x13cb   :  { %v1670_v19 = vmul.f32 %v3100_v16, %v1667_v11  ;;  %vm1676_vm10 = vweird.f32 %v3100_v16 }
0x13cc   :  { %3101 = vrsqrt.f32 %v1668_v17  ;;  %vm1677_vm12 = vmor %vm1675_vm11, %vm1676_vm10  ;;  %vm1685_vm14 = vweird.f32 %v1668_v17 }
0x13cd   :  { %v1671_v20 = vmul.f32 %v3100_v16, %v1670_v19 }
0x13cf   :  { %v1672_v21 = vmul.f32 0.5, %v1671_v20 }
0x13d1   :  { %v1673_v23 = vsub.f32 1.5, %v1672_v21 }
0x13d2   :  { %v3102_v51 = vpop.eup %3101 }
0x13d3   :  { %v1674_v24 = vmul.f32 %v3100_v16, %v1673_v23  ;;  %v1680_v25 = vmul.f32 %v3102_v51, %v1668_v17  ;;  %vm1686_vm13 = vweird.f32 %v3102_v51 }
0x13d4   :  { %vm1687_vm15 = vmor %vm1685_vm14, %vm1686_vm13 }
0x13d5   :  { %v1681_v26 = vmul.f32 %v3102_v51, %v1680_v25  ;;  %v1678_v27 = vsel %vm1677_vm12, %v3100_v16, %v1674_v24 }
0x13d6   :  { %v1689_v31 = vmul.f32 %v1678_v27, %v1655_v59 }
0x13d7   :  { %v1682_v29 = vmul.f32 0.5, %v1681_v26 }
0x13d8   :  { %v1694_v34 = vmul.f32 %v3020_v28, %v1689_v31 }
0x13d9   :  { %v1683_v30 = vsub.f32 1.5, %v1682_v29 }
0x13da   :  { %v4099_v63 = vadd.f32 %v3021_v6, %v1694_v34 }
0x13db   :  { %v1684_v32 = vmul.f32 %v3102_v51, %v1683_v30 }
0x13dd   :  { %v1688_v33 = vsel %vm1687_vm15, %v3102_v51, %v1684_v32 }
0x13de   :  { %v1690_v35 = vmul.f32 %v1688_v33, %v1656_v2 }
0x13e0   :  { %v1695_v36 = vmul.f32 %v3020_v28, %v1690_v35 }
0x13e2   :  { %v4101_v37 = vadd.f32 %v3021_v6, %v1695_v36 }
0x13e4   :  { %v1720_v38 = vpack.c.bf16 %v4101_v37, %v4099_v63 }
0x13e6   :  { %2818 = vmatmul.msk.bf16.vlgmr.msrb.gmra.mxu0 %vm402_vm0, %v1720_v38  ;;  %2823 = vmatmul.msk.bf16.vlgmr.msrb.gmra.mxu1 %vm402_vm0, %v1720_v38 }
0x1463   :  { %v1742_v43 = vpop.f32.mrf.mxu0  ;;  %v1765_v44 = vpop.f32.mrf.mxu1 }
0x1464   :  { %v1743_v45 = vadd.f32 %v3022_v41, %v1742_v43  ;;  %v1766_v22 = vadd.f32 %v3023_v42, %v1765_v44 }
0x1466   :  { %v1770_v46 = vpack.c.bf16 %v1743_v45, %v1743_v45  ;;  %v1772_v47 = vpack.c.bf16 %v1766_v22, %v1766_v22 }
0x1468   :  { %v1885_v49 = vunpack.c.l.b16 %v1770_v46  ;;  %v1778_v50 = vsel %vm455_vm1, %v1772_v47, 0  ;;  %v1837_v52 = vunpack.c.l.b16 %v1772_v47 }
0x1469   :  { %1787 = vmatpush.bf16.xpose.msrb.mxu2 %v1778_v50 }
0x146a   :  { %v1886_v54 = vpack.c.b16 %v1885_v49, %v1885_v49  ;;  %v4110_v55 = vpack.c.b16 %v1837_v52, %v1837_v52 }
0x146b   :  { %v1744_v56 = vpop.f32.mrf.mxu0  ;;  %v1767_v57 = vpop.f32.mrf.mxu1 }
0x146c   :  { %v1745_v58 = vadd.f32 %v3022_v41, %v1744_v56  ;;  %v1768_v61 = vadd.f32 %v3023_v42, %v1767_v57  ;;  %1889 = vrot.lane.b32.xlu1 %v4110_v55, %s3551_s13  ;;  %1887 = vrot.lane.b32.xlu0 %v1886_v54, %s3551_s13 }
0x146e   :  { %v1771_v62 = vpack.c.bf16 %v1745_v58, %v1745_v58  ;;  %v1773_v59 = vpack.c.bf16 %v1768_v61, %v1768_v61 }
0x1470   :  { %v1911_v0 = vunpack.c.l.b16 %v1771_v62  ;;  %v1797_v39 = vsel %vm455_vm1, %v1773_v59, 0  ;;  %v1861_v1 = vunpack.c.l.b16 %v1773_v59  ;;  %2824 = vmatmul.msk.bf16.vlgmr.msrb.gmra.mxu2 %vm455_vm1, %v1770_v46 }
0x1471   :  { %1806 = vmatpush.bf16.xpose.msra.mxu3 %v1797_v39 }
0x1472   :  { %v1912_v60 = vpack.c.b16 %v1911_v0, %v1911_v0  ;;  %v4117_v2 = vpack.c.b16 %v1861_v1, %v1861_v1 }
0x1474   :  { %1915 = vrot.lane.b32.xlu2 %v4117_v2, %s3551_s13  ;;  %1913 = vrot.lane.b32.xlu1 %v1912_v60, %s3551_s13 }
0x1478   :  { %2825 = vmatmul.msk.bf16.vlgmr.msra.gmra.mxu3 %vm455_vm1, %v1771_v62 }
0x14ce   :  { %v1916_v40 = vpop.permute.xlu2 %1915 }
0x14cf   :  { %v1921_v3 = vsel %vm455_vm1, %v1916_v40, 0 }
0x14d0   :  { %1930 = vmatpush.bf16.xpose.msrb.mxu3 %v1921_v3 }
0x14de   :  { %v1890_v4 = vpop.permute.xlu1 %1889  ;;  %v1888_v8 = vpop.permute.xlu0 %1887 }
0x14df   :  { %v1895_v5 = vsel %vm455_vm1, %v1890_v4, 0 }
0x14e0   :  { %1904 = vmatpush.bf16.xpose.msra.mxu2 %v1895_v5 }
0x14e6   :  { %v1914_v9 = vpop.permute.xlu1 %1913 }
0x14e7   :  { %2828 = vmatmul.msk.bf16.vlgmr.msra.gmra.mxu2 %vm455_vm1, %v1888_v8  ;;  %2829 = vmatmul.msk.bf16.vlgmr.msrb.gmra.mxu3 %vm455_vm1, %v1914_v9 }
0x14f3   :  { %v1789_v11 = vpop.f32.mrf.mxu2 }
0x14f4   :  { %v1790_v12 = vadd.f32 %v1789_v11, %v3878_v48 }
0x14f6   :  { %v1812_v13 = vsel %vm455_vm1, %v1790_v12, -inf }
0x14f7   :  { %1813 = vmax.xlane.f32.xlu0 %v1812_v13 }
0x14fb   :  { %v1791_v16 = vpop.f32.mrf.mxu2  ;;  %v1808_v17 = vpop.f32.mrf.mxu3 }
0x14fc   :  { %v1809_v19 = vadd.f32 %v1808_v17, %v3882_v53 }
0x14fe   :  { %v1815_v20 = vsel %vm455_vm1, %v1809_v19, -inf }
0x14ff   :  { %1816 = vmax.xlane.f32.xlu2 %v1815_v20 }
0x1503   :  { %v1810_v21 = vpop.f32.mrf.mxu3 }
0x156a   :  { %v1906_v23 = vpop.f32.mrf.mxu2  ;;  %v1932_v51 = vpop.f32.mrf.mxu3 }
0x156b   :  { %v1907_v24 = vadd.f32 %v1906_v23, %v3878_v48  ;;  %v1933_v25 = vadd.f32 %v1932_v51, %v3882_v53  ;;  %v1814_v26 = vpop.xlane.xlu0 %1813 }
0x156c   :  { %v1818_v27 = vsub.f32 %v1790_v12, %v1814_v26  ;;  %v2910_v26 = vld [vmem:[%s4312_s29 + $0x8] sm:$0xff] }
0x156d   :  { %v1936_v29 = vsel %vm455_vm1, %v1907_v24, -inf  ;;  %v1939_v30 = vsel %vm455_vm1, %v1933_v25, -inf  ;;  %2032 = vmatpush.bf16.msrb.mxu2 %v2910_v26 }
0x156e   :  { %v1820_v28 = vmul.f32 1.442695, %v1818_v27  ;;  %1937 = vmax.xlane.f32.xlu1 %v1936_v29  ;;  %1940 = vmax.xlane.f32.xlu0 %v1939_v30 }
0x1570   :  { %3103 = vpow2.f32 %v1820_v28 }
0x1572   :  { %v1934_v31 = vpop.f32.mrf.mxu3  ;;  %v1817_v32 = vpop.xlane.xlu2 %1816 }
0x1573   :  { %v1819_v33 = vsub.f32 %v1809_v19, %v1817_v32  ;;  %v1908_v6 = vpop.f32.mrf.mxu2 }
0x1575   :  { %v1822_v34 = vmul.f32 1.442695, %v1819_v33  ;;  %v3024_v33 = vld [vmem:[#allocation10 + $0x1] ss:$0 sm:$0xff] }
0x1576   :  { %v3104_v35 = vpop.eup %3103 }
0x1577   :  { %3105 = vpow2.f32 %v1822_v34  ;;  %v1824_v48 = vsel %vm455_vm1, %v3104_v35, 0.0 }
0x1578   :  { %1825 = vadd.xlane.f32.xlu2 %v1824_v48 }
0x157d   :  { %v3106_v53 = vpop.eup %3105 }
0x157e   :  { %v1827_v36 = vsel %vm455_vm1, %v3106_v53, 0.0 }
0x157f   :  { %1828 = vadd.xlane.f32.xlu1 %v1827_v36 }
0x1582   :  { %1839 = vrot.lane.b32.xlu0 %v4110_v55, %s3552_s3 }
0x158a   :  { %1960 = vrot.lane.b32.xlu0 %v4110_v55, %s3553_s16 }
0x1590   :  { %1863 = vrot.lane.b32.xlu2 %v4117_v2, %s3552_s3 }
0x15e1   :  { %v1938_v38 = vpop.xlane.xlu1 %1937  ;;  %v1941_v41 = vpop.xlane.xlu0 %1940 }
0x15e2   :  { %v1942_v42 = vsub.f32 %v1907_v24, %v1938_v38  ;;  %v1943_v43 = vsub.f32 %v1933_v25, %v1941_v41 }
0x15e4   :  { %v1944_v44 = vmul.f32 1.442695, %v1942_v42  ;;  %v1946_v45 = vmul.f32 1.442695, %v1943_v43 }
0x15e6   :  { %3107 = vpow2.f32 %v1944_v44 }
0x15e7   :  { %3109 = vpow2.f32 %v1946_v45 }
0x15eb   :  { %v1826_v22 = vpop.xlane.xlu2 %1825 }
0x15ec   :  { %v3108_v46 = vpop.eup %3107  ;;  %3111 = vrcp.f32 %v1826_v22 }
0x15ed   :  { %v1948_v47 = vsel %vm455_vm1, %v3108_v46, 0.0  ;;  %v3110_v49 = vpop.eup %3109 }
0x15ee   :  { %1949 = vadd.xlane.f32.xlu1 %v1948_v47  ;;  %v1951_v61 = vsel %vm455_vm1, %v3110_v49, 0.0 }
0x15f2   :  { %v3112_v50 = vpop.eup %3111  ;;  %v1829_v52 = vpop.xlane.xlu1 %1828 }
0x15f3   :  { %v1832_v54 = vmul.f32 %v3112_v50, %v3104_v35  ;;  %3113 = vrcp.f32 %v1829_v52  ;;  %v1864_v55 = vpop.permute.xlu2 %1863 }
0x15f4   :  { %v1869_v56 = vsel %vm526_vm2, %v1864_v55, 0  ;;  %v1840_v57 = vpop.permute.xlu0 %1839 }
0x15f5   :  { %1878 = vmatpush.bf16.msra.mxu1 %v1869_v56  ;;  %v1845_v58 = vsel %vm526_vm2, %v1840_v57, 0  ;;  %v1834_v62 = vpack.c.bf16 %v1832_v54, %v1832_v54  ;;  %v2911_v56 = vld [vmem:[%s4315_s12 + $0x8] sm:$0xff] }
0x15f6   :  { %1952 = vadd.xlane.f32.xlu1 %v1951_v61  ;;  %1854 = vmatpush.bf16.msra.mxu0 %v1845_v58 }
0x15f7   :  { %2134 = vmatpush.bf16.msra.mxu3 %v2911_v56 }
0x15f9   :  { %v3114_v59 = vpop.eup %3113  ;;  %2826 = vmatmul.msk.bf16.vlgmr.msra.gmra.mxu0 %vm455_vm1, %v1834_v62 }
0x15fa   :  { %v1833_v0 = vmul.f32 %v3114_v59, %v3106_v53 }
0x15fc   :  { %v1835_v39 = vpack.c.bf16 %v1833_v0, %v1833_v0  ;;  %v1961_v1 = vpop.permute.xlu0 %1960 }
0x15fd   :  { %v1966_v60 = vsel %vm526_vm2, %v1961_v1, 0 }
0x15fe   :  { %2827 = vmatmul.msk.bf16.vlgmr.msra.gmra.mxu1 %vm455_vm1, %v1835_v39  ;;  %1975 = vmatpush.bf16.msrb.mxu0 %v1966_v60 }
0x160f   :  { %1981 = vrot.lane.b32.xlu1 %v4117_v2, %s3553_s16 }
0x1661   :  { %v1950_v40 = vpop.xlane.xlu1 %1949 }
0x1662   :  { %3115 = vrcp.f32 %v1950_v40 }
0x1668   :  { %v3116_v3 = vpop.eup %3115 }
0x1669   :  { %v1956_v4 = vmul.f32 %v3116_v3, %v3108_v46  ;;  %v1953_v8 = vpop.xlane.xlu1 %1952 }
0x166a   :  { %3117 = vrcp.f32 %v1953_v8  ;;  %v3025_v8 = vld [vmem:[#allocation11 + $0x1] ss:$0 sm:$0xff] }
0x166b   :  { %v1958_v5 = vpack.c.bf16 %v1956_v4, %v1956_v4 }
0x166d   :  { %2830 = vmatmul.msk.bf16.vlgmr.msrb.gmra.mxu0 %vm455_vm1, %v1958_v5 }
0x1670   :  { %v3118_v12 = vpop.eup %3117 }
0x1671   :  { %v1957_v16 = vmul.f32 %v3118_v12, %v3110_v49 }
0x1673   :  { %v1959_v2 = vpack.c.bf16 %v1957_v16, %v1957_v16 }
0x1676   :  { %v1856_v9 = vpop.f32.mrf.mxu0 }
0x167b   :  { %v1880_v11 = vpop.f32.mrf.mxu1 }
0x167e   :  { %v1858_v13 = vpop.f32.mrf.mxu0 }
0x167f   :  { %v3026_v13 = vld [vmem:[#allocation13 + $0x1] ss:$0 sm:$0xff] }
0x1681   :  { %v1982_v17 = vpop.permute.xlu1 %1981 }
0x1682   :  { %v1987_v19 = vsel %vm526_vm2, %v1982_v17, 0 }
0x1683   :  { %v1882_v20 = vpop.f32.mrf.mxu1  ;;  %1996 = vmatpush.bf16.msrb.mxu1 %v1987_v19 }
0x1686   :  { %2831 = vmatmul.msk.bf16.vlgmr.msrb.gmra.mxu1 %vm455_vm1, %v1959_v2 }
0x16ea   :  { %v1977_v21 = vpop.f32.mrf.mxu0 }
0x16f2   :  { %v1979_v23 = vpop.f32.mrf.mxu0 }
0x16f3   :  { %v3027_v23 = vld [vmem:[%s4316_s2 + $0x1] ss:$0 sm:$0xff] }
0x1703   :  { %v1998_v51 = vpop.f32.mrf.mxu1 }
0x1704   :  { %v2993_v24 = vpack.i.bf16 %v1998_v51, %v1977_v21 }
0x1706   :  { %2994 = vrot.lane.b32.xlu2 %v2993_v24, %s3554_s23 }
0x170b   :  { %v2000_v25 = vpop.f32.mrf.mxu1 }
0x1760   :  { %v2995_v27 = vpop.permute.xlu2 %2994 }
0x1761   :  { %v2997_v29 = vunpack.i.h.bf16 %v2995_v27  ;;  %v2996_v30 = vunpack.i.l.bf16 %v2995_v27 }
0x1763   :  { %v2011_v28 = vsel %vm455_vm1, %v1880_v11, %v2997_v29  ;;  %v2010_v31 = vsel %vm455_vm1, %v1856_v9, %v2996_v30 }
0x1764   :  { %v2012_v32 = vpack.c.bf16 %v2011_v28, %v2010_v31 }
0x1766   :  { %2836 = vmatmul.msk.bf16.vlgmr.msrb.gmra.mxu2 %vm402_vm0, %v2012_v32 }
0x17e9   :  { %v2034_v6 = vpop.f32.mrf.mxu2 }
0x17ea   :  { %v2035_v34 = vadd.f32 %v3024_v33, %v2034_v6 }
0x17ec   :  { %v2039_v35 = vadd.f32 %v2035_v34, %v4099_v63 }
0x17ee   :  { %v2041_v48 = vsel %vm402_vm0, %v2039_v35, 0.0 }
0x17ef   :  { %2042 = vadd.xlane.f32.xlu0 %v2041_v48 }
0x17f1   :  { %v2036_v53 = vpop.f32.mrf.mxu2 }
0x17f2   :  { %v2037_v36 = vadd.f32 %v3024_v33, %v2036_v53 }
0x17f4   :  { %v2040_v38 = vadd.f32 %v2037_v36, %v4101_v37  ;;  %v2912_v37 = vld [vmem:[%s4313_s19 + $0x8] sm:$0xff] }
0x17f5   :  { %2157 = vmatpush.bf16.msra.mxu0 %v2912_v37 }
0x17f6   :  { %v2044_v41 = vsel %vm402_vm0, %v2040_v38, 0.0 }
0x17f7   :  { %2045 = vadd.xlane.f32.xlu2 %v2044_v41 }
0x17f8   :  { %2856 = vmatmul.msk.bf16.vlgmr.msra.gmra.mxu0 %vm402_vm0, %v3996_v7 }
0x1808   :  { %2857 = vmatmul.msk.bf16.gmra.mxu0 %vm402_vm0, %v4002_v10 }
0x1862   :  { %v2043_v42 = vpop.xlane.xlu0 %2042 }
0x1863   :  { %v2047_v43 = vmul.f32 %v2043_v42, %v3919_v14 }
0x1865   :  { %v2049_v44 = vsub.f32 %v2039_v35, %v2047_v43  ;;  %v3028_v43 = vld [vmem:[%s4317_s7 + $0x1] ss:$0 sm:$0xff] }
0x1867   :  { %v2051_v45 = vmul.f32 %v2049_v44, %v2049_v44 }
0x1869   :  { %v2053_v22 = vsel %vm402_vm0, %v2051_v45, 0.0 }
0x186a   :  { %v2046_v63 = vpop.xlane.xlu2 %2045  ;;  %2054 = vadd.xlane.f32.xlu1 %v2053_v22 }
0x186b   :  { %v2048_v46 = vmul.f32 %v2046_v63, %v3919_v14 }
0x186d   :  { %v2050_v47 = vsub.f32 %v2040_v38, %v2048_v46 }
0x186f   :  { %v2052_v49 = vmul.f32 %v2050_v47, %v2050_v47 }
0x1871   :  { %v2056_v50 = vsel %vm402_vm0, %v2052_v49, 0.0 }
0x1872   :  { %2057 = vadd.xlane.f32.xlu0 %v2056_v50 }
0x1875   :  { %v2159_v51 = vpop.f32.mrf.mxu0 }
0x1876   :  { %v2160_v24 = vadd.f32 %v3027_v23, %v2159_v51 }
0x1878   :  { %v2171_v25 = vpack.c.bf16 %v2160_v24, %v2160_v24 }
0x187a   :  { %v2177_v29 = vunpack.c.l.b16 %v2171_v25 }
0x187d   :  { %v2161_v26 = vpop.f32.mrf.mxu0 }
0x187e   :  { %v2162_v27 = vadd.f32 %v3027_v23, %v2161_v26 }
0x1880   :  { %v2172_v30 = vpack.c.bf16 %v2162_v27, %v2162_v27 }
0x1882   :  { %v2178_v28 = vunpack.c.l.b16 %v2172_v30 }
0x1884   :  { %v4184_v31 = vpack.c.b16 %v2178_v28, %v2177_v29 }
0x1885   :  { %v2164_v32 = vpop.f32.mrf.mxu0 }
0x1886   :  { %2290 = vrot.lane.b32.xlu0 %v4184_v31, %s3551_s13  ;;  %v2184_v33 = vsel %vm455_vm1, %v4184_v31, 0  ;;  %v2165_v6 = vadd.f32 %v3027_v23, %v2164_v32 }
0x1887   :  { %2193 = vmatpush.bf16.xpose.msra.mxu1 %v2184_v33 }
0x1888   :  { %v2173_v34 = vpack.c.bf16 %v2165_v6, %v2165_v6 }
0x188a   :  { %v2201_v53 = vunpack.c.l.b16 %v2173_v34 }
0x188d   :  { %v2166_v35 = vpop.f32.mrf.mxu0 }
0x188e   :  { %v2167_v48 = vadd.f32 %v3027_v23, %v2166_v35 }
0x1890   :  { %v2174_v36 = vpack.c.bf16 %v2167_v48, %v2167_v48 }
0x1892   :  { %v2202_v38 = vunpack.c.l.b16 %v2174_v36 }
0x1894   :  { %v4190_v41 = vpack.c.b16 %v2202_v38, %v2201_v53 }
0x1896   :  { %v2208_v42 = vsel %vm455_vm1, %v4190_v41, 0  ;;  %2316 = vrot.lane.b32.xlu1 %v4190_v41, %s3551_s13 }
0x1897   :  { %2217 = vmatpush.bf16.xpose.msra.mxu2 %v2208_v42 }
0x18dd   :  { %v2055_v52 = vpop.xlane.xlu1 %2054 }
0x18de   :  { %v2059_v54 = vmul.f32 %v2055_v52, %v3919_v14 }
0x18e0   :  { %v2061_v55 = vadd.f32 1e-05, %v2059_v54 }
0x18e2   :  { %3119 = vrsqrt.f32 %v2061_v55  ;;  %vm2069_vm3 = vweird.f32 %v2061_v55 }
0x18e5   :  { %v2058_v57 = vpop.xlane.xlu0 %2057 }
0x18e6   :  { %v2060_v58 = vmul.f32 %v2058_v57, %v3919_v14 }
0x18e8   :  { %v3120_v61 = vpop.eup %3119  ;;  %v2062_v62 = vadd.f32 1e-05, %v2060_v58 }
0x18e9   :  { %v2064_v59 = vmul.f32 %v3120_v61, %v2061_v55  ;;  %vm2070_vm2 = vweird.f32 %v3120_v61 }
0x18ea   :  { %3121 = vrsqrt.f32 %v2062_v62  ;;  %vm2071_vm4 = vmor %vm2069_vm3, %vm2070_vm2  ;;  %vm2079_vm6 = vweird.f32 %v2062_v62 }
0x18eb   :  { %v2065_v0 = vmul.f32 %v3120_v61, %v2064_v59 }
0x18ed   :  { %v2066_v39 = vmul.f32 0.5, %v2065_v0 }
0x18ef   :  { %v2067_v7 = vsub.f32 1.5, %v2066_v39 }
0x18f0   :  { %v3122_v1 = vpop.eup %3121 }
0x18f1   :  { %v2068_v60 = vmul.f32 %v3120_v61, %v2067_v7  ;;  %v2074_v40 = vmul.f32 %v3122_v1, %v2062_v62  ;;  %vm2080_vm5 = vweird.f32 %v3122_v1 }
0x18f2   :  { %vm2081_vm7 = vmor %vm2079_vm6, %vm2080_vm5 }
0x18f3   :  { %v2075_v10 = vmul.f32 %v3122_v1, %v2074_v40  ;;  %v2072_v3 = vsel %vm2071_vm4, %v3120_v61, %v2068_v60 }
0x18f4   :  { %v2083_v9 = vmul.f32 %v2072_v3, %v2049_v44 }
0x18f5   :  { %v2076_v4 = vmul.f32 0.5, %v2075_v10 }
0x18f6   :  { %v2088_v16 = vmul.f32 %v3025_v8, %v2083_v9 }
0x18f7   :  { %v2077_v5 = vsub.f32 1.5, %v2076_v4 }
0x18f8   :  { %v4176_v20 = vadd.f32 %v3026_v13, %v2088_v16  ;;  %v2291_v49 = vpop.permute.xlu0 %2290 }
0x18f9   :  { %v2078_v11 = vmul.f32 %v3122_v1, %v2077_v5  ;;  %v2296_v50 = vsel %vm455_vm1, %v2291_v49, 0 }
0x18fa   :  { %2305 = vmatpush.bf16.xpose.msrb.mxu2 %v2296_v50 }
0x18fb   :  { %v2082_v12 = vsel %vm2081_vm7, %v3122_v1, %v2078_v11 }
0x18fc   :  { %v2084_v17 = vmul.f32 %v2082_v12, %v2050_v47 }
0x18fe   :  { %v2089_v19 = vmul.f32 %v3025_v8, %v2084_v17 }
0x1900   :  { %v4178_v2 = vadd.f32 %v3026_v13, %v2089_v19 }
0x1902   :  { %v2114_v21 = vpack.c.bf16 %v4178_v2, %v4176_v20 }
0x1904   :  { %2851 = vmatmul.msk.bf16.vlgmr.msra.gmra.mxu3 %vm402_vm0, %v2114_v21 }
0x1908   :  { %v2317_v4 = vpop.permute.xlu1 %2316 }
0x1909   :  { %v2322_v5 = vsel %vm455_vm1, %v2317_v4, 0 }
0x1987   :  { %v2136_v44 = vpop.f32.mrf.mxu3 }
0x1988   :  { %v2137_v45 = vadd.f32 %v3028_v43, %v2136_v44 }
0x198a   :  { %v2169_v22 = vpack.c.bf16 %v2137_v45, %v2137_v45 }
0x198c   :  { %2858 = vmatmul.msk.bf16.vlgmr.msra.gmra.mxu1 %vm455_vm1, %v2169_v22  ;;  %v2286_v60 = vunpack.c.l.b16 %v2169_v22 }
0x198e   :  { %v2287_v40 = vpack.c.b16 %v2286_v60, %v2286_v60 }
0x198f   :  { %v2138_v63 = vpop.f32.mrf.mxu3 }
0x1990   :  { %v2139_v46 = vadd.f32 %v3028_v43, %v2138_v63 }
0x1992   :  { %v2170_v47 = vpack.c.bf16 %v2139_v46, %v2139_v46 }
0x1994   :  { %2859 = vmatmul.msk.bf16.vlgmr.msra.gmra.mxu2 %vm455_vm1, %v2170_v47  ;;  %v2312_v58 = vunpack.c.l.b16 %v2170_v47 }
0x1996   :  { %v2313_v61 = vpack.c.b16 %v2312_v58, %v2312_v58 }
0x1a09   :  { %v2195_v37 = vpop.f32.mrf.mxu1 }
0x1a0a   :  { %v2196_v52 = vadd.f32 %v2195_v37, %v4032_v18 }
0x1a0c   :  { %v2223_v54 = vsel %vm402_vm0, %v2196_v52, -inf }
0x1a0d   :  { %2224 = vmax.xlane.f32.xlu2 %v2223_v54 }
0x1a11   :  { %v2197_v55 = vpop.f32.mrf.mxu1 }
0x1a17   :  { %v2219_v56 = vpop.f32.mrf.mxu2 }
0x1a18   :  { %v2220_v10 = vadd.f32 %v2219_v56, %v4036_v15 }
0x1a1a   :  { %v2226_v3 = vsel %vm402_vm0, %v2220_v10, -inf }
0x1a1f   :  { %v2221_v57 = vpop.f32.mrf.mxu2 }
0x1a25   :  { %2247 = vrot.lane.b32.xlu2 %v4184_v31, %s3552_s3 }
0x1a2d   :  { %2314 = vrot.lane.b32.xlu2 %v2313_v61, %s3551_s13 }
0x1a80   :  { %v2225_v62 = vpop.xlane.xlu2 %2224 }
0x1a81   :  { %v2229_v59 = vsub.f32 %v2196_v52, %v2225_v62 }
0x1a83   :  { %v2231_v0 = vmul.f32 1.442695, %v2229_v59 }
0x1a85   :  { %3123 = vpow2.f32 %v2231_v0 }
0x1a88   :  { %v2248_v39 = vpop.permute.xlu2 %2247 }
0x1a89   :  { %2260 = vmatpush.bf16.msrb.mxu3 %v2248_v39 }
0x1a8b   :  { %v3124_v7 = vpop.eup %3123 }
0x1a8c   :  { %v2235_v1 = vsel %vm402_vm0, %v3124_v7, 0.0 }
0x1a8d   :  { %2236 = vadd.xlane.f32.xlu0 %v2235_v1  ;;  %2331 = vmatpush.bf16.xpose.msra.mxu3 %v2322_v5  ;;  %v3029_v5 = vld [vmem:[%s4320_s10 + $0x1] ss:$0 sm:$0xff] }
0x1a90   :  { %v2315_v16 = vpop.permute.xlu2 %2314 }
0x1aa1   :  { %2288 = vrot.lane.b32.xlu0 %v2287_v40, %s3551_s13 }
0x1acb   :  { %2227 = vmax.xlane.f32.xlu0 %v2226_v3 }
0x1adf   :  { %2266 = vrot.lane.b32.xlu0 %v4190_v41, %s3552_s3 }
0x1b00   :  { %v2237_v8 = vpop.xlane.xlu0 %2236 }
0x1b01   :  { %3125 = vrcp.f32 %v2237_v8 }
0x1b07   :  { %v3126_v9 = vpop.eup %3125 }
0x1b08   :  { %v2243_v11 = vmul.f32 %v3126_v9, %v3124_v7  ;;  %v2913_v7 = vld [vmem:[%s4319_s11 + $0x8] sm:$0xff] }
0x1b09   :  { %2429 = vmatpush.bf16.msra.mxu2 %v2913_v7 }
0x1b0a   :  { %v2245_v12 = vpack.c.bf16 %v2243_v11, %v2243_v11 }
0x1b0c   :  { %2860 = vmatmul.msk.bf16.vlgmr.msrb.gmra.mxu3 %vm402_vm0, %v2245_v12 }
0x1b13   :  { %v2289_v13 = vpop.permute.xlu0 %2288 }
0x1b14   :  { %2862 = vmatmul.msk.bf16.vlgmr.msrb.gmra.mxu2 %vm455_vm1, %v2289_v13 }
0x1b1c   :  { %2863 = vmatmul.msk.bf16.vlgmr.msra.gmra.mxu3 %vm455_vm1, %v2315_v16 }
0x1b3e   :  { %v2228_v17 = vpop.xlane.xlu0 %2227 }
0x1b3f   :  { %v2230_v25 = vsub.f32 %v2220_v10, %v2228_v17 }
0x1b41   :  { %v2233_v27 = vmul.f32 1.442695, %v2230_v25 }
0x1b43   :  { %3127 = vpow2.f32 %v2233_v27 }
0x1b49   :  { %v3128_v33 = vpop.eup %3127 }
0x1b4a   :  { %v2238_v34 = vsel %vm402_vm0, %v3128_v33, 0.0 }
0x1b51   :  { %v2267_v19 = vpop.permute.xlu0 %2266 }
0x1b52   :  { %2279 = vmatpush.bf16.msrb.mxu1 %v2267_v19 }
0x1b8f   :  { %v4215_v21 = vpop.f32.mrf.mxu3 }
0x1b97   :  { %v2264_v23 = vpop.f32.mrf.mxu3  ;;  %v2307_v51 = vpop.f32.mrf.mxu2 }
0x1b98   :  { %v2308_v24 = vadd.f32 %v2307_v51, %v4032_v18 }
0x1b9a   :  { %v2337_v26 = vsel %vm402_vm0, %v2308_v24, -inf }
0x1b9b   :  { %2338 = vmax.xlane.f32.xlu1 %v2337_v26 }
0x1b9f   :  { %v2309_v29 = vpop.f32.mrf.mxu2  ;;  %v2333_v30 = vpop.f32.mrf.mxu3 }
0x1ba0   :  { %v2334_v28 = vadd.f32 %v2333_v30, %v4036_v15 }
0x1ba2   :  { %v2340_v32 = vsel %vm402_vm0, %v2334_v28, -inf }
0x1ba3   :  { %2341 = vmax.xlane.f32.xlu2 %v2340_v32 }
0x1ba7   :  { %v2335_v6 = vpop.f32.mrf.mxu3 }
0x1bab   :  { %2239 = vadd.xlane.f32.xlu2 %v2238_v34 }
0x1c0e   :  { %v2339_v35 = vpop.xlane.xlu1 %2338 }
0x1c0f   :  { %v2343_v18 = vsub.f32 %v2308_v24, %v2339_v35 }
0x1c11   :  { %v2345_v48 = vmul.f32 1.442695, %v2343_v18 }
0x1c13   :  { %3129 = vpow2.f32 %v2345_v48 }
0x1c16   :  { %v2342_v53 = vpop.xlane.xlu2 %2341 }
0x1c17   :  { %v2344_v36 = vsub.f32 %v2334_v28, %v2342_v53 }
0x1c19   :  { %v3130_v38 = vpop.eup %3129  ;;  %v2347_v42 = vmul.f32 1.442695, %v2344_v36 }
0x1c1a   :  { %v2349_v43 = vsel %vm402_vm0, %v3130_v38, 0.0 }
0x1c1b   :  { %3131 = vpow2.f32 %v2347_v42  ;;  %2350 = vadd.xlane.f32.xlu1 %v2349_v43 }
0x1c1e   :  { %v2240_v15 = vpop.xlane.xlu2 %2239 }
0x1c1f   :  { %3133 = vrcp.f32 %v2240_v15 }
0x1c21   :  { %v3132_v44 = vpop.eup %3131 }
0x1c22   :  { %v2352_v45 = vsel %vm402_vm0, %v3132_v44, 0.0 }
0x1c23   :  { %2353 = vadd.xlane.f32.xlu2 %v2352_v45 }
0x1c25   :  { %v3134_v22 = vpop.eup %3133 }
0x1c26   :  { %v2244_v63 = vmul.f32 %v3134_v22, %v3128_v33  ;;  %v2914_v33 = vld [vmem:[%s4321_s8 + $0x8] sm:$0xff] }
0x1c27   :  { %2528 = vmatpush.bf16.msrb.mxu3 %v2914_v33 }
0x1c28   :  { %v2246_v46 = vpack.c.bf16 %v2244_v63, %v2244_v63 }
0x1c2a   :  { %2861 = vmatmul.msk.bf16.vlgmr.msrb.gmra.mxu1 %vm402_vm0, %v2246_v46  ;;  %v3030_v46 = vld [vmem:[%s4322_s27 + $0x1] ss:$0 sm:$0xff] }
0x1c34   :  { %2361 = vrot.lane.b32.xlu1 %v4184_v31, %s3553_s16 }
0x1c3b   :  { %2380 = vrot.lane.b32.xlu2 %v4190_v41, %s3553_s16 }
0x1c8e   :  { %v2351_v49 = vpop.xlane.xlu1 %2350 }
0x1c96   :  { %v2354_v47 = vpop.xlane.xlu2 %2353 }
0x1c97   :  { %3135 = vrcp.f32 %v2354_v47 }
0x1c98   :  { %3137 = vrcp.f32 %v2351_v49 }
0x1c9d   :  { %v3136_v50 = vpop.eup %3135 }
0x1c9e   :  { %v2358_v37 = vmul.f32 %v3136_v50, %v3132_v44  ;;  %v2381_v52 = vpop.permute.xlu2 %2380  ;;  %v3138_v55 = vpop.eup %3137 }
0x1c9f   :  { %2393 = vmatpush.bf16.msra.mxu1 %v2381_v52  ;;  %v2357_v56 = vmul.f32 %v3138_v55, %v3130_v38 }
0x1ca0   :  { %v2360_v54 = vpack.c.bf16 %v2358_v37, %v2358_v37  ;;  %v3031_v37 = vld [vmem:[#allocation14 + $0x1] ss:$0 sm:$0xff] }
0x1ca1   :  { %v2359_v31 = vpack.c.bf16 %v2357_v56, %v2357_v56 }
0x1ca2   :  { %2865 = vmatmul.msk.bf16.vlgmr.msra.gmra.mxu1 %vm402_vm0, %v2360_v54 }
0x1ca6   :  { %v2362_v57 = vpop.permute.xlu1 %2361 }
0x1ca7   :  { %v2281_v58 = vpop.f32.mrf.mxu1  ;;  %2374 = vmatpush.bf16.msrb.mxu0 %v2362_v57 }
0x1caa   :  { %2864 = vmatmul.msk.bf16.vlgmr.msrb.gmra.mxu0 %vm402_vm0, %v2359_v31  ;;  %v2916_v31 = vld [vmem:[%s4323_s0 + $0x18] sm:$0xff] }
0x1cab   :  { %2562 = vmatpush.bf16.msra.mxu0 %v2916_v31 }
0x1caf   :  { %v2283_v41 = vpop.f32.mrf.mxu1 }
0x1cb0   :  { %v2915_v41 = vld [vmem:[%s4323_s0 + $0x10] sm:$0xff] }
0x1cb1   :  { %2563 = vmatpush.bf16.msra.mxu0 %v2915_v41 }
0x1d1f   :  { %v2395_v61 = vpop.f32.mrf.mxu1 }
0x1d27   :  { %v2376_v62 = vpop.f32.mrf.mxu0  ;;  %v2397_v59 = vpop.f32.mrf.mxu1 }
0x1d28   :  { %v2998_v0 = vpack.i.bf16 %v2395_v61, %v2376_v62  ;;  %v3032_v62 = vld [vmem:[#allocation16 + $0x1] ss:$0 sm:$0xff] }
0x1d2a   :  { %2999 = vrot.lane.b32.xlu0 %v2998_v0, %s3554_s23 }
0x1d2f   :  { %v2378_v39 = vpop.f32.mrf.mxu0 }
0x1d9c   :  { %v3000_v1 = vpop.permute.xlu0 %2999 }
0x1d9d   :  { %v3002_v60 = vunpack.i.h.bf16 %v3000_v1  ;;  %v3001_v40 = vunpack.i.l.bf16 %v3000_v1 }
0x1d9f   :  { %v2408_v10 = vsel %vm455_vm1, %v2281_v58, %v3002_v60  ;;  %v2407_v3 = vsel %vm455_vm1, %v4215_v21, %v3001_v40  ;;  %v3033_v40 = vld [vmem:[#allocation17 + $0x1] ss:$0 sm:$0xff] }
0x1da0   :  { %v2409_v4 = vpack.c.bf16 %v2408_v10, %v2407_v3 }
0x1da2   :  { %2870 = vmatmul.msk.bf16.vlgmr.msra.gmra.mxu2 %vm402_vm0, %v2409_v4 }
0x1e25   :  { %v2431_v8 = vpop.f32.mrf.mxu2 }
0x1e26   :  { %v2432_v9 = vadd.f32 %v3029_v5, %v2431_v8 }
0x1e28   :  { %v2436_v11 = vadd.f32 %v2432_v9, %v4176_v20 }
0x1e2a   :  { %v2438_v12 = vsel %vm402_vm0, %v2436_v11, 0.0 }
0x1e2b   :  { %2439 = vadd.xlane.f32.xlu0 %v2438_v12 }
0x1e2d   :  { %v2433_v13 = vpop.f32.mrf.mxu2 }
0x1e2e   :  { %v2434_v16 = vadd.f32 %v3029_v5, %v2433_v13 }
0x1e30   :  { %v2437_v17 = vadd.f32 %v2434_v16, %v4178_v2 }
0x1e32   :  { %v2441_v19 = vsel %vm402_vm0, %v2437_v17, 0.0 }
0x1e33   :  { %2442 = vadd.xlane.f32.xlu1 %v2441_v19 }
0x1e9e   :  { %v2440_v21 = vpop.xlane.xlu0 %2439 }
0x1e9f   :  { %v2444_v23 = vmul.f32 %v2440_v21, %v3919_v14 }
0x1ea1   :  { %v2446_v51 = vsub.f32 %v2436_v11, %v2444_v23 }
0x1ea3   :  { %v2448_v24 = vmul.f32 %v2446_v51, %v2446_v51 }
0x1ea5   :  { %v2450_v25 = vsel %vm402_vm0, %v2448_v24, 0.0 }
0x1ea6   :  { %v2443_v26 = vpop.xlane.xlu1 %2442  ;;  %2451 = vadd.xlane.f32.xlu2 %v2450_v25 }
0x1ea7   :  { %v2445_v20 = vmul.f32 %v2443_v26, %v3919_v14 }
0x1ea9   :  { %v2447_v27 = vsub.f32 %v2437_v17, %v2445_v20 }
0x1eab   :  { %v2449_v29 = vmul.f32 %v2447_v27, %v2447_v27 }
0x1ead   :  { %v2453_v30 = vsel %vm402_vm0, %v2449_v29, 0.0 }
0x1eae   :  { %2454 = vadd.xlane.f32.xlu0 %v2453_v30  ;;  %v2917_v30 = vld [vmem:[%s3741_s20] sm:$0xff]  ;;  %s3556_s20 = smov [#allocation23]  }
0x1eaf   :  { %2649 = vmatpush.bf16.msrb.mxu1 %v2917_v30  ;;  %s2662_s30 = sshll.u32 %s3556_s20, 4  ;;  %s2663_s30 = int_to_ptr.vmem [resolvable:$true] %s2662_s30 }
0x1f19   :  { %v2452_v2 = vpop.xlane.xlu2 %2451 }
0x1f1a   :  { %v2456_v28 = vmul.f32 %v2452_v2, %v3919_v14 }
0x1f1c   :  { %v2458_v32 = vadd.f32 1e-05, %v2456_v28 }
0x1f1e   :  { %3139 = vrsqrt.f32 %v2458_v32  ;;  %vm2466_vm8 = vweird.f32 %v2458_v32 }
0x1f21   :  { %v2455_v6 = vpop.xlane.xlu0 %2454 }
0x1f22   :  { %v2457_v34 = vmul.f32 %v2455_v6, %v3919_v14 }
0x1f24   :  { %v3140_v35 = vpop.eup %3139  ;;  %v2459_v18 = vadd.f32 1e-05, %v2457_v34 }
0x1f25   :  { %v2461_v48 = vmul.f32 %v3140_v35, %v2458_v32  ;;  %vm2467_vm1 = vweird.f32 %v3140_v35 }
0x1f26   :  { %3141 = vrsqrt.f32 %v2459_v18  ;;  %vm2468_vm10 = vmor %vm2466_vm8, %vm2467_vm1  ;;  %vm2476_vm12 = vweird.f32 %v2459_v18 }
0x1f27   :  { %v2462_v53 = vmul.f32 %v3140_v35, %v2461_v48 }
0x1f29   :  { %v2463_v36 = vmul.f32 0.5, %v2462_v53 }
0x1f2b   :  { %v2464_v38 = vsub.f32 1.5, %v2463_v36 }
0x1f2c   :  { %v3142_v42 = vpop.eup %3141 }
0x1f2d   :  { %v2465_v43 = vmul.f32 %v3140_v35, %v2464_v38  ;;  %v2471_v15 = vmul.f32 %v3142_v42, %v2459_v18  ;;  %vm2477_vm11 = vweird.f32 %v3142_v42 }
0x1f2e   :  { %vm2478_vm13 = vmor %vm2476_vm12, %vm2477_vm11 }
0x1f2f   :  { %v2472_v44 = vmul.f32 %v3142_v42, %v2471_v15  ;;  %v2469_v45 = vsel %vm2468_vm10, %v3140_v35, %v2465_v43 }
0x1f30   :  { %v2480_v47 = vmul.f32 %v2469_v45, %v2446_v51 }
0x1f31   :  { %v2473_v22 = vmul.f32 0.5, %v2472_v44  ;;  %v3034_v44 = vld [vmem:[#allocation19 + $0x1] ss:$0 sm:$0xff] }
0x1f32   :  { %v2485_v52 = vmul.f32 %v3030_v46, %v2480_v47 }
0x1f33   :  { %v2474_v63 = vsub.f32 1.5, %v2473_v22 }
0x1f34   :  { %v2490_v56 = vadd.f32 %v3031_v37, %v2485_v52 }
0x1f35   :  { %v2475_v49 = vmul.f32 %v3142_v42, %v2474_v63  ;;  %v3035_v63 = vld [vmem:[#allocation20 + $0x1] ss:$0 sm:$0xff] }
0x1f37   :  { %v2479_v50 = vsel %vm2478_vm13, %v3142_v42, %v2475_v49 }
0x1f38   :  { %v2481_v54 = vmul.f32 %v2479_v50, %v2447_v27 }
0x1f3a   :  { %v2486_v55 = vmul.f32 %v3030_v46, %v2481_v54  ;;  %v3036_v54 = vld [vmem:[#allocation22] ss:$0 sm:$0xff] }
0x1f3c   :  { %v2491_v57 = vadd.f32 %v3031_v37, %v2486_v55 }
0x1f3e   :  { %v2508_v58 = vpack.c.bf16 %v2491_v57, %v2490_v56 }
0x1f40   :  { %2881 = vmatmul.msk.bf16.vlgmr.msrb.gmra.mxu3 %vm402_vm0, %v2508_v58 }
0x1fc3   :  { %v2530_v61 = vpop.f32.mrf.mxu3 }
0x1fc4   :  { %v2531_v59 = vadd.f32 %v3032_v62, %v2530_v61 }
0x1fc6   :  { %v2535_v7 = vmax.f32 %v2531_v59, 0.0 }
0x1fcb   :  { %v2532_v0 = vpop.f32.mrf.mxu3 }
0x1fcc   :  { %v2533_v39 = vadd.f32 %v3032_v62, %v2532_v0 }
0x1fce   :  { %v2536_v1 = vmax.f32 %v2533_v39, 0.0 }
0x1fd0   :  { %v2537_v60 = vpack.c.bf16 %v2536_v1, %v2535_v7 }
0x1fd2   :  { %2890 = vmatmul.msk.bf16.vlgmr.msra.gmra.mxu0 %vm1627_vm9, %v2537_v60 }
0x204f   :  { %v2565_v10 = vpop.f32.mrf.mxu0 }
0x2050   :  { %v2566_v3 = vadd.f32 %v3033_v40, %v2565_v10 }
0x2052   :  { %v2570_v4 = vadd.f32 %v2566_v3, %v2490_v56 }
0x2054   :  { %v2572_v5 = vsel %vm402_vm0, %v2570_v4, 0.0 }
0x2055   :  { %2573 = vadd.xlane.f32.xlu1 %v2572_v5 }
0x2057   :  { %v2567_v8 = vpop.f32.mrf.mxu0 }
0x2058   :  { %v2568_v9 = vadd.f32 %v3033_v40, %v2567_v8 }
0x205a   :  { %v2571_v11 = vadd.f32 %v2568_v9, %v2491_v57 }
0x205c   :  { %v2575_v12 = vsel %vm402_vm0, %v2571_v11, 0.0 }
0x205d   :  { %2576 = vadd.xlane.f32.xlu0 %v2575_v12 }
0x20c8   :  { %v2574_v13 = vpop.xlane.xlu1 %2573 }
0x20c9   :  { %v2578_v16 = vmul.f32 %v2574_v13, %v3919_v14 }
0x20cb   :  { %v2580_v17 = vsub.f32 %v2570_v4, %v2578_v16 }
0x20cd   :  { %v2582_v19 = vmul.f32 %v2580_v17, %v2580_v17 }
0x20cf   :  { %v2584_v21 = vsel %vm402_vm0, %v2582_v19, 0.0 }
0x20d0   :  { %v2577_v23 = vpop.xlane.xlu0 %2576  ;;  %2585 = vadd.xlane.f32.xlu2 %v2584_v21 }
0x20d1   :  { %v2579_v51 = vmul.f32 %v2577_v23, %v3919_v14 }
0x20d3   :  { %v2581_v24 = vsub.f32 %v2571_v11, %v2579_v51 }
0x20d5   :  { %v2583_v25 = vmul.f32 %v2581_v24, %v2581_v24 }
0x20d7   :  { %v2587_v26 = vsel %vm402_vm0, %v2583_v25, 0.0 }
0x20d8   :  { %2588 = vadd.xlane.f32.xlu1 %v2587_v26 }
0x2143   :  { %v2586_v20 = vpop.xlane.xlu2 %2585 }
0x2144   :  { %v2590_v27 = vmul.f32 %v2586_v20, %v3919_v14 }
0x2146   :  { %v2592_v29 = vadd.f32 1e-05, %v2590_v27 }
0x2148   :  { %3143 = vrsqrt.f32 %v2592_v29  ;;  %vm2600_vm14 = vweird.f32 %v2592_v29 }
0x214b   :  { %v2589_v2 = vpop.xlane.xlu1 %2588 }
0x214c   :  { %v2591_v28 = vmul.f32 %v2589_v2, %v3919_v14 }
0x214e   :  { %v3144_v32 = vpop.eup %3143  ;;  %v2593_v33 = vadd.f32 1e-05, %v2591_v28 }
0x214f   :  { %v2595_v6 = vmul.f32 %v3144_v32, %v2592_v29  ;;  %vm2601_vm9 = vweird.f32 %v3144_v32 }
0x2150   :  { %3145 = vrsqrt.f32 %v2593_v33  ;;  %vm2602_vm15 = vmor %vm2600_vm14, %vm2601_vm9  ;;  %vm2610_vm3 = vweird.f32 %v2593_v33 }
0x2151   :  { %v2596_v34 = vmul.f32 %v3144_v32, %v2595_v6 }
0x2153   :  { %v2597_v35 = vmul.f32 0.5, %v2596_v34 }
0x2155   :  { %v2598_v18 = vsub.f32 1.5, %v2597_v35 }
0x2156   :  { %v3146_v48 = vpop.eup %3145 }
0x2157   :  { %v2599_v53 = vmul.f32 %v3144_v32, %v2598_v18  ;;  %v2605_v36 = vmul.f32 %v3146_v48, %v2593_v33  ;;  %vm2611_vm2 = vweird.f32 %v3146_v48 }
0x2158   :  { %vm2612_vm4 = vmor %vm2610_vm3, %vm2611_vm2 }
0x2159   :  { %v2606_v38 = vmul.f32 %v3146_v48, %v2605_v36  ;;  %v2603_v42 = vsel %vm2602_vm15, %v3144_v32, %v2599_v53 }
0x215a   :  { %v2614_v14 = vmul.f32 %v2603_v42, %v2580_v17 }
0x215b   :  { %v2607_v43 = vmul.f32 0.5, %v2606_v38 }
0x215c   :  { %v2619_v46 = vmul.f32 %v3034_v44, %v2614_v14 }
0x215d   :  { %v2608_v15 = vsub.f32 1.5, %v2607_v43 }
0x215e   :  { %v2624_v50 = vadd.f32 %v3035_v63, %v2619_v46 }
0x215f   :  { %v2609_v45 = vmul.f32 %v3146_v48, %v2608_v15 }
0x2161   :  { %v2613_v22 = vsel %vm2612_vm4, %v3146_v48, %v2609_v45 }
0x2162   :  { %v2615_v47 = vmul.f32 %v2613_v22, %v2581_v24 }
0x2164   :  { %v2620_v49 = vmul.f32 %v3034_v44, %v2615_v47 }
0x2166   :  { %v2625_v37 = vadd.f32 %v3035_v63, %v2620_v49 }
0x2168   :  { %v2626_v52 = vpack.c.bf16 %v2625_v37, %v2624_v50 }
0x216a   :  { %2895 = vmatmul.msk.bf16.vlgmr.msrb.gmra.mxu1 %vm402_vm0, %v2626_v52 }
0x21e7   :  { %v2651_v55 = vpop.f32.mrf.mxu1 }
0x21e8   :  { %v2652_v56 = vadd.f32 %v3036_v54, %v2651_v55 }
0x21ea   :  { %2656 = vst [vmem:[#allocation23] sm:$0xff] %v2652_v56 }
0x21ef   :  { %v2653_v57 = vpop.f32.mrf.mxu1 }
0x21f0   :  { %v2654_v58 = vadd.f32 %v3036_v54, %v2653_v57 }
0x21f2   :  { %2657 = vst [vmem:[#allocation23 + $0x8] sm:$0xff] %v2654_v58 }
0x21f3   :  { %3482 = shalt.err (!%p3479_p13)
}
0x21f4   :  { %s3557_s5 = smov 128  }
0x21f5   :  { %2670 = dma.vmem_to_hbm [thread:$0]  %s2663_s30, 256, %s2665_s18, [#allocation4], %s3557_s5, %s3557_s5, %s3554_s23  }
0x21f6   :  { %3497 = dma.done.wait [#allocation4], 256  }
0x21f7   :  { %3498 = vsyncadd [#allocation4], 4294967040 }
0x21f8   :  { %2675 = vsyncpa [#allocation3], 1 }
0x21f9   :  { %2676 = vsyncpa [#allocation6], 1 }
0x21fa   :  { %2677 = vsyncpa [#allocation9], 1 }
0x21fb   :  { %2678 = vsyncpa [#allocation12], 1 }
0x21fc   :  { %2679 = vsyncpa [#allocation15], 1 }
0x21fd   :  { %2680 = vsyncpa [#allocation18], 1 }
0x21fe   :  { %2681 = vsyncpa [#allocation21], 1 }
0x21ff   :  { %2682 = vsyncpa [#allocation4], 1 }

</bundles_post_ra>
